<compile_context>
chip_gen: v5e
topology: v5e:2x2
jax: 0.10.0
libtpu: 0.0.40
codegen_flags: <defaults>
</compile_context>

<pallas_src>
import jax
import jax.numpy as jnp
from jax.experimental import pallas as pl
from jax.experimental.pallas import tpu as pltpu


# ----------------------------------------------------------------------------
# fused kernel: all layers + both directions + FC head, single invocation
# ----------------------------------------------------------------------------
def _make_fused_kernel(*, T, Bp, E, H, n_layers, num_dir, w_dtype):
    D4H = 4 * H

    def kernel(*refs):
        it = iter(refs)
        x_ref = next(it)                        # (T*Bp, E)          f32, time-major rows
        len_ref = next(it)                      # (Bp, 1)            int32
        layer_refs = [(next(it), next(it), next(it)) for _ in range(n_layers)]
        fc_w_ref = next(it)                     # (num_dir*H, O)     f32
        fc_b_ref = next(it)                     # (1, O)             f32
        out_ref = next(it)                      # (Bp, O)            f32
        gx_ref = next(it)                       # (T*Bp, num_dir*4H) f32 scratch
        y_ref = next(it)                        # (T*Bp, num_dir*H)  f32 scratch

        lengths = len_ref[...]                                  # (Bp, 1) int32
        valid = [t < lengths for t in range(T)]                 # reused across layers/dirs

        h_final = [None] * num_dir

        for layer in range(n_layers):
            w_ih_ref, w_hh_ref, b_ref = layer_refs[layer]
            store_y = layer < n_layers - 1      # last layer's y is never consumed

            # ---- hoisted input projection: ONE MXU matmul per layer -----------
            src_ref = x_ref if layer == 0 else y_ref
            gx_ref[...] = (
                jnp.dot(src_ref[...].astype(w_dtype), w_ih_ref[...],
                        preferred_element_type=jnp.float32)
                + b_ref[...])                    # (+ b_ih + b_hh), (T*Bp, num_dir*4H)

            # recurrent weights stay vreg-resident across the unrolled time loop
            w_hh = [w_hh_ref[d] for d in range(num_dir)]        # (H, 4H) bf16

            h = [jnp.zeros((Bp, H), jnp.float32) for _ in range(num_dir)]
            c = [jnp.zeros((Bp, H), jnp.float32) for _ in range(num_dir)]

            # ---- fully unrolled recurrence: static, tile-aligned slices --------
            # h/c live in vregs; only h @ W_hh stays on the sequential chain.
            # TODO(synk): for long sequences switch to lax.fori_loop carries to
            # bound trace/compile size.
            for s in range(T):
                for d in range(num_dir):
                    t_act = s if d == 0 else T - 1 - s          # reverse dir: T-1..0
                    row = t_act * Bp                            # multiple of 8
                    gates = gx_ref[pl.ds(row, Bp), pl.ds(d * D4H, D4H)] + jnp.dot(
                        h[d].astype(w_dtype), w_hh[d],
                        preferred_element_type=jnp.float32)     # (Bp, 4H) f32
                    # full-width transcendentals (EUP), then narrow selects
                    sg = jax.nn.sigmoid(gates)
                    th = jnp.tanh(gates)
                    i_g = sg[:, 0:H]
                    f_g = sg[:, H:2 * H]
                    g_g = th[:, 2 * H:3 * H]
                    o_g = sg[:, 3 * H:4 * H]
                    c_raw = f_g * c[d] + i_g * g_g
                    h_raw = o_g * jnp.tanh(c_raw)
                    # packed-sequence mask: only update state for valid timesteps
                    m = valid[t_act]                            # (Bp, 1) bool
                    c[d] = jnp.where(m, c_raw, c[d])
                    h[d] = jnp.where(m, h_raw, h[d])
                    if store_y:
                        # pad_packed_sequence: padded positions are zero
                        y_ref[pl.ds(row, Bp), pl.ds(d * H, H)] = jnp.where(
                            m, h_raw, jnp.zeros_like(h_raw))

            for d in range(num_dir):
                h_final[d] = h[d]

        # ---- torch: hidden = cat(hidden[-2], hidden[-1]); logits = fc(hidden) --
        logits = fc_b_ref[...]                                   # (1, O)
        for d in range(num_dir):
            logits = logits + jnp.dot(h_final[d],
                                      fc_w_ref[pl.ds(d * H, H), :],
                                      preferred_element_type=jnp.float32)
        out_ref[...] = logits

    return kernel


# ----------------------------------------------------------------------------
# wrapper
# ----------------------------------------------------------------------------
def lstm_classifier_forward(text, text_lengths, params, *,
                            hidden_dim, n_layers, bidirectional):
    """text: (B, T, E) float32 (already-embedded tokens); text_lengths: (B,) int."""
    B, T, E = text.shape
    H = hidden_dim
    num_dir = 2 if bidirectional else 1
    O = params["fc_b"].shape[-1]
    w_dtype = params["layer0"]["w_ih"].dtype

    # pad the batch to a sublane multiple so every per-timestep slab slice is tile-aligned
    Bp = ((B + 7) // 8) * 8
    x = text.astype(jnp.float32)
    lens = text_lengths.astype(jnp.int32)
    if Bp != B:
        x = jnp.pad(x, ((0, Bp - B), (0, 0), (0, 0)))
        lens = jnp.pad(lens, (0, Bp - B))        # padded rows: length 0 -> h stays zero

    # time-major, flattened to a dense 2-D slab: row t*Bp + b  <->  (b, t)
    x2d = jnp.transpose(x, (1, 0, 2)).reshape(T * Bp, E)
    lens2d = lens.reshape(Bp, 1)

    inputs = [x2d, lens2d]
    in_specs = [
        pl.BlockSpec((T * Bp, E), lambda i: (0, 0)),
        pl.BlockSpec((Bp, 1), lambda i: (0, 0)),
    ]
    for layer in range(n_layers):
        p = params[f"layer{layer}"]
        in_dim = E if layer == 0 else H * num_dir
        inputs += [p["w_ih"], p["w_hh"], p["b"]]
        in_specs += [
            pl.BlockSpec((in_dim, num_dir * 4 * H), lambda i: (0, 0)),
            pl.BlockSpec((num_dir, H, 4 * H), lambda i: (0, 0, 0)),
            pl.BlockSpec((1, num_dir * 4 * H), lambda i: (0, 0)),
        ]
    inputs += [params["fc_w_t"], params["fc_b"]]
    in_specs += [
        pl.BlockSpec((num_dir * H, O), lambda i: (0, 0)),
        pl.BlockSpec((1, O), lambda i: (0, 0)),
    ]

    scratch_shapes = [
        pltpu.VMEM((T * Bp, num_dir * 4 * H), jnp.float32),   # hoisted gate projections
        pltpu.VMEM((T * Bp, num_dir * H), jnp.float32),       # layer outputs -> next layer
    ]

    kernel = _make_fused_kernel(T=T, Bp=Bp, E=E, H=H, n_layers=n_layers,
                                num_dir=num_dir, w_dtype=w_dtype)

    out = pl.pallas_call(
        kernel,
        grid=(1,),
        in_specs=in_specs,
        out_specs=pl.BlockSpec((Bp, O), lambda i: (0, 0)),
        out_shape=jax.ShapeDtypeStruct((Bp, O), jnp.float32),
        scratch_shapes=scratch_shapes,
        compiler_params=pltpu.CompilerParams(
            dimension_semantics=("arbitrary",),
            vmem_limit_bytes=64 * 1024 * 1024,
        ),
    )(*inputs)
    return out[:B]


# ----------------------------------------------------------------------------
# parameter construction (PyTorch nn.LSTM / nn.Linear shapes, packed for the kernel)
# ----------------------------------------------------------------------------
def init_params(key, embedding_dim, hidden_dim, output_dim, n_layers, bidirectional,
                w_dtype=jnp.bfloat16):
    """Per layer: w_ih (in_dim, num_dir*4H) = [W_ih_fwd^T | W_ih_bwd^T]   (bf16)
                  w_hh (num_dir, H, 4H)     = stack of W_hh_d^T           (bf16)
                  b    (1, num_dir*4H)      = per-direction (b_ih + b_hh) (f32)
    Gate order inside each 4H block is PyTorch's [i, f, g, o]."""
    H = hidden_dim
    k = 1.0 / jnp.sqrt(jnp.float32(H))
    num_dir = 2 if bidirectional else 1
    params = {}
    for layer in range(n_layers):
        in_dim = embedding_dim if layer == 0 else H * num_dir
        w_ih_list, w_hh_list, b_list = [], [], []
        for _ in range(num_dir):
            key, k1, k2, k3, k4 = jax.random.split(key, 5)
            w_ih = jax.random.uniform(k1, (4 * H, in_dim), jnp.float32, -k, k)
            w_hh = jax.random.uniform(k2, (4 * H, H), jnp.float32, -k, k)
            b_ih = jax.random.uniform(k3, (4 * H,), jnp.float32, -k, k)
            b_hh = jax.random.uniform(k4, (4 * H,), jnp.float32, -k, k)
            w_ih_list.append(w_ih.T)
            w_hh_list.append(w_hh.T)
            b_list.append(b_ih + b_hh)
        params[f"layer{layer}"] = dict(
            w_ih=jnp.concatenate(w_ih_list, axis=1).astype(w_dtype),
            w_hh=jnp.stack(w_hh_list, axis=0).astype(w_dtype),
            b=jnp.concatenate(b_list).reshape(1, num_dir * 4 * H),
        )
    fc_in = H * num_dir
    kf = 1.0 / jnp.sqrt(jnp.float32(fc_in))
    key, k1, k2 = jax.random.split(key, 3)
    fc_w = jax.random.uniform(k1, (output_dim, fc_in), jnp.float32, -kf, kf)
    fc_b = jax.random.uniform(k2, (output_dim,), jnp.float32, -kf, kf)
    params["fc_w_t"] = fc_w.T                        # (fc_in, O), kept f32 (tiny)
    params["fc_b"] = fc_b.reshape(1, output_dim)
    return params


# ----------------------------------------------------------------------------
# pure-JAX reference (same packed params, same dtype path), no Pallas
# ----------------------------------------------------------------------------
def reference_forward(text, text_lengths, params, *,
                      hidden_dim, n_layers, bidirectional):
    B, T, _ = text.shape
    H = hidden_dim
    num_dir = 2 if bidirectional else 1
    w_dtype = params["layer0"]["w_ih"].dtype
    x = text.astype(jnp.float32)                     # (B, T, in)
    lengths = text_lengths.astype(jnp.int32)
    finals = {}
    for layer in range(n_layers):
        p = params[f"layer{layer}"]
        dir_outs = []
        for d in range(num_dir):
            wih = p["w_ih"][:, d * 4 * H:(d + 1) * 4 * H]
            whh = p["w_hh"][d]
            bias = p["b"][:, d * 4 * H:(d + 1) * 4 * H]
            h = jnp.zeros((B, H), jnp.float32)
            c = jnp.zeros((B, H), jnp.float32)
            ys = [None] * T
            ts = range(T) if d == 0 else range(T - 1, -1, -1)
            for t in ts:
                xt = x[:, t, :]
                gates = (jnp.dot(xt.astype(w_dtype), wih,
                                 preferred_element_type=jnp.float32)
                         + jnp.dot(h.astype(w_dtype), whh,
                                   preferred_element_type=jnp.float32)
                         + bias)
                i_g = jax.nn.sigmoid(gates[:, 0:H])
                f_g = jax.nn.sigmoid(gates[:, H:2 * H])
                g_g = jnp.tanh(gates[:, 2 * H:3 * H])
                o_g = jax.nn.sigmoid(gates[:, 3 * H:4 * H])
                c_raw = f_g * c + i_g * g_g
                h_raw = o_g * jnp.tanh(c_raw)
                m = (t < lengths)[:, None]
                c = jnp.where(m, c_raw, c)
                h = jnp.where(m, h_raw, h)
                ys[t] = jnp.where(m, h_raw, 0.0)
            finals[(layer, d)] = h
            dir_outs.append(jnp.stack(ys, axis=1))   # (B, T, H)
        x = jnp.concatenate(dir_outs, axis=-1) if num_dir == 2 else dir_outs[0]
    out = params["fc_b"]
    for d in range(num_dir):
        out = out + jnp.dot(finals[(n_layers - 1, d)],
                            params["fc_w_t"][d * H:(d + 1) * H, :],
                            preferred_element_type=jnp.float32)
    return out


if __name__ == "__main__":
    embedding_dim, hidden_dim, output_dim = 16, 32, 3
    n_layers, bidirectional = 2, True
    B, T = 4, 8

    key = jax.random.PRNGKey(0)
    key, kx = jax.random.split(key)
    text = jax.random.normal(kx, (B, T, embedding_dim), jnp.float32)
    text_lengths = jnp.array([8, 5, 3, 6], dtype=jnp.int32)

    params = init_params(key, embedding_dim, hidden_dim, output_dim,
                         n_layers, bidirectional)

    out = lstm_classifier_forward(text, text_lengths, params,
                                  hidden_dim=hidden_dim,
                                  n_layers=n_layers,
                                  bidirectional=bidirectional)
    out = jax.block_until_ready(out)
    assert out.shape == (B, output_dim), out.shape

    ref = reference_forward(text, text_lengths, params,
                            hidden_dim=hidden_dim,
                            n_layers=n_layers,
                            bidirectional=bidirectional)
    ref = jax.block_until_ready(ref)
    assert jnp.allclose(out, ref, atol=5e-3, rtol=5e-3), (out, ref)

    print("KERNEL_OK")
</pallas_src>

<mosaic_0001>
module attributes {stable_mosaic.version = 11 : i64} {
  func.func @kernel(%arg0: i32, %arg1: memref<64x16xf32, #tpu.memory_space<vmem>>, %arg2: memref<8x1xi32, #tpu.memory_space<vmem>>, %arg3: memref<16x256xbf16, #tpu.memory_space<vmem>>, %arg4: memref<2x32x128xbf16, #tpu.memory_space<vmem>>, %arg5: memref<1x256xf32, #tpu.memory_space<vmem>>, %arg6: memref<64x256xbf16, #tpu.memory_space<vmem>>, %arg7: memref<2x32x128xbf16, #tpu.memory_space<vmem>>, %arg8: memref<1x256xf32, #tpu.memory_space<vmem>>, %arg9: memref<64x3xf32, #tpu.memory_space<vmem>>, %arg10: memref<1x3xf32, #tpu.memory_space<vmem>>, %arg11: memref<8x3xf32, #tpu.memory_space<vmem>>, %arg12: memref<64x256xf32, #tpu.memory_space<vmem>>, %arg13: memref<64x64xf32, #tpu.memory_space<vmem>>) attributes {dimension_semantics = [#tpu.dimension_semantics<arbitrary>], iteration_bounds = array<i64: 1>, scalar_prefetch = 0 : i64, scratch_operands = 2 : i64, tpu.core_type = #tpu.core_type<tc>, window_params = [{pipeline_mode = #tpu.pipeline_mode<synchronous>, transform_indices = @transform_0, window_bounds = array<i64: 64, 16>}, {pipeline_mode = #tpu.pipeline_mode<synchronous>, transform_indices = @transform_1, window_bounds = array<i64: 8, 1>}, {pipeline_mode = #tpu.pipeline_mode<synchronous>, transform_indices = @transform_2, window_bounds = array<i64: 16, 256>}, {pipeline_mode = #tpu.pipeline_mode<synchronous>, transform_indices = @transform_3, window_bounds = array<i64: 2, 32, 128>}, {pipeline_mode = #tpu.pipeline_mode<synchronous>, transform_indices = @transform_4, window_bounds = array<i64: 1, 256>}, {pipeline_mode = #tpu.pipeline_mode<synchronous>, transform_indices = @transform_5, window_bounds = array<i64: 64, 256>}, {pipeline_mode = #tpu.pipeline_mode<synchronous>, transform_indices = @transform_6, window_bounds = array<i64: 2, 32, 128>}, {pipeline_mode = #tpu.pipeline_mode<synchronous>, transform_indices = @transform_7, window_bounds = array<i64: 1, 256>}, {pipeline_mode = #tpu.pipeline_mode<synchronous>, transform_indices = @transform_8, window_bounds = array<i64: 64, 3>}, {pipeline_mode = #tpu.pipeline_mode<synchronous>, transform_indices = @transform_9, window_bounds = array<i64: 1, 3>}, {pipeline_mode = #tpu.pipeline_mode<synchronous>, transform_indices = @transform_10, window_bounds = array<i64: 8, 3>}]} {
    %c0 = arith.constant 0 : index
    %c0_0 = arith.constant 0 : index
    %0 = vector.load %arg2[%c0, %c0_0] : memref<8x1xi32, #tpu.memory_space<vmem>>, vector<8x1xi32>
    %c0_i32 = arith.constant 0 : i32
    %1 = vector.broadcast %c0_i32 : i32 to vector<8x1xi32>
    %2 = arith.cmpi sgt, %0, %1 : vector<8x1xi32>
    %c1_i32 = arith.constant 1 : i32
    %3 = vector.broadcast %c1_i32 : i32 to vector<8x1xi32>
    %4 = arith.cmpi sgt, %0, %3 : vector<8x1xi32>
    %c2_i32 = arith.constant 2 : i32
    %5 = vector.broadcast %c2_i32 : i32 to vector<8x1xi32>
    %6 = arith.cmpi sgt, %0, %5 : vector<8x1xi32>
    %c3_i32 = arith.constant 3 : i32
    %7 = vector.broadcast %c3_i32 : i32 to vector<8x1xi32>
    %8 = arith.cmpi sgt, %0, %7 : vector<8x1xi32>
    %c4_i32 = arith.constant 4 : i32
    %9 = vector.broadcast %c4_i32 : i32 to vector<8x1xi32>
    %10 = arith.cmpi sgt, %0, %9 : vector<8x1xi32>
    %c5_i32 = arith.constant 5 : i32
    %11 = vector.broadcast %c5_i32 : i32 to vector<8x1xi32>
    %12 = arith.cmpi sgt, %0, %11 : vector<8x1xi32>
    %c6_i32 = arith.constant 6 : i32
    %13 = vector.broadcast %c6_i32 : i32 to vector<8x1xi32>
    %14 = arith.cmpi sgt, %0, %13 : vector<8x1xi32>
    %c7_i32 = arith.constant 7 : i32
    %15 = vector.broadcast %c7_i32 : i32 to vector<8x1xi32>
    %16 = arith.cmpi sgt, %0, %15 : vector<8x1xi32>
    %c0_1 = arith.constant 0 : index
    %c0_2 = arith.constant 0 : index
    %17 = vector.load %arg1[%c0_1, %c0_2] : memref<64x16xf32, #tpu.memory_space<vmem>>, vector<64x16xf32>
    %18 = arith.truncf %17 : vector<64x16xf32> to vector<64x16xbf16>
    %c0_3 = arith.constant 0 : index
    %c0_4 = arith.constant 0 : index
    %19 = vector.load %arg3[%c0_3, %c0_4] : memref<16x256xbf16, #tpu.memory_space<vmem>>, vector<16x256xbf16>
    %cst = arith.constant dense<0.000000e+00> : vector<64x256xf32>
    %20 = tpu.matmul %18, %19, %cst {dimension_numbers = #tpu.dot_dimension_numbers<[1], [0], [0], [1], [0, 0, 1, 1], [], []>} : vector<64x16xbf16>, vector<16x256xbf16>, vector<64x256xf32> -> vector<64x256xf32>
    %c0_5 = arith.constant 0 : index
    %c0_6 = arith.constant 0 : index
    %21 = vector.load %arg5[%c0_5, %c0_6] : memref<1x256xf32, #tpu.memory_space<vmem>>, vector<1x256xf32>
    %22 = vector.broadcast %21 : vector<1x256xf32> to vector<64x256xf32>
    %23 = arith.addf %20, %22 : vector<64x256xf32>
    %c0_7 = arith.constant 0 : index
    %c0_8 = arith.constant 0 : index
    %24 = vector.load %arg12[%c0_7, %c0_8] : memref<64x256xf32, #tpu.memory_space<vmem>>, vector<64x256xf32>
    tpu.vector_store %arg12[%c0_7, %c0_8], %23 {strides = array<i32>} : memref<64x256xf32, #tpu.memory_space<vmem>>, vector<64x256xf32>,
    %c0_9 = arith.constant 0 : index
    %c0_10 = arith.constant 0 : index
    %c0_11 = arith.constant 0 : index
    %25 = vector.load %arg4[%c0_9, %c0_10, %c0_11] : memref<2x32x128xbf16, #tpu.memory_space<vmem>>, vector<1x32x128xbf16>
    %26 = vector.shape_cast %25 : vector<1x32x128xbf16> to vector<32x128xbf16>
    %c1 = arith.constant 1 : index
    %c0_12 = arith.constant 0 : index
    %c0_13 = arith.constant 0 : index
    %27 = vector.load %arg4[%c1, %c0_12, %c0_13] : memref<2x32x128xbf16, #tpu.memory_space<vmem>>, vector<1x32x128xbf16>
    %28 = vector.shape_cast %27 : vector<1x32x128xbf16> to vector<32x128xbf16>
    %cst_14 = arith.constant 0.000000e+00 : f32
    %29 = vector.broadcast %cst_14 : f32 to vector<8x32xf32>
    %cst_15 = arith.constant 0.000000e+00 : f32
    %30 = vector.broadcast %cst_15 : f32 to vector<8x32xf32>
    %cst_16 = arith.constant 0.000000e+00 : f32
    %31 = vector.broadcast %cst_16 : f32 to vector<8x32xf32>
    %cst_17 = arith.constant 0.000000e+00 : f32
    %32 = vector.broadcast %cst_17 : f32 to vector<8x32xf32>
    %c0_18 = arith.constant 0 : index
    %c0_19 = arith.constant 0 : index
    %33 = vector.load %arg12[%c0_18, %c0_19] : memref<64x256xf32, #tpu.memory_space<vmem>>, vector<8x128xf32>
    %34 = arith.truncf %29 : vector<8x32xf32> to vector<8x32xbf16>
    %cst_20 = arith.constant dense<0.000000e+00> : vector<8x128xf32>
    %35 = tpu.matmul %34, %26, %cst_20 {dimension_numbers = #tpu.dot_dimension_numbers<[1], [0], [0], [1], [0, 0, 1, 1], [], []>} : vector<8x32xbf16>, vector<32x128xbf16>, vector<8x128xf32> -> vector<8x128xf32>
    %36 = arith.addf %33, %35 : vector<8x128xf32>
    %37 = arith.negf %36 : vector<8x128xf32>
    %38 = math.exp %37 : vector<8x128xf32>
    %cst_21 = arith.constant 1.000000e+00 : f32
    %39 = vector.broadcast %cst_21 : f32 to vector<8x128xf32>
    %40 = arith.addf %39, %38 : vector<8x128xf32>
    %41 = arith.divf %39, %40 : vector<8x128xf32>
    %42 = math.tanh %36 : vector<8x128xf32>
    %43 = vector.extract_strided_slice %41 {offsets = [0, 0], sizes = [8, 32], strides = [1, 1]} : vector<8x128xf32> to vector<8x32xf32>
    %44 = vector.extract_strided_slice %41 {offsets = [0, 32], sizes = [8, 32], strides = [1, 1]} : vector<8x128xf32> to vector<8x32xf32>
    %45 = vector.extract_strided_slice %42 {offsets = [0, 64], sizes = [8, 32], strides = [1, 1]} : vector<8x128xf32> to vector<8x32xf32>
    %46 = vector.extract_strided_slice %41 {offsets = [0, 96], sizes = [8, 32], strides = [1, 1]} : vector<8x128xf32> to vector<8x32xf32>
    %47 = arith.mulf %44, %31 : vector<8x32xf32>
    %48 = arith.mulf %43, %45 : vector<8x32xf32>
    %49 = arith.addf %47, %48 : vector<8x32xf32>
    %50 = math.tanh %49 : vector<8x32xf32>
    %51 = arith.mulf %46, %50 : vector<8x32xf32>
    %52 = vector.shape_cast %2 : vector<8x1xi1> to vector<8x1xi1>
    %53 = vector.broadcast %52 : vector<8x1xi1> to vector<8x32xi1>
    %54 = arith.select %53, %49, %31 : vector<8x32xi1>, vector<8x32xf32>
    %55 = vector.shape_cast %2 : vector<8x1xi1> to vector<8x1xi1>
    %56 = vector.broadcast %55 : vector<8x1xi1> to vector<8x32xi1>
    %57 = arith.select %56, %51, %29 : vector<8x32xi1>, vector<8x32xf32>
    %cst_22 = arith.constant 0.000000e+00 : f32
    %58 = vector.broadcast %cst_22 : f32 to vector<8x32xf32>
    %59 = vector.shape_cast %2 : vector<8x1xi1> to vector<8x1xi1>
    %60 = vector.broadcast %59 : vector<8x1xi1> to vector<8x32xi1>
    %61 = arith.select %60, %51, %58 : vector<8x32xi1>, vector<8x32xf32>
    %c0_23 = arith.constant 0 : index
    %c0_24 = arith.constant 0 : index
    %62 = vector.load %arg13[%c0_23, %c0_24] : memref<64x64xf32, #tpu.memory_space<vmem>>, vector<8x32xf32>
    tpu.vector_store %arg13[%c0_23, %c0_24], %61 {strides = array<i32>} : memref<64x64xf32, #tpu.memory_space<vmem>>, vector<8x32xf32>,
    %c56 = arith.constant 56 : index
    %c128 = arith.constant 128 : index
    %63 = vector.load %arg12[%c56, %c128] : memref<64x256xf32, #tpu.memory_space<vmem>>, vector<8x128xf32>
    %64 = arith.truncf %30 : vector<8x32xf32> to vector<8x32xbf16>
    %cst_25 = arith.constant dense<0.000000e+00> : vector<8x128xf32>
    %65 = tpu.matmul %64, %28, %cst_25 {dimension_numbers = #tpu.dot_dimension_numbers<[1], [0], [0], [1], [0, 0, 1, 1], [], []>} : vector<8x32xbf16>, vector<32x128xbf16>, vector<8x128xf32> -> vector<8x128xf32>
    %66 = arith.addf %63, %65 : vector<8x128xf32>
    %67 = arith.negf %66 : vector<8x128xf32>
    %68 = math.exp %67 : vector<8x128xf32>
    %cst_26 = arith.constant 1.000000e+00 : f32
    %69 = vector.broadcast %cst_26 : f32 to vector<8x128xf32>
    %70 = arith.addf %69, %68 : vector<8x128xf32>
    %71 = arith.divf %69, %70 : vector<8x128xf32>
    %72 = math.tanh %66 : vector<8x128xf32>
    %73 = vector.extract_strided_slice %71 {offsets = [0, 0], sizes = [8, 32], strides = [1, 1]} : vector<8x128xf32> to vector<8x32xf32>
    %74 = vector.extract_strided_slice %71 {offsets = [0, 32], sizes = [8, 32], strides = [1, 1]} : vector<8x128xf32> to vector<8x32xf32>
    %75 = vector.extract_strided_slice %72 {offsets = [0, 64], sizes = [8, 32], strides = [1, 1]} : vector<8x128xf32> to vector<8x32xf32>
    %76 = vector.extract_strided_slice %71 {offsets = [0, 96], sizes = [8, 32], strides = [1, 1]} : vector<8x128xf32> to vector<8x32xf32>
    %77 = arith.mulf %74, %32 : vector<8x32xf32>
    %78 = arith.mulf %73, %75 : vector<8x32xf32>
    %79 = arith.addf %77, %78 : vector<8x32xf32>
    %80 = math.tanh %79 : vector<8x32xf32>
    %81 = arith.mulf %76, %80 : vector<8x32xf32>
    %82 = vector.shape_cast %16 : vector<8x1xi1> to vector<8x1xi1>
    %83 = vector.broadcast %82 : vector<8x1xi1> to vector<8x32xi1>
    %84 = arith.select %83, %79, %32 : vector<8x32xi1>, vector<8x32xf32>
    %85 = vector.shape_cast %16 : vector<8x1xi1> to vector<8x1xi1>
    %86 = vector.broadcast %85 : vector<8x1xi1> to vector<8x32xi1>
    %87 = arith.select %86, %81, %30 : vector<8x32xi1>, vector<8x32xf32>
    %cst_27 = arith.constant 0.000000e+00 : f32
    %88 = vector.broadcast %cst_27 : f32 to vector<8x32xf32>
    %89 = vector.shape_cast %16 : vector<8x1xi1> to vector<8x1xi1>
    %90 = vector.broadcast %89 : vector<8x1xi1> to vector<8x32xi1>
    %91 = arith.select %90, %81, %88 : vector<8x32xi1>, vector<8x32xf32>
    %c56_28 = arith.constant 56 : index
    %c32 = arith.constant 32 : index
    %92 = vector.load %arg13[%c56_28, %c32] : memref<64x64xf32, #tpu.memory_space<vmem>>, vector<8x32xf32>
    tpu.vector_store %arg13[%c56_28, %c32], %91 {strides = array<i32>} : memref<64x64xf32, #tpu.memory_space<vmem>>, vector<8x32xf32>,
    %c8 = arith.constant 8 : index
    %c0_29 = arith.constant 0 : index
    %93 = vector.load %arg12[%c8, %c0_29] : memref<64x256xf32, #tpu.memory_space<vmem>>, vector<8x128xf32>
    %94 = arith.truncf %57 : vector<8x32xf32> to vector<8x32xbf16>
    %cst_30 = arith.constant dense<0.000000e+00> : vector<8x128xf32>
    %95 = tpu.matmul %94, %26, %cst_30 {dimension_numbers = #tpu.dot_dimension_numbers<[1], [0], [0], [1], [0, 0, 1, 1], [], []>} : vector<8x32xbf16>, vector<32x128xbf16>, vector<8x128xf32> -> vector<8x128xf32>
    %96 = arith.addf %93, %95 : vector<8x128xf32>
    %97 = arith.negf %96 : vector<8x128xf32>
    %98 = math.exp %97 : vector<8x128xf32>
    %cst_31 = arith.constant 1.000000e+00 : f32
    %99 = vector.broadcast %cst_31 : f32 to vector<8x128xf32>
    %100 = arith.addf %99, %98 : vector<8x128xf32>
    %101 = arith.divf %99, %100 : vector<8x128xf32>
    %102 = math.tanh %96 : vector<8x128xf32>
    %103 = vector.extract_strided_slice %101 {offsets = [0, 0], sizes = [8, 32], strides = [1, 1]} : vector<8x128xf32> to vector<8x32xf32>
    %104 = vector.extract_strided_slice %101 {offsets = [0, 32], sizes = [8, 32], strides = [1, 1]} : vector<8x128xf32> to vector<8x32xf32>
    %105 = vector.extract_strided_slice %102 {offsets = [0, 64], sizes = [8, 32], strides = [1, 1]} : vector<8x128xf32> to vector<8x32xf32>
    %106 = vector.extract_strided_slice %101 {offsets = [0, 96], sizes = [8, 32], strides = [1, 1]} : vector<8x128xf32> to vector<8x32xf32>
    %107 = arith.mulf %104, %54 : vector<8x32xf32>
    %108 = arith.mulf %103, %105 : vector<8x32xf32>
    %109 = arith.addf %107, %108 : vector<8x32xf32>
    %110 = math.tanh %109 : vector<8x32xf32>
    %111 = arith.mulf %106, %110 : vector<8x32xf32>
    %112 = vector.shape_cast %4 : vector<8x1xi1> to vector<8x1xi1>
    %113 = vector.broadcast %112 : vector<8x1xi1> to vector<8x32xi1>
    %114 = arith.select %113, %109, %54 : vector<8x32xi1>, vector<8x32xf32>
    %115 = vector.shape_cast %4 : vector<8x1xi1> to vector<8x1xi1>
    %116 = vector.broadcast %115 : vector<8x1xi1> to vector<8x32xi1>
    %117 = arith.select %116, %111, %57 : vector<8x32xi1>, vector<8x32xf32>
    %cst_32 = arith.constant 0.000000e+00 : f32
    %118 = vector.broadcast %cst_32 : f32 to vector<8x32xf32>
    %119 = vector.shape_cast %4 : vector<8x1xi1> to vector<8x1xi1>
    %120 = vector.broadcast %119 : vector<8x1xi1> to vector<8x32xi1>
    %121 = arith.select %120, %111, %118 : vector<8x32xi1>, vector<8x32xf32>
    %c8_33 = arith.constant 8 : index
    %c0_34 = arith.constant 0 : index
    %122 = vector.load %arg13[%c8_33, %c0_34] : memref<64x64xf32, #tpu.memory_space<vmem>>, vector<8x32xf32>
    tpu.vector_store %arg13[%c8_33, %c0_34], %121 {strides = array<i32>} : memref<64x64xf32, #tpu.memory_space<vmem>>, vector<8x32xf32>,
    %c48 = arith.constant 48 : index
    %c128_35 = arith.constant 128 : index
    %123 = vector.load %arg12[%c48, %c128_35] : memref<64x256xf32, #tpu.memory_space<vmem>>, vector<8x128xf32>
    %124 = arith.truncf %87 : vector<8x32xf32> to vector<8x32xbf16>
    %cst_36 = arith.constant dense<0.000000e+00> : vector<8x128xf32>
    %125 = tpu.matmul %124, %28, %cst_36 {dimension_numbers = #tpu.dot_dimension_numbers<[1], [0], [0], [1], [0, 0, 1, 1], [], []>} : vector<8x32xbf16>, vector<32x128xbf16>, vector<8x128xf32> -> vector<8x128xf32>
    %126 = arith.addf %123, %125 : vector<8x128xf32>
    %127 = arith.negf %126 : vector<8x128xf32>
    %128 = math.exp %127 : vector<8x128xf32>
    %cst_37 = arith.constant 1.000000e+00 : f32
    %129 = vector.broadcast %cst_37 : f32 to vector<8x128xf32>
    %130 = arith.addf %129, %128 : vector<8x128xf32>
    %131 = arith.divf %129, %130 : vector<8x128xf32>
    %132 = math.tanh %126 : vector<8x128xf32>
    %133 = vector.extract_strided_slice %131 {offsets = [0, 0], sizes = [8, 32], strides = [1, 1]} : vector<8x128xf32> to vector<8x32xf32>
    %134 = vector.extract_strided_slice %131 {offsets = [0, 32], sizes = [8, 32], strides = [1, 1]} : vector<8x128xf32> to vector<8x32xf32>
    %135 = vector.extract_strided_slice %132 {offsets = [0, 64], sizes = [8, 32], strides = [1, 1]} : vector<8x128xf32> to vector<8x32xf32>
    %136 = vector.extract_strided_slice %131 {offsets = [0, 96], sizes = [8, 32], strides = [1, 1]} : vector<8x128xf32> to vector<8x32xf32>
    %137 = arith.mulf %134, %84 : vector<8x32xf32>
    %138 = arith.mulf %133, %135 : vector<8x32xf32>
    %139 = arith.addf %137, %138 : vector<8x32xf32>
    %140 = math.tanh %139 : vector<8x32xf32>
    %141 = arith.mulf %136, %140 : vector<8x32xf32>
    %142 = vector.shape_cast %14 : vector<8x1xi1> to vector<8x1xi1>
    %143 = vector.broadcast %142 : vector<8x1xi1> to vector<8x32xi1>
    %144 = arith.select %143, %139, %84 : vector<8x32xi1>, vector<8x32xf32>
    %145 = vector.shape_cast %14 : vector<8x1xi1> to vector<8x1xi1>
    %146 = vector.broadcast %145 : vector<8x1xi1> to vector<8x32xi1>
    %147 = arith.select %146, %141, %87 : vector<8x32xi1>, vector<8x32xf32>
    %cst_38 = arith.constant 0.000000e+00 : f32
    %148 = vector.broadcast %cst_38 : f32 to vector<8x32xf32>
    %149 = vector.shape_cast %14 : vector<8x1xi1> to vector<8x1xi1>
    %150 = vector.broadcast %149 : vector<8x1xi1> to vector<8x32xi1>
    %151 = arith.select %150, %141, %148 : vector<8x32xi1>, vector<8x32xf32>
    %c48_39 = arith.constant 48 : index
    %c32_40 = arith.constant 32 : index
    %152 = vector.load %arg13[%c48_39, %c32_40] : memref<64x64xf32, #tpu.memory_space<vmem>>, vector<8x32xf32>
    tpu.vector_store %arg13[%c48_39, %c32_40], %151 {strides = array<i32>} : memref<64x64xf32, #tpu.memory_space<vmem>>, vector<8x32xf32>,
    %c16 = arith.constant 16 : index
    %c0_41 = arith.constant 0 : index
    %153 = vector.load %arg12[%c16, %c0_41] : memref<64x256xf32, #tpu.memory_space<vmem>>, vector<8x128xf32>
    %154 = arith.truncf %117 : vector<8x32xf32> to vector<8x32xbf16>
    %cst_42 = arith.constant dense<0.000000e+00> : vector<8x128xf32>
    %155 = tpu.matmul %154, %26, %cst_42 {dimension_numbers = #tpu.dot_dimension_numbers<[1], [0], [0], [1], [0, 0, 1, 1], [], []>} : vector<8x32xbf16>, vector<32x128xbf16>, vector<8x128xf32> -> vector<8x128xf32>
    %156 = arith.addf %153, %155 : vector<8x128xf32>
    %157 = arith.negf %156 : vector<8x128xf32>
    %158 = math.exp %157 : vector<8x128xf32>
    %cst_43 = arith.constant 1.000000e+00 : f32
    %159 = vector.broadcast %cst_43 : f32 to vector<8x128xf32>
    %160 = arith.addf %159, %158 : vector<8x128xf32>
    %161 = arith.divf %159, %160 : vector<8x128xf32>
    %162 = math.tanh %156 : vector<8x128xf32>
    %163 = vector.extract_strided_slice %161 {offsets = [0, 0], sizes = [8, 32], strides = [1, 1]} : vector<8x128xf32> to vector<8x32xf32>
    %164 = vector.extract_strided_slice %161 {offsets = [0, 32], sizes = [8, 32], strides = [1, 1]} : vector<8x128xf32> to vector<8x32xf32>
    %165 = vector.extract_strided_slice %162 {offsets = [0, 64], sizes = [8, 32], strides = [1, 1]} : vector<8x128xf32> to vector<8x32xf32>
    %166 = vector.extract_strided_slice %161 {offsets = [0, 96], sizes = [8, 32], strides = [1, 1]} : vector<8x128xf32> to vector<8x32xf32>
    %167 = arith.mulf %164, %114 : vector<8x32xf32>
    %168 = arith.mulf %163, %165 : vector<8x32xf32>
    %169 = arith.addf %167, %168 : vector<8x32xf32>
    %170 = math.tanh %169 : vector<8x32xf32>
    %171 = arith.mulf %166, %170 : vector<8x32xf32>
    %172 = vector.shape_cast %6 : vector<8x1xi1> to vector<8x1xi1>
    %173 = vector.broadcast %172 : vector<8x1xi1> to vector<8x32xi1>
    %174 = arith.select %173, %169, %114 : vector<8x32xi1>, vector<8x32xf32>
    %175 = vector.shape_cast %6 : vector<8x1xi1> to vector<8x1xi1>
    %176 = vector.broadcast %175 : vector<8x1xi1> to vector<8x32xi1>
    %177 = arith.select %176, %171, %117 : vector<8x32xi1>, vector<8x32xf32>
    %cst_44 = arith.constant 0.000000e+00 : f32
    %178 = vector.broadcast %cst_44 : f32 to vector<8x32xf32>
    %179 = vector.shape_cast %6 : vector<8x1xi1> to vector<8x1xi1>
    %180 = vector.broadcast %179 : vector<8x1xi1> to vector<8x32xi1>
    %181 = arith.select %180, %171, %178 : vector<8x32xi1>, vector<8x32xf32>
    %c16_45 = arith.constant 16 : index
    %c0_46 = arith.constant 0 : index
    %182 = vector.load %arg13[%c16_45, %c0_46] : memref<64x64xf32, #tpu.memory_space<vmem>>, vector<8x32xf32>
    tpu.vector_store %arg13[%c16_45, %c0_46], %181 {strides = array<i32>} : memref<64x64xf32, #tpu.memory_space<vmem>>, vector<8x32xf32>,
    %c40 = arith.constant 40 : index
    %c128_47 = arith.constant 128 : index
    %183 = vector.load %arg12[%c40, %c128_47] : memref<64x256xf32, #tpu.memory_space<vmem>>, vector<8x128xf32>
    %184 = arith.truncf %147 : vector<8x32xf32> to vector<8x32xbf16>
    %cst_48 = arith.constant dense<0.000000e+00> : vector<8x128xf32>
    %185 = tpu.matmul %184, %28, %cst_48 {dimension_numbers = #tpu.dot_dimension_numbers<[1], [0], [0], [1], [0, 0, 1, 1], [], []>} : vector<8x32xbf16>, vector<32x128xbf16>, vector<8x128xf32> -> vector<8x128xf32>
    %186 = arith.addf %183, %185 : vector<8x128xf32>
    %187 = arith.negf %186 : vector<8x128xf32>
    %188 = math.exp %187 : vector<8x128xf32>
    %cst_49 = arith.constant 1.000000e+00 : f32
    %189 = vector.broadcast %cst_49 : f32 to vector<8x128xf32>
    %190 = arith.addf %189, %188 : vector<8x128xf32>
    %191 = arith.divf %189, %190 : vector<8x128xf32>
    %192 = math.tanh %186 : vector<8x128xf32>
    %193 = vector.extract_strided_slice %191 {offsets = [0, 0], sizes = [8, 32], strides = [1, 1]} : vector<8x128xf32> to vector<8x32xf32>
    %194 = vector.extract_strided_slice %191 {offsets = [0, 32], sizes = [8, 32], strides = [1, 1]} : vector<8x128xf32> to vector<8x32xf32>
    %195 = vector.extract_strided_slice %192 {offsets = [0, 64], sizes = [8, 32], strides = [1, 1]} : vector<8x128xf32> to vector<8x32xf32>
    %196 = vector.extract_strided_slice %191 {offsets = [0, 96], sizes = [8, 32], strides = [1, 1]} : vector<8x128xf32> to vector<8x32xf32>
    %197 = arith.mulf %194, %144 : vector<8x32xf32>
    %198 = arith.mulf %193, %195 : vector<8x32xf32>
    %199 = arith.addf %197, %198 : vector<8x32xf32>
    %200 = math.tanh %199 : vector<8x32xf32>
    %201 = arith.mulf %196, %200 : vector<8x32xf32>
    %202 = vector.shape_cast %12 : vector<8x1xi1> to vector<8x1xi1>
    %203 = vector.broadcast %202 : vector<8x1xi1> to vector<8x32xi1>
    %204 = arith.select %203, %199, %144 : vector<8x32xi1>, vector<8x32xf32>
    %205 = vector.shape_cast %12 : vector<8x1xi1> to vector<8x1xi1>
    %206 = vector.broadcast %205 : vector<8x1xi1> to vector<8x32xi1>
    %207 = arith.select %206, %201, %147 : vector<8x32xi1>, vector<8x32xf32>
    %cst_50 = arith.constant 0.000000e+00 : f32
    %208 = vector.broadcast %cst_50 : f32 to vector<8x32xf32>
    %209 = vector.shape_cast %12 : vector<8x1xi1> to vector<8x1xi1>
    %210 = vector.broadcast %209 : vector<8x1xi1> to vector<8x32xi1>
    %211 = arith.select %210, %201, %208 : vector<8x32xi1>, vector<8x32xf32>
    %c40_51 = arith.constant 40 : index
    %c32_52 = arith.constant 32 : index
    %212 = vector.load %arg13[%c40_51, %c32_52] : memref<64x64xf32, #tpu.memory_space<vmem>>, vector<8x32xf32>
    tpu.vector_store %arg13[%c40_51, %c32_52], %211 {strides = array<i32>} : memref<64x64xf32, #tpu.memory_space<vmem>>, vector<8x32xf32>,
    %c24 = arith.constant 24 : index
    %c0_53 = arith.constant 0 : index
    %213 = vector.load %arg12[%c24, %c0_53] : memref<64x256xf32, #tpu.memory_space<vmem>>, vector<8x128xf32>
    %214 = arith.truncf %177 : vector<8x32xf32> to vector<8x32xbf16>
    %cst_54 = arith.constant dense<0.000000e+00> : vector<8x128xf32>
    %215 = tpu.matmul %214, %26, %cst_54 {dimension_numbers = #tpu.dot_dimension_numbers<[1], [0], [0], [1], [0, 0, 1, 1], [], []>} : vector<8x32xbf16>, vector<32x128xbf16>, vector<8x128xf32> -> vector<8x128xf32>
    %216 = arith.addf %213, %215 : vector<8x128xf32>
    %217 = arith.negf %216 : vector<8x128xf32>
    %218 = math.exp %217 : vector<8x128xf32>
    %cst_55 = arith.constant 1.000000e+00 : f32
    %219 = vector.broadcast %cst_55 : f32 to vector<8x128xf32>
    %220 = arith.addf %219, %218 : vector<8x128xf32>
    %221 = arith.divf %219, %220 : vector<8x128xf32>
    %222 = math.tanh %216 : vector<8x128xf32>
    %223 = vector.extract_strided_slice %221 {offsets = [0, 0], sizes = [8, 32], strides = [1, 1]} : vector<8x128xf32> to vector<8x32xf32>
    %224 = vector.extract_strided_slice %221 {offsets = [0, 32], sizes = [8, 32], strides = [1, 1]} : vector<8x128xf32> to vector<8x32xf32>
    %225 = vector.extract_strided_slice %222 {offsets = [0, 64], sizes = [8, 32], strides = [1, 1]} : vector<8x128xf32> to vector<8x32xf32>
    %226 = vector.extract_strided_slice %221 {offsets = [0, 96], sizes = [8, 32], strides = [1, 1]} : vector<8x128xf32> to vector<8x32xf32>
    %227 = arith.mulf %224, %174 : vector<8x32xf32>
    %228 = arith.mulf %223, %225 : vector<8x32xf32>
    %229 = arith.addf %227, %228 : vector<8x32xf32>
    %230 = math.tanh %229 : vector<8x32xf32>
    %231 = arith.mulf %226, %230 : vector<8x32xf32>
    %232 = vector.shape_cast %8 : vector<8x1xi1> to vector<8x1xi1>
    %233 = vector.broadcast %232 : vector<8x1xi1> to vector<8x32xi1>
    %234 = arith.select %233, %229, %174 : vector<8x32xi1>, vector<8x32xf32>
    %235 = vector.shape_cast %8 : vector<8x1xi1> to vector<8x1xi1>
    %236 = vector.broadcast %235 : vector<8x1xi1> to vector<8x32xi1>
    %237 = arith.select %236, %231, %177 : vector<8x32xi1>, vector<8x32xf32>
    %cst_56 = arith.constant 0.000000e+00 : f32
    %238 = vector.broadcast %cst_56 : f32 to vector<8x32xf32>
    %239 = vector.shape_cast %8 : vector<8x1xi1> to vector<8x1xi1>
    %240 = vector.broadcast %239 : vector<8x1xi1> to vector<8x32xi1>
    %241 = arith.select %240, %231, %238 : vector<8x32xi1>, vector<8x32xf32>
    %c24_57 = arith.constant 24 : index
    %c0_58 = arith.constant 0 : index
    %242 = vector.load %arg13[%c24_57, %c0_58] : memref<64x64xf32, #tpu.memory_space<vmem>>, vector<8x32xf32>
    tpu.vector_store %arg13[%c24_57, %c0_58], %241 {strides = array<i32>} : memref<64x64xf32, #tpu.memory_space<vmem>>, vector<8x32xf32>,
    %c32_59 = arith.constant 32 : index
    %c128_60 = arith.constant 128 : index
    %243 = vector.load %arg12[%c32_59, %c128_60] : memref<64x256xf32, #tpu.memory_space<vmem>>, vector<8x128xf32>
    %244 = arith.truncf %207 : vector<8x32xf32> to vector<8x32xbf16>
    %cst_61 = arith.constant dense<0.000000e+00> : vector<8x128xf32>
    %245 = tpu.matmul %244, %28, %cst_61 {dimension_numbers = #tpu.dot_dimension_numbers<[1], [0], [0], [1], [0, 0, 1, 1], [], []>} : vector<8x32xbf16>, vector<32x128xbf16>, vector<8x128xf32> -> vector<8x128xf32>
    %246 = arith.addf %243, %245 : vector<8x128xf32>
    %247 = arith.negf %246 : vector<8x128xf32>
    %248 = math.exp %247 : vector<8x128xf32>
    %cst_62 = arith.constant 1.000000e+00 : f32
    %249 = vector.broadcast %cst_62 : f32 to vector<8x128xf32>
    %250 = arith.addf %249, %248 : vector<8x128xf32>
    %251 = arith.divf %249, %250 : vector<8x128xf32>
    %252 = math.tanh %246 : vector<8x128xf32>
    %253 = vector.extract_strided_slice %251 {offsets = [0, 0], sizes = [8, 32], strides = [1, 1]} : vector<8x128xf32> to vector<8x32xf32>
    %254 = vector.extract_strided_slice %251 {offsets = [0, 32], sizes = [8, 32], strides = [1, 1]} : vector<8x128xf32> to vector<8x32xf32>
    %255 = vector.extract_strided_slice %252 {offsets = [0, 64], sizes = [8, 32], strides = [1, 1]} : vector<8x128xf32> to vector<8x32xf32>
    %256 = vector.extract_strided_slice %251 {offsets = [0, 96], sizes = [8, 32], strides = [1, 1]} : vector<8x128xf32> to vector<8x32xf32>
    %257 = arith.mulf %254, %204 : vector<8x32xf32>
    %258 = arith.mulf %253, %255 : vector<8x32xf32>
    %259 = arith.addf %257, %258 : vector<8x32xf32>
    %260 = math.tanh %259 : vector<8x32xf32>
    %261 = arith.mulf %256, %260 : vector<8x32xf32>
    %262 = vector.shape_cast %10 : vector<8x1xi1> to vector<8x1xi1>
    %263 = vector.broadcast %262 : vector<8x1xi1> to vector<8x32xi1>
    %264 = arith.select %263, %259, %204 : vector<8x32xi1>, vector<8x32xf32>
    %265 = vector.shape_cast %10 : vector<8x1xi1> to vector<8x1xi1>
    %266 = vector.broadcast %265 : vector<8x1xi1> to vector<8x32xi1>
    %267 = arith.select %266, %261, %207 : vector<8x32xi1>, vector<8x32xf32>
    %cst_63 = arith.constant 0.000000e+00 : f32
    %268 = vector.broadcast %cst_63 : f32 to vector<8x32xf32>
    %269 = vector.shape_cast %10 : vector<8x1xi1> to vector<8x1xi1>
    %270 = vector.broadcast %269 : vector<8x1xi1> to vector<8x32xi1>
    %271 = arith.select %270, %261, %268 : vector<8x32xi1>, vector<8x32xf32>
    %c32_64 = arith.constant 32 : index
    %c32_65 = arith.constant 32 : index
    %272 = vector.load %arg13[%c32_64, %c32_65] : memref<64x64xf32, #tpu.memory_space<vmem>>, vector<8x32xf32>
    tpu.vector_store %arg13[%c32_64, %c32_65], %271 {strides = array<i32>} : memref<64x64xf32, #tpu.memory_space<vmem>>, vector<8x32xf32>,
    %c32_66 = arith.constant 32 : index
    %c0_67 = arith.constant 0 : index
    %273 = vector.load %arg12[%c32_66, %c0_67] : memref<64x256xf32, #tpu.memory_space<vmem>>, vector<8x128xf32>
    %274 = arith.truncf %237 : vector<8x32xf32> to vector<8x32xbf16>
    %cst_68 = arith.constant dense<0.000000e+00> : vector<8x128xf32>
    %275 = tpu.matmul %274, %26, %cst_68 {dimension_numbers = #tpu.dot_dimension_numbers<[1], [0], [0], [1], [0, 0, 1, 1], [], []>} : vector<8x32xbf16>, vector<32x128xbf16>, vector<8x128xf32> -> vector<8x128xf32>
    %276 = arith.addf %273, %275 : vector<8x128xf32>
    %277 = arith.negf %276 : vector<8x128xf32>
    %278 = math.exp %277 : vector<8x128xf32>
    %cst_69 = arith.constant 1.000000e+00 : f32
    %279 = vector.broadcast %cst_69 : f32 to vector<8x128xf32>
    %280 = arith.addf %279, %278 : vector<8x128xf32>
    %281 = arith.divf %279, %280 : vector<8x128xf32>
    %282 = math.tanh %276 : vector<8x128xf32>
    %283 = vector.extract_strided_slice %281 {offsets = [0, 0], sizes = [8, 32], strides = [1, 1]} : vector<8x128xf32> to vector<8x32xf32>
    %284 = vector.extract_strided_slice %281 {offsets = [0, 32], sizes = [8, 32], strides = [1, 1]} : vector<8x128xf32> to vector<8x32xf32>
    %285 = vector.extract_strided_slice %282 {offsets = [0, 64], sizes = [8, 32], strides = [1, 1]} : vector<8x128xf32> to vector<8x32xf32>
    %286 = vector.extract_strided_slice %281 {offsets = [0, 96], sizes = [8, 32], strides = [1, 1]} : vector<8x128xf32> to vector<8x32xf32>
    %287 = arith.mulf %284, %234 : vector<8x32xf32>
    %288 = arith.mulf %283, %285 : vector<8x32xf32>
    %289 = arith.addf %287, %288 : vector<8x32xf32>
    %290 = math.tanh %289 : vector<8x32xf32>
    %291 = arith.mulf %286, %290 : vector<8x32xf32>
    %292 = vector.shape_cast %10 : vector<8x1xi1> to vector<8x1xi1>
    %293 = vector.broadcast %292 : vector<8x1xi1> to vector<8x32xi1>
    %294 = arith.select %293, %289, %234 : vector<8x32xi1>, vector<8x32xf32>
    %295 = vector.shape_cast %10 : vector<8x1xi1> to vector<8x1xi1>
    %296 = vector.broadcast %295 : vector<8x1xi1> to vector<8x32xi1>
    %297 = arith.select %296, %291, %237 : vector<8x32xi1>, vector<8x32xf32>
    %cst_70 = arith.constant 0.000000e+00 : f32
    %298 = vector.broadcast %cst_70 : f32 to vector<8x32xf32>
    %299 = vector.shape_cast %10 : vector<8x1xi1> to vector<8x1xi1>
    %300 = vector.broadcast %299 : vector<8x1xi1> to vector<8x32xi1>
    %301 = arith.select %300, %291, %298 : vector<8x32xi1>, vector<8x32xf32>
    %c32_71 = arith.constant 32 : index
    %c0_72 = arith.constant 0 : index
    %302 = vector.load %arg13[%c32_71, %c0_72] : memref<64x64xf32, #tpu.memory_space<vmem>>, vector<8x32xf32>
    tpu.vector_store %arg13[%c32_71, %c0_72], %301 {strides = array<i32>} : memref<64x64xf32, #tpu.memory_space<vmem>>, vector<8x32xf32>,
    %c24_73 = arith.constant 24 : index
    %c128_74 = arith.constant 128 : index
    %303 = vector.load %arg12[%c24_73, %c128_74] : memref<64x256xf32, #tpu.memory_space<vmem>>, vector<8x128xf32>
    %304 = arith.truncf %267 : vector<8x32xf32> to vector<8x32xbf16>
    %cst_75 = arith.constant dense<0.000000e+00> : vector<8x128xf32>
    %305 = tpu.matmul %304, %28, %cst_75 {dimension_numbers = #tpu.dot_dimension_numbers<[1], [0], [0], [1], [0, 0, 1, 1], [], []>} : vector<8x32xbf16>, vector<32x128xbf16>, vector<8x128xf32> -> vector<8x128xf32>
    %306 = arith.addf %303, %305 : vector<8x128xf32>
    %307 = arith.negf %306 : vector<8x128xf32>
    %308 = math.exp %307 : vector<8x128xf32>
    %cst_76 = arith.constant 1.000000e+00 : f32
    %309 = vector.broadcast %cst_76 : f32 to vector<8x128xf32>
    %310 = arith.addf %309, %308 : vector<8x128xf32>
    %311 = arith.divf %309, %310 : vector<8x128xf32>
    %312 = math.tanh %306 : vector<8x128xf32>
    %313 = vector.extract_strided_slice %311 {offsets = [0, 0], sizes = [8, 32], strides = [1, 1]} : vector<8x128xf32> to vector<8x32xf32>
    %314 = vector.extract_strided_slice %311 {offsets = [0, 32], sizes = [8, 32], strides = [1, 1]} : vector<8x128xf32> to vector<8x32xf32>
    %315 = vector.extract_strided_slice %312 {offsets = [0, 64], sizes = [8, 32], strides = [1, 1]} : vector<8x128xf32> to vector<8x32xf32>
    %316 = vector.extract_strided_slice %311 {offsets = [0, 96], sizes = [8, 32], strides = [1, 1]} : vector<8x128xf32> to vector<8x32xf32>
    %317 = arith.mulf %314, %264 : vector<8x32xf32>
    %318 = arith.mulf %313, %315 : vector<8x32xf32>
    %319 = arith.addf %317, %318 : vector<8x32xf32>
    %320 = math.tanh %319 : vector<8x32xf32>
    %321 = arith.mulf %316, %320 : vector<8x32xf32>
    %322 = vector.shape_cast %8 : vector<8x1xi1> to vector<8x1xi1>
    %323 = vector.broadcast %322 : vector<8x1xi1> to vector<8x32xi1>
    %324 = arith.select %323, %319, %264 : vector<8x32xi1>, vector<8x32xf32>
    %325 = vector.shape_cast %8 : vector<8x1xi1> to vector<8x1xi1>
    %326 = vector.broadcast %325 : vector<8x1xi1> to vector<8x32xi1>
    %327 = arith.select %326, %321, %267 : vector<8x32xi1>, vector<8x32xf32>
    %cst_77 = arith.constant 0.000000e+00 : f32
    %328 = vector.broadcast %cst_77 : f32 to vector<8x32xf32>
    %329 = vector.shape_cast %8 : vector<8x1xi1> to vector<8x1xi1>
    %330 = vector.broadcast %329 : vector<8x1xi1> to vector<8x32xi1>
    %331 = arith.select %330, %321, %328 : vector<8x32xi1>, vector<8x32xf32>
    %c24_78 = arith.constant 24 : index
    %c32_79 = arith.constant 32 : index
    %332 = vector.load %arg13[%c24_78, %c32_79] : memref<64x64xf32, #tpu.memory_space<vmem>>, vector<8x32xf32>
    tpu.vector_store %arg13[%c24_78, %c32_79], %331 {strides = array<i32>} : memref<64x64xf32, #tpu.memory_space<vmem>>, vector<8x32xf32>,
    %c40_80 = arith.constant 40 : index
    %c0_81 = arith.constant 0 : index
    %333 = vector.load %arg12[%c40_80, %c0_81] : memref<64x256xf32, #tpu.memory_space<vmem>>, vector<8x128xf32>
    %334 = arith.truncf %297 : vector<8x32xf32> to vector<8x32xbf16>
    %cst_82 = arith.constant dense<0.000000e+00> : vector<8x128xf32>
    %335 = tpu.matmul %334, %26, %cst_82 {dimension_numbers = #tpu.dot_dimension_numbers<[1], [0], [0], [1], [0, 0, 1, 1], [], []>} : vector<8x32xbf16>, vector<32x128xbf16>, vector<8x128xf32> -> vector<8x128xf32>
    %336 = arith.addf %333, %335 : vector<8x128xf32>
    %337 = arith.negf %336 : vector<8x128xf32>
    %338 = math.exp %337 : vector<8x128xf32>
    %cst_83 = arith.constant 1.000000e+00 : f32
    %339 = vector.broadcast %cst_83 : f32 to vector<8x128xf32>
    %340 = arith.addf %339, %338 : vector<8x128xf32>
    %341 = arith.divf %339, %340 : vector<8x128xf32>
    %342 = math.tanh %336 : vector<8x128xf32>
    %343 = vector.extract_strided_slice %341 {offsets = [0, 0], sizes = [8, 32], strides = [1, 1]} : vector<8x128xf32> to vector<8x32xf32>
    %344 = vector.extract_strided_slice %341 {offsets = [0, 32], sizes = [8, 32], strides = [1, 1]} : vector<8x128xf32> to vector<8x32xf32>
    %345 = vector.extract_strided_slice %342 {offsets = [0, 64], sizes = [8, 32], strides = [1, 1]} : vector<8x128xf32> to vector<8x32xf32>
    %346 = vector.extract_strided_slice %341 {offsets = [0, 96], sizes = [8, 32], strides = [1, 1]} : vector<8x128xf32> to vector<8x32xf32>
    %347 = arith.mulf %344, %294 : vector<8x32xf32>
    %348 = arith.mulf %343, %345 : vector<8x32xf32>
    %349 = arith.addf %347, %348 : vector<8x32xf32>
    %350 = math.tanh %349 : vector<8x32xf32>
    %351 = arith.mulf %346, %350 : vector<8x32xf32>
    %352 = vector.shape_cast %12 : vector<8x1xi1> to vector<8x1xi1>
    %353 = vector.broadcast %352 : vector<8x1xi1> to vector<8x32xi1>
    %354 = arith.select %353, %349, %294 : vector<8x32xi1>, vector<8x32xf32>
    %355 = vector.shape_cast %12 : vector<8x1xi1> to vector<8x1xi1>
    %356 = vector.broadcast %355 : vector<8x1xi1> to vector<8x32xi1>
    %357 = arith.select %356, %351, %297 : vector<8x32xi1>, vector<8x32xf32>
    %cst_84 = arith.constant 0.000000e+00 : f32
    %358 = vector.broadcast %cst_84 : f32 to vector<8x32xf32>
    %359 = vector.shape_cast %12 : vector<8x1xi1> to vector<8x1xi1>
    %360 = vector.broadcast %359 : vector<8x1xi1> to vector<8x32xi1>
    %361 = arith.select %360, %351, %358 : vector<8x32xi1>, vector<8x32xf32>
    %c40_85 = arith.constant 40 : index
    %c0_86 = arith.constant 0 : index
    %362 = vector.load %arg13[%c40_85, %c0_86] : memref<64x64xf32, #tpu.memory_space<vmem>>, vector<8x32xf32>
    tpu.vector_store %arg13[%c40_85, %c0_86], %361 {strides = array<i32>} : memref<64x64xf32, #tpu.memory_space<vmem>>, vector<8x32xf32>,
    %c16_87 = arith.constant 16 : index
    %c128_88 = arith.constant 128 : index
    %363 = vector.load %arg12[%c16_87, %c128_88] : memref<64x256xf32, #tpu.memory_space<vmem>>, vector<8x128xf32>
    %364 = arith.truncf %327 : vector<8x32xf32> to vector<8x32xbf16>
    %cst_89 = arith.constant dense<0.000000e+00> : vector<8x128xf32>
    %365 = tpu.matmul %364, %28, %cst_89 {dimension_numbers = #tpu.dot_dimension_numbers<[1], [0], [0], [1], [0, 0, 1, 1], [], []>} : vector<8x32xbf16>, vector<32x128xbf16>, vector<8x128xf32> -> vector<8x128xf32>
    %366 = arith.addf %363, %365 : vector<8x128xf32>
    %367 = arith.negf %366 : vector<8x128xf32>
    %368 = math.exp %367 : vector<8x128xf32>
    %cst_90 = arith.constant 1.000000e+00 : f32
    %369 = vector.broadcast %cst_90 : f32 to vector<8x128xf32>
    %370 = arith.addf %369, %368 : vector<8x128xf32>
    %371 = arith.divf %369, %370 : vector<8x128xf32>
    %372 = math.tanh %366 : vector<8x128xf32>
    %373 = vector.extract_strided_slice %371 {offsets = [0, 0], sizes = [8, 32], strides = [1, 1]} : vector<8x128xf32> to vector<8x32xf32>
    %374 = vector.extract_strided_slice %371 {offsets = [0, 32], sizes = [8, 32], strides = [1, 1]} : vector<8x128xf32> to vector<8x32xf32>
    %375 = vector.extract_strided_slice %372 {offsets = [0, 64], sizes = [8, 32], strides = [1, 1]} : vector<8x128xf32> to vector<8x32xf32>
    %376 = vector.extract_strided_slice %371 {offsets = [0, 96], sizes = [8, 32], strides = [1, 1]} : vector<8x128xf32> to vector<8x32xf32>
    %377 = arith.mulf %374, %324 : vector<8x32xf32>
    %378 = arith.mulf %373, %375 : vector<8x32xf32>
    %379 = arith.addf %377, %378 : vector<8x32xf32>
    %380 = math.tanh %379 : vector<8x32xf32>
    %381 = arith.mulf %376, %380 : vector<8x32xf32>
    %382 = vector.shape_cast %6 : vector<8x1xi1> to vector<8x1xi1>
    %383 = vector.broadcast %382 : vector<8x1xi1> to vector<8x32xi1>
    %384 = arith.select %383, %379, %324 : vector<8x32xi1>, vector<8x32xf32>
    %385 = vector.shape_cast %6 : vector<8x1xi1> to vector<8x1xi1>
    %386 = vector.broadcast %385 : vector<8x1xi1> to vector<8x32xi1>
    %387 = arith.select %386, %381, %327 : vector<8x32xi1>, vector<8x32xf32>
    %cst_91 = arith.constant 0.000000e+00 : f32
    %388 = vector.broadcast %cst_91 : f32 to vector<8x32xf32>
    %389 = vector.shape_cast %6 : vector<8x1xi1> to vector<8x1xi1>
    %390 = vector.broadcast %389 : vector<8x1xi1> to vector<8x32xi1>
    %391 = arith.select %390, %381, %388 : vector<8x32xi1>, vector<8x32xf32>
    %c16_92 = arith.constant 16 : index
    %c32_93 = arith.constant 32 : index
    %392 = vector.load %arg13[%c16_92, %c32_93] : memref<64x64xf32, #tpu.memory_space<vmem>>, vector<8x32xf32>
    tpu.vector_store %arg13[%c16_92, %c32_93], %391 {strides = array<i32>} : memref<64x64xf32, #tpu.memory_space<vmem>>, vector<8x32xf32>,
    %c48_94 = arith.constant 48 : index
    %c0_95 = arith.constant 0 : index
    %393 = vector.load %arg12[%c48_94, %c0_95] : memref<64x256xf32, #tpu.memory_space<vmem>>, vector<8x128xf32>
    %394 = arith.truncf %357 : vector<8x32xf32> to vector<8x32xbf16>
    %cst_96 = arith.constant dense<0.000000e+00> : vector<8x128xf32>
    %395 = tpu.matmul %394, %26, %cst_96 {dimension_numbers = #tpu.dot_dimension_numbers<[1], [0], [0], [1], [0, 0, 1, 1], [], []>} : vector<8x32xbf16>, vector<32x128xbf16>, vector<8x128xf32> -> vector<8x128xf32>
    %396 = arith.addf %393, %395 : vector<8x128xf32>
    %397 = arith.negf %396 : vector<8x128xf32>
    %398 = math.exp %397 : vector<8x128xf32>
    %cst_97 = arith.constant 1.000000e+00 : f32
    %399 = vector.broadcast %cst_97 : f32 to vector<8x128xf32>
    %400 = arith.addf %399, %398 : vector<8x128xf32>
    %401 = arith.divf %399, %400 : vector<8x128xf32>
    %402 = math.tanh %396 : vector<8x128xf32>
    %403 = vector.extract_strided_slice %401 {offsets = [0, 0], sizes = [8, 32], strides = [1, 1]} : vector<8x128xf32> to vector<8x32xf32>
    %404 = vector.extract_strided_slice %401 {offsets = [0, 32], sizes = [8, 32], strides = [1, 1]} : vector<8x128xf32> to vector<8x32xf32>
    %405 = vector.extract_strided_slice %402 {offsets = [0, 64], sizes = [8, 32], strides = [1, 1]} : vector<8x128xf32> to vector<8x32xf32>
    %406 = vector.extract_strided_slice %401 {offsets = [0, 96], sizes = [8, 32], strides = [1, 1]} : vector<8x128xf32> to vector<8x32xf32>
    %407 = arith.mulf %404, %354 : vector<8x32xf32>
    %408 = arith.mulf %403, %405 : vector<8x32xf32>
    %409 = arith.addf %407, %408 : vector<8x32xf32>
    %410 = math.tanh %409 : vector<8x32xf32>
    %411 = arith.mulf %406, %410 : vector<8x32xf32>
    %412 = vector.shape_cast %14 : vector<8x1xi1> to vector<8x1xi1>
    %413 = vector.broadcast %412 : vector<8x1xi1> to vector<8x32xi1>
    %414 = arith.select %413, %409, %354 : vector<8x32xi1>, vector<8x32xf32>
    %415 = vector.shape_cast %14 : vector<8x1xi1> to vector<8x1xi1>
    %416 = vector.broadcast %415 : vector<8x1xi1> to vector<8x32xi1>
    %417 = arith.select %416, %411, %357 : vector<8x32xi1>, vector<8x32xf32>
    %cst_98 = arith.constant 0.000000e+00 : f32
    %418 = vector.broadcast %cst_98 : f32 to vector<8x32xf32>
    %419 = vector.shape_cast %14 : vector<8x1xi1> to vector<8x1xi1>
    %420 = vector.broadcast %419 : vector<8x1xi1> to vector<8x32xi1>
    %421 = arith.select %420, %411, %418 : vector<8x32xi1>, vector<8x32xf32>
    %c48_99 = arith.constant 48 : index
    %c0_100 = arith.constant 0 : index
    %422 = vector.load %arg13[%c48_99, %c0_100] : memref<64x64xf32, #tpu.memory_space<vmem>>, vector<8x32xf32>
    tpu.vector_store %arg13[%c48_99, %c0_100], %421 {strides = array<i32>} : memref<64x64xf32, #tpu.memory_space<vmem>>, vector<8x32xf32>,
    %c8_101 = arith.constant 8 : index
    %c128_102 = arith.constant 128 : index
    %423 = vector.load %arg12[%c8_101, %c128_102] : memref<64x256xf32, #tpu.memory_space<vmem>>, vector<8x128xf32>
    %424 = arith.truncf %387 : vector<8x32xf32> to vector<8x32xbf16>
    %cst_103 = arith.constant dense<0.000000e+00> : vector<8x128xf32>
    %425 = tpu.matmul %424, %28, %cst_103 {dimension_numbers = #tpu.dot_dimension_numbers<[1], [0], [0], [1], [0, 0, 1, 1], [], []>} : vector<8x32xbf16>, vector<32x128xbf16>, vector<8x128xf32> -> vector<8x128xf32>
    %426 = arith.addf %423, %425 : vector<8x128xf32>
    %427 = arith.negf %426 : vector<8x128xf32>
    %428 = math.exp %427 : vector<8x128xf32>
    %cst_104 = arith.constant 1.000000e+00 : f32
    %429 = vector.broadcast %cst_104 : f32 to vector<8x128xf32>
    %430 = arith.addf %429, %428 : vector<8x128xf32>
    %431 = arith.divf %429, %430 : vector<8x128xf32>
    %432 = math.tanh %426 : vector<8x128xf32>
    %433 = vector.extract_strided_slice %431 {offsets = [0, 0], sizes = [8, 32], strides = [1, 1]} : vector<8x128xf32> to vector<8x32xf32>
    %434 = vector.extract_strided_slice %431 {offsets = [0, 32], sizes = [8, 32], strides = [1, 1]} : vector<8x128xf32> to vector<8x32xf32>
    %435 = vector.extract_strided_slice %432 {offsets = [0, 64], sizes = [8, 32], strides = [1, 1]} : vector<8x128xf32> to vector<8x32xf32>
    %436 = vector.extract_strided_slice %431 {offsets = [0, 96], sizes = [8, 32], strides = [1, 1]} : vector<8x128xf32> to vector<8x32xf32>
    %437 = arith.mulf %434, %384 : vector<8x32xf32>
    %438 = arith.mulf %433, %435 : vector<8x32xf32>
    %439 = arith.addf %437, %438 : vector<8x32xf32>
    %440 = math.tanh %439 : vector<8x32xf32>
    %441 = arith.mulf %436, %440 : vector<8x32xf32>
    %442 = vector.shape_cast %4 : vector<8x1xi1> to vector<8x1xi1>
    %443 = vector.broadcast %442 : vector<8x1xi1> to vector<8x32xi1>
    %444 = arith.select %443, %439, %384 : vector<8x32xi1>, vector<8x32xf32>
    %445 = vector.shape_cast %4 : vector<8x1xi1> to vector<8x1xi1>
    %446 = vector.broadcast %445 : vector<8x1xi1> to vector<8x32xi1>
    %447 = arith.select %446, %441, %387 : vector<8x32xi1>, vector<8x32xf32>
    %cst_105 = arith.constant 0.000000e+00 : f32
    %448 = vector.broadcast %cst_105 : f32 to vector<8x32xf32>
    %449 = vector.shape_cast %4 : vector<8x1xi1> to vector<8x1xi1>
    %450 = vector.broadcast %449 : vector<8x1xi1> to vector<8x32xi1>
    %451 = arith.select %450, %441, %448 : vector<8x32xi1>, vector<8x32xf32>
    %c8_106 = arith.constant 8 : index
    %c32_107 = arith.constant 32 : index
    %452 = vector.load %arg13[%c8_106, %c32_107] : memref<64x64xf32, #tpu.memory_space<vmem>>, vector<8x32xf32>
    tpu.vector_store %arg13[%c8_106, %c32_107], %451 {strides = array<i32>} : memref<64x64xf32, #tpu.memory_space<vmem>>, vector<8x32xf32>,
    %c56_108 = arith.constant 56 : index
    %c0_109 = arith.constant 0 : index
    %453 = vector.load %arg12[%c56_108, %c0_109] : memref<64x256xf32, #tpu.memory_space<vmem>>, vector<8x128xf32>
    %454 = arith.truncf %417 : vector<8x32xf32> to vector<8x32xbf16>
    %cst_110 = arith.constant dense<0.000000e+00> : vector<8x128xf32>
    %455 = tpu.matmul %454, %26, %cst_110 {dimension_numbers = #tpu.dot_dimension_numbers<[1], [0], [0], [1], [0, 0, 1, 1], [], []>} : vector<8x32xbf16>, vector<32x128xbf16>, vector<8x128xf32> -> vector<8x128xf32>
    %456 = arith.addf %453, %455 : vector<8x128xf32>
    %457 = arith.negf %456 : vector<8x128xf32>
    %458 = math.exp %457 : vector<8x128xf32>
    %cst_111 = arith.constant 1.000000e+00 : f32
    %459 = vector.broadcast %cst_111 : f32 to vector<8x128xf32>
    %460 = arith.addf %459, %458 : vector<8x128xf32>
    %461 = arith.divf %459, %460 : vector<8x128xf32>
    %462 = math.tanh %456 : vector<8x128xf32>
    %463 = vector.extract_strided_slice %461 {offsets = [0, 0], sizes = [8, 32], strides = [1, 1]} : vector<8x128xf32> to vector<8x32xf32>
    %464 = vector.extract_strided_slice %461 {offsets = [0, 32], sizes = [8, 32], strides = [1, 1]} : vector<8x128xf32> to vector<8x32xf32>
    %465 = vector.extract_strided_slice %462 {offsets = [0, 64], sizes = [8, 32], strides = [1, 1]} : vector<8x128xf32> to vector<8x32xf32>
    %466 = vector.extract_strided_slice %461 {offsets = [0, 96], sizes = [8, 32], strides = [1, 1]} : vector<8x128xf32> to vector<8x32xf32>
    %467 = arith.mulf %464, %414 : vector<8x32xf32>
    %468 = arith.mulf %463, %465 : vector<8x32xf32>
    %469 = arith.addf %467, %468 : vector<8x32xf32>
    %470 = math.tanh %469 : vector<8x32xf32>
    %471 = arith.mulf %466, %470 : vector<8x32xf32>
    %cst_112 = arith.constant 0.000000e+00 : f32
    %472 = vector.broadcast %cst_112 : f32 to vector<8x32xf32>
    %473 = vector.shape_cast %16 : vector<8x1xi1> to vector<8x1xi1>
    %474 = vector.broadcast %473 : vector<8x1xi1> to vector<8x32xi1>
    %475 = arith.select %474, %471, %472 : vector<8x32xi1>, vector<8x32xf32>
    %c56_113 = arith.constant 56 : index
    %c0_114 = arith.constant 0 : index
    %476 = vector.load %arg13[%c56_113, %c0_114] : memref<64x64xf32, #tpu.memory_space<vmem>>, vector<8x32xf32>
    tpu.vector_store %arg13[%c56_113, %c0_114], %475 {strides = array<i32>} : memref<64x64xf32, #tpu.memory_space<vmem>>, vector<8x32xf32>,
    %c0_115 = arith.constant 0 : index
    %c128_116 = arith.constant 128 : index
    %477 = vector.load %arg12[%c0_115, %c128_116] : memref<64x256xf32, #tpu.memory_space<vmem>>, vector<8x128xf32>
    %478 = arith.truncf %447 : vector<8x32xf32> to vector<8x32xbf16>
    %cst_117 = arith.constant dense<0.000000e+00> : vector<8x128xf32>
    %479 = tpu.matmul %478, %28, %cst_117 {dimension_numbers = #tpu.dot_dimension_numbers<[1], [0], [0], [1], [0, 0, 1, 1], [], []>} : vector<8x32xbf16>, vector<32x128xbf16>, vector<8x128xf32> -> vector<8x128xf32>
    %480 = arith.addf %477, %479 : vector<8x128xf32>
    %481 = arith.negf %480 : vector<8x128xf32>
    %482 = math.exp %481 : vector<8x128xf32>
    %cst_118 = arith.constant 1.000000e+00 : f32
    %483 = vector.broadcast %cst_118 : f32 to vector<8x128xf32>
    %484 = arith.addf %483, %482 : vector<8x128xf32>
    %485 = arith.divf %483, %484 : vector<8x128xf32>
    %486 = math.tanh %480 : vector<8x128xf32>
    %487 = vector.extract_strided_slice %485 {offsets = [0, 0], sizes = [8, 32], strides = [1, 1]} : vector<8x128xf32> to vector<8x32xf32>
    %488 = vector.extract_strided_slice %485 {offsets = [0, 32], sizes = [8, 32], strides = [1, 1]} : vector<8x128xf32> to vector<8x32xf32>
    %489 = vector.extract_strided_slice %486 {offsets = [0, 64], sizes = [8, 32], strides = [1, 1]} : vector<8x128xf32> to vector<8x32xf32>
    %490 = vector.extract_strided_slice %485 {offsets = [0, 96], sizes = [8, 32], strides = [1, 1]} : vector<8x128xf32> to vector<8x32xf32>
    %491 = arith.mulf %488, %444 : vector<8x32xf32>
    %492 = arith.mulf %487, %489 : vector<8x32xf32>
    %493 = arith.addf %491, %492 : vector<8x32xf32>
    %494 = math.tanh %493 : vector<8x32xf32>
    %495 = arith.mulf %490, %494 : vector<8x32xf32>
    %cst_119 = arith.constant 0.000000e+00 : f32
    %496 = vector.broadcast %cst_119 : f32 to vector<8x32xf32>
    %497 = vector.shape_cast %2 : vector<8x1xi1> to vector<8x1xi1>
    %498 = vector.broadcast %497 : vector<8x1xi1> to vector<8x32xi1>
    %499 = arith.select %498, %495, %496 : vector<8x32xi1>, vector<8x32xf32>
    %c0_120 = arith.constant 0 : index
    %c32_121 = arith.constant 32 : index
    %500 = vector.load %arg13[%c0_120, %c32_121] : memref<64x64xf32, #tpu.memory_space<vmem>>, vector<8x32xf32>
    tpu.vector_store %arg13[%c0_120, %c32_121], %499 {strides = array<i32>} : memref<64x64xf32, #tpu.memory_space<vmem>>, vector<8x32xf32>,
    %c0_122 = arith.constant 0 : index
    %c0_123 = arith.constant 0 : index
    %501 = vector.load %arg13[%c0_122, %c0_123] : memref<64x64xf32, #tpu.memory_space<vmem>>, vector<64x64xf32>
    %502 = arith.truncf %501 : vector<64x64xf32> to vector<64x64xbf16>
    %c0_124 = arith.constant 0 : index
    %c0_125 = arith.constant 0 : index
    %503 = vector.load %arg6[%c0_124, %c0_125] : memref<64x256xbf16, #tpu.memory_space<vmem>>, vector<64x256xbf16>
    %cst_126 = arith.constant dense<0.000000e+00> : vector<64x256xf32>
    %504 = tpu.matmul %502, %503, %cst_126 {dimension_numbers = #tpu.dot_dimension_numbers<[1], [0], [0], [1], [0, 0, 1, 1], [], []>} : vector<64x64xbf16>, vector<64x256xbf16>, vector<64x256xf32> -> vector<64x256xf32>
    %c0_127 = arith.constant 0 : index
    %c0_128 = arith.constant 0 : index
    %505 = vector.load %arg8[%c0_127, %c0_128] : memref<1x256xf32, #tpu.memory_space<vmem>>, vector<1x256xf32>
    %506 = vector.broadcast %505 : vector<1x256xf32> to vector<64x256xf32>
    %507 = arith.addf %504, %506 : vector<64x256xf32>
    %c0_129 = arith.constant 0 : index
    %c0_130 = arith.constant 0 : index
    %508 = vector.load %arg12[%c0_129, %c0_130] : memref<64x256xf32, #tpu.memory_space<vmem>>, vector<64x256xf32>
    tpu.vector_store %arg12[%c0_129, %c0_130], %507 {strides = array<i32>} : memref<64x256xf32, #tpu.memory_space<vmem>>, vector<64x256xf32>,
    %c0_131 = arith.constant 0 : index
    %c0_132 = arith.constant 0 : index
    %c0_133 = arith.constant 0 : index
    %509 = vector.load %arg7[%c0_131, %c0_132, %c0_133] : memref<2x32x128xbf16, #tpu.memory_space<vmem>>, vector<1x32x128xbf16>
    %510 = vector.shape_cast %509 : vector<1x32x128xbf16> to vector<32x128xbf16>
    %c1_134 = arith.constant 1 : index
    %c0_135 = arith.constant 0 : index
    %c0_136 = arith.constant 0 : index
    %511 = vector.load %arg7[%c1_134, %c0_135, %c0_136] : memref<2x32x128xbf16, #tpu.memory_space<vmem>>, vector<1x32x128xbf16>
    %512 = vector.shape_cast %511 : vector<1x32x128xbf16> to vector<32x128xbf16>
    %cst_137 = arith.constant 0.000000e+00 : f32
    %513 = vector.broadcast %cst_137 : f32 to vector<8x32xf32>
    %cst_138 = arith.constant 0.000000e+00 : f32
    %514 = vector.broadcast %cst_138 : f32 to vector<8x32xf32>
    %cst_139 = arith.constant 0.000000e+00 : f32
    %515 = vector.broadcast %cst_139 : f32 to vector<8x32xf32>
    %cst_140 = arith.constant 0.000000e+00 : f32
    %516 = vector.broadcast %cst_140 : f32 to vector<8x32xf32>
    %c0_141 = arith.constant 0 : index
    %c0_142 = arith.constant 0 : index
    %517 = vector.load %arg12[%c0_141, %c0_142] : memref<64x256xf32, #tpu.memory_space<vmem>>, vector<8x128xf32>
    %518 = arith.truncf %513 : vector<8x32xf32> to vector<8x32xbf16>
    %cst_143 = arith.constant dense<0.000000e+00> : vector<8x128xf32>
    %519 = tpu.matmul %518, %510, %cst_143 {dimension_numbers = #tpu.dot_dimension_numbers<[1], [0], [0], [1], [0, 0, 1, 1], [], []>} : vector<8x32xbf16>, vector<32x128xbf16>, vector<8x128xf32> -> vector<8x128xf32>
    %520 = arith.addf %517, %519 : vector<8x128xf32>
    %521 = arith.negf %520 : vector<8x128xf32>
    %522 = math.exp %521 : vector<8x128xf32>
    %cst_144 = arith.constant 1.000000e+00 : f32
    %523 = vector.broadcast %cst_144 : f32 to vector<8x128xf32>
    %524 = arith.addf %523, %522 : vector<8x128xf32>
    %525 = arith.divf %523, %524 : vector<8x128xf32>
    %526 = math.tanh %520 : vector<8x128xf32>
    %527 = vector.extract_strided_slice %525 {offsets = [0, 0], sizes = [8, 32], strides = [1, 1]} : vector<8x128xf32> to vector<8x32xf32>
    %528 = vector.extract_strided_slice %525 {offsets = [0, 32], sizes = [8, 32], strides = [1, 1]} : vector<8x128xf32> to vector<8x32xf32>
    %529 = vector.extract_strided_slice %526 {offsets = [0, 64], sizes = [8, 32], strides = [1, 1]} : vector<8x128xf32> to vector<8x32xf32>
    %530 = vector.extract_strided_slice %525 {offsets = [0, 96], sizes = [8, 32], strides = [1, 1]} : vector<8x128xf32> to vector<8x32xf32>
    %531 = arith.mulf %528, %515 : vector<8x32xf32>
    %532 = arith.mulf %527, %529 : vector<8x32xf32>
    %533 = arith.addf %531, %532 : vector<8x32xf32>
    %534 = math.tanh %533 : vector<8x32xf32>
    %535 = arith.mulf %530, %534 : vector<8x32xf32>
    %536 = vector.shape_cast %2 : vector<8x1xi1> to vector<8x1xi1>
    %537 = vector.broadcast %536 : vector<8x1xi1> to vector<8x32xi1>
    %538 = arith.select %537, %533, %515 : vector<8x32xi1>, vector<8x32xf32>
    %539 = vector.shape_cast %2 : vector<8x1xi1> to vector<8x1xi1>
    %540 = vector.broadcast %539 : vector<8x1xi1> to vector<8x32xi1>
    %541 = arith.select %540, %535, %513 : vector<8x32xi1>, vector<8x32xf32>
    %c56_145 = arith.constant 56 : index
    %c128_146 = arith.constant 128 : index
    %542 = vector.load %arg12[%c56_145, %c128_146] : memref<64x256xf32, #tpu.memory_space<vmem>>, vector<8x128xf32>
    %543 = arith.truncf %514 : vector<8x32xf32> to vector<8x32xbf16>
    %cst_147 = arith.constant dense<0.000000e+00> : vector<8x128xf32>
    %544 = tpu.matmul %543, %512, %cst_147 {dimension_numbers = #tpu.dot_dimension_numbers<[1], [0], [0], [1], [0, 0, 1, 1], [], []>} : vector<8x32xbf16>, vector<32x128xbf16>, vector<8x128xf32> -> vector<8x128xf32>
    %545 = arith.addf %542, %544 : vector<8x128xf32>
    %546 = arith.negf %545 : vector<8x128xf32>
    %547 = math.exp %546 : vector<8x128xf32>
    %cst_148 = arith.constant 1.000000e+00 : f32
    %548 = vector.broadcast %cst_148 : f32 to vector<8x128xf32>
    %549 = arith.addf %548, %547 : vector<8x128xf32>
    %550 = arith.divf %548, %549 : vector<8x128xf32>
    %551 = math.tanh %545 : vector<8x128xf32>
    %552 = vector.extract_strided_slice %550 {offsets = [0, 0], sizes = [8, 32], strides = [1, 1]} : vector<8x128xf32> to vector<8x32xf32>
    %553 = vector.extract_strided_slice %550 {offsets = [0, 32], sizes = [8, 32], strides = [1, 1]} : vector<8x128xf32> to vector<8x32xf32>
    %554 = vector.extract_strided_slice %551 {offsets = [0, 64], sizes = [8, 32], strides = [1, 1]} : vector<8x128xf32> to vector<8x32xf32>
    %555 = vector.extract_strided_slice %550 {offsets = [0, 96], sizes = [8, 32], strides = [1, 1]} : vector<8x128xf32> to vector<8x32xf32>
    %556 = arith.mulf %553, %516 : vector<8x32xf32>
    %557 = arith.mulf %552, %554 : vector<8x32xf32>
    %558 = arith.addf %556, %557 : vector<8x32xf32>
    %559 = math.tanh %558 : vector<8x32xf32>
    %560 = arith.mulf %555, %559 : vector<8x32xf32>
    %561 = vector.shape_cast %16 : vector<8x1xi1> to vector<8x1xi1>
    %562 = vector.broadcast %561 : vector<8x1xi1> to vector<8x32xi1>
    %563 = arith.select %562, %558, %516 : vector<8x32xi1>, vector<8x32xf32>
    %564 = vector.shape_cast %16 : vector<8x1xi1> to vector<8x1xi1>
    %565 = vector.broadcast %564 : vector<8x1xi1> to vector<8x32xi1>
    %566 = arith.select %565, %560, %514 : vector<8x32xi1>, vector<8x32xf32>
    %c8_149 = arith.constant 8 : index
    %c0_150 = arith.constant 0 : index
    %567 = vector.load %arg12[%c8_149, %c0_150] : memref<64x256xf32, #tpu.memory_space<vmem>>, vector<8x128xf32>
    %568 = arith.truncf %541 : vector<8x32xf32> to vector<8x32xbf16>
    %cst_151 = arith.constant dense<0.000000e+00> : vector<8x128xf32>
    %569 = tpu.matmul %568, %510, %cst_151 {dimension_numbers = #tpu.dot_dimension_numbers<[1], [0], [0], [1], [0, 0, 1, 1], [], []>} : vector<8x32xbf16>, vector<32x128xbf16>, vector<8x128xf32> -> vector<8x128xf32>
    %570 = arith.addf %567, %569 : vector<8x128xf32>
    %571 = arith.negf %570 : vector<8x128xf32>
    %572 = math.exp %571 : vector<8x128xf32>
    %cst_152 = arith.constant 1.000000e+00 : f32
    %573 = vector.broadcast %cst_152 : f32 to vector<8x128xf32>
    %574 = arith.addf %573, %572 : vector<8x128xf32>
    %575 = arith.divf %573, %574 : vector<8x128xf32>
    %576 = math.tanh %570 : vector<8x128xf32>
    %577 = vector.extract_strided_slice %575 {offsets = [0, 0], sizes = [8, 32], strides = [1, 1]} : vector<8x128xf32> to vector<8x32xf32>
    %578 = vector.extract_strided_slice %575 {offsets = [0, 32], sizes = [8, 32], strides = [1, 1]} : vector<8x128xf32> to vector<8x32xf32>
    %579 = vector.extract_strided_slice %576 {offsets = [0, 64], sizes = [8, 32], strides = [1, 1]} : vector<8x128xf32> to vector<8x32xf32>
    %580 = vector.extract_strided_slice %575 {offsets = [0, 96], sizes = [8, 32], strides = [1, 1]} : vector<8x128xf32> to vector<8x32xf32>
    %581 = arith.mulf %578, %538 : vector<8x32xf32>
    %582 = arith.mulf %577, %579 : vector<8x32xf32>
    %583 = arith.addf %581, %582 : vector<8x32xf32>
    %584 = math.tanh %583 : vector<8x32xf32>
    %585 = arith.mulf %580, %584 : vector<8x32xf32>
    %586 = vector.shape_cast %4 : vector<8x1xi1> to vector<8x1xi1>
    %587 = vector.broadcast %586 : vector<8x1xi1> to vector<8x32xi1>
    %588 = arith.select %587, %583, %538 : vector<8x32xi1>, vector<8x32xf32>
    %589 = vector.shape_cast %4 : vector<8x1xi1> to vector<8x1xi1>
    %590 = vector.broadcast %589 : vector<8x1xi1> to vector<8x32xi1>
    %591 = arith.select %590, %585, %541 : vector<8x32xi1>, vector<8x32xf32>
    %c48_153 = arith.constant 48 : index
    %c128_154 = arith.constant 128 : index
    %592 = vector.load %arg12[%c48_153, %c128_154] : memref<64x256xf32, #tpu.memory_space<vmem>>, vector<8x128xf32>
    %593 = arith.truncf %566 : vector<8x32xf32> to vector<8x32xbf16>
    %cst_155 = arith.constant dense<0.000000e+00> : vector<8x128xf32>
    %594 = tpu.matmul %593, %512, %cst_155 {dimension_numbers = #tpu.dot_dimension_numbers<[1], [0], [0], [1], [0, 0, 1, 1], [], []>} : vector<8x32xbf16>, vector<32x128xbf16>, vector<8x128xf32> -> vector<8x128xf32>
    %595 = arith.addf %592, %594 : vector<8x128xf32>
    %596 = arith.negf %595 : vector<8x128xf32>
    %597 = math.exp %596 : vector<8x128xf32>
    %cst_156 = arith.constant 1.000000e+00 : f32
    %598 = vector.broadcast %cst_156 : f32 to vector<8x128xf32>
    %599 = arith.addf %598, %597 : vector<8x128xf32>
    %600 = arith.divf %598, %599 : vector<8x128xf32>
    %601 = math.tanh %595 : vector<8x128xf32>
    %602 = vector.extract_strided_slice %600 {offsets = [0, 0], sizes = [8, 32], strides = [1, 1]} : vector<8x128xf32> to vector<8x32xf32>
    %603 = vector.extract_strided_slice %600 {offsets = [0, 32], sizes = [8, 32], strides = [1, 1]} : vector<8x128xf32> to vector<8x32xf32>
    %604 = vector.extract_strided_slice %601 {offsets = [0, 64], sizes = [8, 32], strides = [1, 1]} : vector<8x128xf32> to vector<8x32xf32>
    %605 = vector.extract_strided_slice %600 {offsets = [0, 96], sizes = [8, 32], strides = [1, 1]} : vector<8x128xf32> to vector<8x32xf32>
    %606 = arith.mulf %603, %563 : vector<8x32xf32>
    %607 = arith.mulf %602, %604 : vector<8x32xf32>
    %608 = arith.addf %606, %607 : vector<8x32xf32>
    %609 = math.tanh %608 : vector<8x32xf32>
    %610 = arith.mulf %605, %609 : vector<8x32xf32>
    %611 = vector.shape_cast %14 : vector<8x1xi1> to vector<8x1xi1>
    %612 = vector.broadcast %611 : vector<8x1xi1> to vector<8x32xi1>
    %613 = arith.select %612, %608, %563 : vector<8x32xi1>, vector<8x32xf32>
    %614 = vector.shape_cast %14 : vector<8x1xi1> to vector<8x1xi1>
    %615 = vector.broadcast %614 : vector<8x1xi1> to vector<8x32xi1>
    %616 = arith.select %615, %610, %566 : vector<8x32xi1>, vector<8x32xf32>
    %c16_157 = arith.constant 16 : index
    %c0_158 = arith.constant 0 : index
    %617 = vector.load %arg12[%c16_157, %c0_158] : memref<64x256xf32, #tpu.memory_space<vmem>>, vector<8x128xf32>
    %618 = arith.truncf %591 : vector<8x32xf32> to vector<8x32xbf16>
    %cst_159 = arith.constant dense<0.000000e+00> : vector<8x128xf32>
    %619 = tpu.matmul %618, %510, %cst_159 {dimension_numbers = #tpu.dot_dimension_numbers<[1], [0], [0], [1], [0, 0, 1, 1], [], []>} : vector<8x32xbf16>, vector<32x128xbf16>, vector<8x128xf32> -> vector<8x128xf32>
    %620 = arith.addf %617, %619 : vector<8x128xf32>
    %621 = arith.negf %620 : vector<8x128xf32>
    %622 = math.exp %621 : vector<8x128xf32>
    %cst_160 = arith.constant 1.000000e+00 : f32
    %623 = vector.broadcast %cst_160 : f32 to vector<8x128xf32>
    %624 = arith.addf %623, %622 : vector<8x128xf32>
    %625 = arith.divf %623, %624 : vector<8x128xf32>
    %626 = math.tanh %620 : vector<8x128xf32>
    %627 = vector.extract_strided_slice %625 {offsets = [0, 0], sizes = [8, 32], strides = [1, 1]} : vector<8x128xf32> to vector<8x32xf32>
    %628 = vector.extract_strided_slice %625 {offsets = [0, 32], sizes = [8, 32], strides = [1, 1]} : vector<8x128xf32> to vector<8x32xf32>
    %629 = vector.extract_strided_slice %626 {offsets = [0, 64], sizes = [8, 32], strides = [1, 1]} : vector<8x128xf32> to vector<8x32xf32>
    %630 = vector.extract_strided_slice %625 {offsets = [0, 96], sizes = [8, 32], strides = [1, 1]} : vector<8x128xf32> to vector<8x32xf32>
    %631 = arith.mulf %628, %588 : vector<8x32xf32>
    %632 = arith.mulf %627, %629 : vector<8x32xf32>
    %633 = arith.addf %631, %632 : vector<8x32xf32>
    %634 = math.tanh %633 : vector<8x32xf32>
    %635 = arith.mulf %630, %634 : vector<8x32xf32>
    %636 = vector.shape_cast %6 : vector<8x1xi1> to vector<8x1xi1>
    %637 = vector.broadcast %636 : vector<8x1xi1> to vector<8x32xi1>
    %638 = arith.select %637, %633, %588 : vector<8x32xi1>, vector<8x32xf32>
    %639 = vector.shape_cast %6 : vector<8x1xi1> to vector<8x1xi1>
    %640 = vector.broadcast %639 : vector<8x1xi1> to vector<8x32xi1>
    %641 = arith.select %640, %635, %591 : vector<8x32xi1>, vector<8x32xf32>
    %c40_161 = arith.constant 40 : index
    %c128_162 = arith.constant 128 : index
    %642 = vector.load %arg12[%c40_161, %c128_162] : memref<64x256xf32, #tpu.memory_space<vmem>>, vector<8x128xf32>
    %643 = arith.truncf %616 : vector<8x32xf32> to vector<8x32xbf16>
    %cst_163 = arith.constant dense<0.000000e+00> : vector<8x128xf32>
    %644 = tpu.matmul %643, %512, %cst_163 {dimension_numbers = #tpu.dot_dimension_numbers<[1], [0], [0], [1], [0, 0, 1, 1], [], []>} : vector<8x32xbf16>, vector<32x128xbf16>, vector<8x128xf32> -> vector<8x128xf32>
    %645 = arith.addf %642, %644 : vector<8x128xf32>
    %646 = arith.negf %645 : vector<8x128xf32>
    %647 = math.exp %646 : vector<8x128xf32>
    %cst_164 = arith.constant 1.000000e+00 : f32
    %648 = vector.broadcast %cst_164 : f32 to vector<8x128xf32>
    %649 = arith.addf %648, %647 : vector<8x128xf32>
    %650 = arith.divf %648, %649 : vector<8x128xf32>
    %651 = math.tanh %645 : vector<8x128xf32>
    %652 = vector.extract_strided_slice %650 {offsets = [0, 0], sizes = [8, 32], strides = [1, 1]} : vector<8x128xf32> to vector<8x32xf32>
    %653 = vector.extract_strided_slice %650 {offsets = [0, 32], sizes = [8, 32], strides = [1, 1]} : vector<8x128xf32> to vector<8x32xf32>
    %654 = vector.extract_strided_slice %651 {offsets = [0, 64], sizes = [8, 32], strides = [1, 1]} : vector<8x128xf32> to vector<8x32xf32>
    %655 = vector.extract_strided_slice %650 {offsets = [0, 96], sizes = [8, 32], strides = [1, 1]} : vector<8x128xf32> to vector<8x32xf32>
    %656 = arith.mulf %653, %613 : vector<8x32xf32>
    %657 = arith.mulf %652, %654 : vector<8x32xf32>
    %658 = arith.addf %656, %657 : vector<8x32xf32>
    %659 = math.tanh %658 : vector<8x32xf32>
    %660 = arith.mulf %655, %659 : vector<8x32xf32>
    %661 = vector.shape_cast %12 : vector<8x1xi1> to vector<8x1xi1>
    %662 = vector.broadcast %661 : vector<8x1xi1> to vector<8x32xi1>
    %663 = arith.select %662, %658, %613 : vector<8x32xi1>, vector<8x32xf32>
    %664 = vector.shape_cast %12 : vector<8x1xi1> to vector<8x1xi1>
    %665 = vector.broadcast %664 : vector<8x1xi1> to vector<8x32xi1>
    %666 = arith.select %665, %660, %616 : vector<8x32xi1>, vector<8x32xf32>
    %c24_165 = arith.constant 24 : index
    %c0_166 = arith.constant 0 : index
    %667 = vector.load %arg12[%c24_165, %c0_166] : memref<64x256xf32, #tpu.memory_space<vmem>>, vector<8x128xf32>
    %668 = arith.truncf %641 : vector<8x32xf32> to vector<8x32xbf16>
    %cst_167 = arith.constant dense<0.000000e+00> : vector<8x128xf32>
    %669 = tpu.matmul %668, %510, %cst_167 {dimension_numbers = #tpu.dot_dimension_numbers<[1], [0], [0], [1], [0, 0, 1, 1], [], []>} : vector<8x32xbf16>, vector<32x128xbf16>, vector<8x128xf32> -> vector<8x128xf32>
    %670 = arith.addf %667, %669 : vector<8x128xf32>
    %671 = arith.negf %670 : vector<8x128xf32>
    %672 = math.exp %671 : vector<8x128xf32>
    %cst_168 = arith.constant 1.000000e+00 : f32
    %673 = vector.broadcast %cst_168 : f32 to vector<8x128xf32>
    %674 = arith.addf %673, %672 : vector<8x128xf32>
    %675 = arith.divf %673, %674 : vector<8x128xf32>
    %676 = math.tanh %670 : vector<8x128xf32>
    %677 = vector.extract_strided_slice %675 {offsets = [0, 0], sizes = [8, 32], strides = [1, 1]} : vector<8x128xf32> to vector<8x32xf32>
    %678 = vector.extract_strided_slice %675 {offsets = [0, 32], sizes = [8, 32], strides = [1, 1]} : vector<8x128xf32> to vector<8x32xf32>
    %679 = vector.extract_strided_slice %676 {offsets = [0, 64], sizes = [8, 32], strides = [1, 1]} : vector<8x128xf32> to vector<8x32xf32>
    %680 = vector.extract_strided_slice %675 {offsets = [0, 96], sizes = [8, 32], strides = [1, 1]} : vector<8x128xf32> to vector<8x32xf32>
    %681 = arith.mulf %678, %638 : vector<8x32xf32>
    %682 = arith.mulf %677, %679 : vector<8x32xf32>
    %683 = arith.addf %681, %682 : vector<8x32xf32>
    %684 = math.tanh %683 : vector<8x32xf32>
    %685 = arith.mulf %680, %684 : vector<8x32xf32>
    %686 = vector.shape_cast %8 : vector<8x1xi1> to vector<8x1xi1>
    %687 = vector.broadcast %686 : vector<8x1xi1> to vector<8x32xi1>
    %688 = arith.select %687, %683, %638 : vector<8x32xi1>, vector<8x32xf32>
    %689 = vector.shape_cast %8 : vector<8x1xi1> to vector<8x1xi1>
    %690 = vector.broadcast %689 : vector<8x1xi1> to vector<8x32xi1>
    %691 = arith.select %690, %685, %641 : vector<8x32xi1>, vector<8x32xf32>
    %c32_169 = arith.constant 32 : index
    %c128_170 = arith.constant 128 : index
    %692 = vector.load %arg12[%c32_169, %c128_170] : memref<64x256xf32, #tpu.memory_space<vmem>>, vector<8x128xf32>
    %693 = arith.truncf %666 : vector<8x32xf32> to vector<8x32xbf16>
    %cst_171 = arith.constant dense<0.000000e+00> : vector<8x128xf32>
    %694 = tpu.matmul %693, %512, %cst_171 {dimension_numbers = #tpu.dot_dimension_numbers<[1], [0], [0], [1], [0, 0, 1, 1], [], []>} : vector<8x32xbf16>, vector<32x128xbf16>, vector<8x128xf32> -> vector<8x128xf32>
    %695 = arith.addf %692, %694 : vector<8x128xf32>
    %696 = arith.negf %695 : vector<8x128xf32>
    %697 = math.exp %696 : vector<8x128xf32>
    %cst_172 = arith.constant 1.000000e+00 : f32
    %698 = vector.broadcast %cst_172 : f32 to vector<8x128xf32>
    %699 = arith.addf %698, %697 : vector<8x128xf32>
    %700 = arith.divf %698, %699 : vector<8x128xf32>
    %701 = math.tanh %695 : vector<8x128xf32>
    %702 = vector.extract_strided_slice %700 {offsets = [0, 0], sizes = [8, 32], strides = [1, 1]} : vector<8x128xf32> to vector<8x32xf32>
    %703 = vector.extract_strided_slice %700 {offsets = [0, 32], sizes = [8, 32], strides = [1, 1]} : vector<8x128xf32> to vector<8x32xf32>
    %704 = vector.extract_strided_slice %701 {offsets = [0, 64], sizes = [8, 32], strides = [1, 1]} : vector<8x128xf32> to vector<8x32xf32>
    %705 = vector.extract_strided_slice %700 {offsets = [0, 96], sizes = [8, 32], strides = [1, 1]} : vector<8x128xf32> to vector<8x32xf32>
    %706 = arith.mulf %703, %663 : vector<8x32xf32>
    %707 = arith.mulf %702, %704 : vector<8x32xf32>
    %708 = arith.addf %706, %707 : vector<8x32xf32>
    %709 = math.tanh %708 : vector<8x32xf32>
    %710 = arith.mulf %705, %709 : vector<8x32xf32>
    %711 = vector.shape_cast %10 : vector<8x1xi1> to vector<8x1xi1>
    %712 = vector.broadcast %711 : vector<8x1xi1> to vector<8x32xi1>
    %713 = arith.select %712, %708, %663 : vector<8x32xi1>, vector<8x32xf32>
    %714 = vector.shape_cast %10 : vector<8x1xi1> to vector<8x1xi1>
    %715 = vector.broadcast %714 : vector<8x1xi1> to vector<8x32xi1>
    %716 = arith.select %715, %710, %666 : vector<8x32xi1>, vector<8x32xf32>
    %c32_173 = arith.constant 32 : index
    %c0_174 = arith.constant 0 : index
    %717 = vector.load %arg12[%c32_173, %c0_174] : memref<64x256xf32, #tpu.memory_space<vmem>>, vector<8x128xf32>
    %718 = arith.truncf %691 : vector<8x32xf32> to vector<8x32xbf16>
    %cst_175 = arith.constant dense<0.000000e+00> : vector<8x128xf32>
    %719 = tpu.matmul %718, %510, %cst_175 {dimension_numbers = #tpu.dot_dimension_numbers<[1], [0], [0], [1], [0, 0, 1, 1], [], []>} : vector<8x32xbf16>, vector<32x128xbf16>, vector<8x128xf32> -> vector<8x128xf32>
    %720 = arith.addf %717, %719 : vector<8x128xf32>
    %721 = arith.negf %720 : vector<8x128xf32>
    %722 = math.exp %721 : vector<8x128xf32>
    %cst_176 = arith.constant 1.000000e+00 : f32
    %723 = vector.broadcast %cst_176 : f32 to vector<8x128xf32>
    %724 = arith.addf %723, %722 : vector<8x128xf32>
    %725 = arith.divf %723, %724 : vector<8x128xf32>
    %726 = math.tanh %720 : vector<8x128xf32>
    %727 = vector.extract_strided_slice %725 {offsets = [0, 0], sizes = [8, 32], strides = [1, 1]} : vector<8x128xf32> to vector<8x32xf32>
    %728 = vector.extract_strided_slice %725 {offsets = [0, 32], sizes = [8, 32], strides = [1, 1]} : vector<8x128xf32> to vector<8x32xf32>
    %729 = vector.extract_strided_slice %726 {offsets = [0, 64], sizes = [8, 32], strides = [1, 1]} : vector<8x128xf32> to vector<8x32xf32>
    %730 = vector.extract_strided_slice %725 {offsets = [0, 96], sizes = [8, 32], strides = [1, 1]} : vector<8x128xf32> to vector<8x32xf32>
    %731 = arith.mulf %728, %688 : vector<8x32xf32>
    %732 = arith.mulf %727, %729 : vector<8x32xf32>
    %733 = arith.addf %731, %732 : vector<8x32xf32>
    %734 = math.tanh %733 : vector<8x32xf32>
    %735 = arith.mulf %730, %734 : vector<8x32xf32>
    %736 = vector.shape_cast %10 : vector<8x1xi1> to vector<8x1xi1>
    %737 = vector.broadcast %736 : vector<8x1xi1> to vector<8x32xi1>
    %738 = arith.select %737, %733, %688 : vector<8x32xi1>, vector<8x32xf32>
    %739 = vector.shape_cast %10 : vector<8x1xi1> to vector<8x1xi1>
    %740 = vector.broadcast %739 : vector<8x1xi1> to vector<8x32xi1>
    %741 = arith.select %740, %735, %691 : vector<8x32xi1>, vector<8x32xf32>
    %c24_177 = arith.constant 24 : index
    %c128_178 = arith.constant 128 : index
    %742 = vector.load %arg12[%c24_177, %c128_178] : memref<64x256xf32, #tpu.memory_space<vmem>>, vector<8x128xf32>
    %743 = arith.truncf %716 : vector<8x32xf32> to vector<8x32xbf16>
    %cst_179 = arith.constant dense<0.000000e+00> : vector<8x128xf32>
    %744 = tpu.matmul %743, %512, %cst_179 {dimension_numbers = #tpu.dot_dimension_numbers<[1], [0], [0], [1], [0, 0, 1, 1], [], []>} : vector<8x32xbf16>, vector<32x128xbf16>, vector<8x128xf32> -> vector<8x128xf32>
    %745 = arith.addf %742, %744 : vector<8x128xf32>
    %746 = arith.negf %745 : vector<8x128xf32>
    %747 = math.exp %746 : vector<8x128xf32>
    %cst_180 = arith.constant 1.000000e+00 : f32
    %748 = vector.broadcast %cst_180 : f32 to vector<8x128xf32>
    %749 = arith.addf %748, %747 : vector<8x128xf32>
    %750 = arith.divf %748, %749 : vector<8x128xf32>
    %751 = math.tanh %745 : vector<8x128xf32>
    %752 = vector.extract_strided_slice %750 {offsets = [0, 0], sizes = [8, 32], strides = [1, 1]} : vector<8x128xf32> to vector<8x32xf32>
    %753 = vector.extract_strided_slice %750 {offsets = [0, 32], sizes = [8, 32], strides = [1, 1]} : vector<8x128xf32> to vector<8x32xf32>
    %754 = vector.extract_strided_slice %751 {offsets = [0, 64], sizes = [8, 32], strides = [1, 1]} : vector<8x128xf32> to vector<8x32xf32>
    %755 = vector.extract_strided_slice %750 {offsets = [0, 96], sizes = [8, 32], strides = [1, 1]} : vector<8x128xf32> to vector<8x32xf32>
    %756 = arith.mulf %753, %713 : vector<8x32xf32>
    %757 = arith.mulf %752, %754 : vector<8x32xf32>
    %758 = arith.addf %756, %757 : vector<8x32xf32>
    %759 = math.tanh %758 : vector<8x32xf32>
    %760 = arith.mulf %755, %759 : vector<8x32xf32>
    %761 = vector.shape_cast %8 : vector<8x1xi1> to vector<8x1xi1>
    %762 = vector.broadcast %761 : vector<8x1xi1> to vector<8x32xi1>
    %763 = arith.select %762, %758, %713 : vector<8x32xi1>, vector<8x32xf32>
    %764 = vector.shape_cast %8 : vector<8x1xi1> to vector<8x1xi1>
    %765 = vector.broadcast %764 : vector<8x1xi1> to vector<8x32xi1>
    %766 = arith.select %765, %760, %716 : vector<8x32xi1>, vector<8x32xf32>
    %c40_181 = arith.constant 40 : index
    %c0_182 = arith.constant 0 : index
    %767 = vector.load %arg12[%c40_181, %c0_182] : memref<64x256xf32, #tpu.memory_space<vmem>>, vector<8x128xf32>
    %768 = arith.truncf %741 : vector<8x32xf32> to vector<8x32xbf16>
    %cst_183 = arith.constant dense<0.000000e+00> : vector<8x128xf32>
    %769 = tpu.matmul %768, %510, %cst_183 {dimension_numbers = #tpu.dot_dimension_numbers<[1], [0], [0], [1], [0, 0, 1, 1], [], []>} : vector<8x32xbf16>, vector<32x128xbf16>, vector<8x128xf32> -> vector<8x128xf32>
    %770 = arith.addf %767, %769 : vector<8x128xf32>
    %771 = arith.negf %770 : vector<8x128xf32>
    %772 = math.exp %771 : vector<8x128xf32>
    %cst_184 = arith.constant 1.000000e+00 : f32
    %773 = vector.broadcast %cst_184 : f32 to vector<8x128xf32>
    %774 = arith.addf %773, %772 : vector<8x128xf32>
    %775 = arith.divf %773, %774 : vector<8x128xf32>
    %776 = math.tanh %770 : vector<8x128xf32>
    %777 = vector.extract_strided_slice %775 {offsets = [0, 0], sizes = [8, 32], strides = [1, 1]} : vector<8x128xf32> to vector<8x32xf32>
    %778 = vector.extract_strided_slice %775 {offsets = [0, 32], sizes = [8, 32], strides = [1, 1]} : vector<8x128xf32> to vector<8x32xf32>
    %779 = vector.extract_strided_slice %776 {offsets = [0, 64], sizes = [8, 32], strides = [1, 1]} : vector<8x128xf32> to vector<8x32xf32>
    %780 = vector.extract_strided_slice %775 {offsets = [0, 96], sizes = [8, 32], strides = [1, 1]} : vector<8x128xf32> to vector<8x32xf32>
    %781 = arith.mulf %778, %738 : vector<8x32xf32>
    %782 = arith.mulf %777, %779 : vector<8x32xf32>
    %783 = arith.addf %781, %782 : vector<8x32xf32>
    %784 = math.tanh %783 : vector<8x32xf32>
    %785 = arith.mulf %780, %784 : vector<8x32xf32>
    %786 = vector.shape_cast %12 : vector<8x1xi1> to vector<8x1xi1>
    %787 = vector.broadcast %786 : vector<8x1xi1> to vector<8x32xi1>
    %788 = arith.select %787, %783, %738 : vector<8x32xi1>, vector<8x32xf32>
    %789 = vector.shape_cast %12 : vector<8x1xi1> to vector<8x1xi1>
    %790 = vector.broadcast %789 : vector<8x1xi1> to vector<8x32xi1>
    %791 = arith.select %790, %785, %741 : vector<8x32xi1>, vector<8x32xf32>
    %c16_185 = arith.constant 16 : index
    %c128_186 = arith.constant 128 : index
    %792 = vector.load %arg12[%c16_185, %c128_186] : memref<64x256xf32, #tpu.memory_space<vmem>>, vector<8x128xf32>
    %793 = arith.truncf %766 : vector<8x32xf32> to vector<8x32xbf16>
    %cst_187 = arith.constant dense<0.000000e+00> : vector<8x128xf32>
    %794 = tpu.matmul %793, %512, %cst_187 {dimension_numbers = #tpu.dot_dimension_numbers<[1], [0], [0], [1], [0, 0, 1, 1], [], []>} : vector<8x32xbf16>, vector<32x128xbf16>, vector<8x128xf32> -> vector<8x128xf32>
    %795 = arith.addf %792, %794 : vector<8x128xf32>
    %796 = arith.negf %795 : vector<8x128xf32>
    %797 = math.exp %796 : vector<8x128xf32>
    %cst_188 = arith.constant 1.000000e+00 : f32
    %798 = vector.broadcast %cst_188 : f32 to vector<8x128xf32>
    %799 = arith.addf %798, %797 : vector<8x128xf32>
    %800 = arith.divf %798, %799 : vector<8x128xf32>
    %801 = math.tanh %795 : vector<8x128xf32>
    %802 = vector.extract_strided_slice %800 {offsets = [0, 0], sizes = [8, 32], strides = [1, 1]} : vector<8x128xf32> to vector<8x32xf32>
    %803 = vector.extract_strided_slice %800 {offsets = [0, 32], sizes = [8, 32], strides = [1, 1]} : vector<8x128xf32> to vector<8x32xf32>
    %804 = vector.extract_strided_slice %801 {offsets = [0, 64], sizes = [8, 32], strides = [1, 1]} : vector<8x128xf32> to vector<8x32xf32>
    %805 = vector.extract_strided_slice %800 {offsets = [0, 96], sizes = [8, 32], strides = [1, 1]} : vector<8x128xf32> to vector<8x32xf32>
    %806 = arith.mulf %803, %763 : vector<8x32xf32>
    %807 = arith.mulf %802, %804 : vector<8x32xf32>
    %808 = arith.addf %806, %807 : vector<8x32xf32>
    %809 = math.tanh %808 : vector<8x32xf32>
    %810 = arith.mulf %805, %809 : vector<8x32xf32>
    %811 = vector.shape_cast %6 : vector<8x1xi1> to vector<8x1xi1>
    %812 = vector.broadcast %811 : vector<8x1xi1> to vector<8x32xi1>
    %813 = arith.select %812, %808, %763 : vector<8x32xi1>, vector<8x32xf32>
    %814 = vector.shape_cast %6 : vector<8x1xi1> to vector<8x1xi1>
    %815 = vector.broadcast %814 : vector<8x1xi1> to vector<8x32xi1>
    %816 = arith.select %815, %810, %766 : vector<8x32xi1>, vector<8x32xf32>
    %c48_189 = arith.constant 48 : index
    %c0_190 = arith.constant 0 : index
    %817 = vector.load %arg12[%c48_189, %c0_190] : memref<64x256xf32, #tpu.memory_space<vmem>>, vector<8x128xf32>
    %818 = arith.truncf %791 : vector<8x32xf32> to vector<8x32xbf16>
    %cst_191 = arith.constant dense<0.000000e+00> : vector<8x128xf32>
    %819 = tpu.matmul %818, %510, %cst_191 {dimension_numbers = #tpu.dot_dimension_numbers<[1], [0], [0], [1], [0, 0, 1, 1], [], []>} : vector<8x32xbf16>, vector<32x128xbf16>, vector<8x128xf32> -> vector<8x128xf32>
    %820 = arith.addf %817, %819 : vector<8x128xf32>
    %821 = arith.negf %820 : vector<8x128xf32>
    %822 = math.exp %821 : vector<8x128xf32>
    %cst_192 = arith.constant 1.000000e+00 : f32
    %823 = vector.broadcast %cst_192 : f32 to vector<8x128xf32>
    %824 = arith.addf %823, %822 : vector<8x128xf32>
    %825 = arith.divf %823, %824 : vector<8x128xf32>
    %826 = math.tanh %820 : vector<8x128xf32>
    %827 = vector.extract_strided_slice %825 {offsets = [0, 0], sizes = [8, 32], strides = [1, 1]} : vector<8x128xf32> to vector<8x32xf32>
    %828 = vector.extract_strided_slice %825 {offsets = [0, 32], sizes = [8, 32], strides = [1, 1]} : vector<8x128xf32> to vector<8x32xf32>
    %829 = vector.extract_strided_slice %826 {offsets = [0, 64], sizes = [8, 32], strides = [1, 1]} : vector<8x128xf32> to vector<8x32xf32>
    %830 = vector.extract_strided_slice %825 {offsets = [0, 96], sizes = [8, 32], strides = [1, 1]} : vector<8x128xf32> to vector<8x32xf32>
    %831 = arith.mulf %828, %788 : vector<8x32xf32>
    %832 = arith.mulf %827, %829 : vector<8x32xf32>
    %833 = arith.addf %831, %832 : vector<8x32xf32>
    %834 = math.tanh %833 : vector<8x32xf32>
    %835 = arith.mulf %830, %834 : vector<8x32xf32>
    %836 = vector.shape_cast %14 : vector<8x1xi1> to vector<8x1xi1>
    %837 = vector.broadcast %836 : vector<8x1xi1> to vector<8x32xi1>
    %838 = arith.select %837, %833, %788 : vector<8x32xi1>, vector<8x32xf32>
    %839 = vector.shape_cast %14 : vector<8x1xi1> to vector<8x1xi1>
    %840 = vector.broadcast %839 : vector<8x1xi1> to vector<8x32xi1>
    %841 = arith.select %840, %835, %791 : vector<8x32xi1>, vector<8x32xf32>
    %c8_193 = arith.constant 8 : index
    %c128_194 = arith.constant 128 : index
    %842 = vector.load %arg12[%c8_193, %c128_194] : memref<64x256xf32, #tpu.memory_space<vmem>>, vector<8x128xf32>
    %843 = arith.truncf %816 : vector<8x32xf32> to vector<8x32xbf16>
    %cst_195 = arith.constant dense<0.000000e+00> : vector<8x128xf32>
    %844 = tpu.matmul %843, %512, %cst_195 {dimension_numbers = #tpu.dot_dimension_numbers<[1], [0], [0], [1], [0, 0, 1, 1], [], []>} : vector<8x32xbf16>, vector<32x128xbf16>, vector<8x128xf32> -> vector<8x128xf32>
    %845 = arith.addf %842, %844 : vector<8x128xf32>
    %846 = arith.negf %845 : vector<8x128xf32>
    %847 = math.exp %846 : vector<8x128xf32>
    %cst_196 = arith.constant 1.000000e+00 : f32
    %848 = vector.broadcast %cst_196 : f32 to vector<8x128xf32>
    %849 = arith.addf %848, %847 : vector<8x128xf32>
    %850 = arith.divf %848, %849 : vector<8x128xf32>
    %851 = math.tanh %845 : vector<8x128xf32>
    %852 = vector.extract_strided_slice %850 {offsets = [0, 0], sizes = [8, 32], strides = [1, 1]} : vector<8x128xf32> to vector<8x32xf32>
    %853 = vector.extract_strided_slice %850 {offsets = [0, 32], sizes = [8, 32], strides = [1, 1]} : vector<8x128xf32> to vector<8x32xf32>
    %854 = vector.extract_strided_slice %851 {offsets = [0, 64], sizes = [8, 32], strides = [1, 1]} : vector<8x128xf32> to vector<8x32xf32>
    %855 = vector.extract_strided_slice %850 {offsets = [0, 96], sizes = [8, 32], strides = [1, 1]} : vector<8x128xf32> to vector<8x32xf32>
    %856 = arith.mulf %853, %813 : vector<8x32xf32>
    %857 = arith.mulf %852, %854 : vector<8x32xf32>
    %858 = arith.addf %856, %857 : vector<8x32xf32>
    %859 = math.tanh %858 : vector<8x32xf32>
    %860 = arith.mulf %855, %859 : vector<8x32xf32>
    %861 = vector.shape_cast %4 : vector<8x1xi1> to vector<8x1xi1>
    %862 = vector.broadcast %861 : vector<8x1xi1> to vector<8x32xi1>
    %863 = arith.select %862, %858, %813 : vector<8x32xi1>, vector<8x32xf32>
    %864 = vector.shape_cast %4 : vector<8x1xi1> to vector<8x1xi1>
    %865 = vector.broadcast %864 : vector<8x1xi1> to vector<8x32xi1>
    %866 = arith.select %865, %860, %816 : vector<8x32xi1>, vector<8x32xf32>
    %c56_197 = arith.constant 56 : index
    %c0_198 = arith.constant 0 : index
    %867 = vector.load %arg12[%c56_197, %c0_198] : memref<64x256xf32, #tpu.memory_space<vmem>>, vector<8x128xf32>
    %868 = arith.truncf %841 : vector<8x32xf32> to vector<8x32xbf16>
    %cst_199 = arith.constant dense<0.000000e+00> : vector<8x128xf32>
    %869 = tpu.matmul %868, %510, %cst_199 {dimension_numbers = #tpu.dot_dimension_numbers<[1], [0], [0], [1], [0, 0, 1, 1], [], []>} : vector<8x32xbf16>, vector<32x128xbf16>, vector<8x128xf32> -> vector<8x128xf32>
    %870 = arith.addf %867, %869 : vector<8x128xf32>
    %871 = arith.negf %870 : vector<8x128xf32>
    %872 = math.exp %871 : vector<8x128xf32>
    %cst_200 = arith.constant 1.000000e+00 : f32
    %873 = vector.broadcast %cst_200 : f32 to vector<8x128xf32>
    %874 = arith.addf %873, %872 : vector<8x128xf32>
    %875 = arith.divf %873, %874 : vector<8x128xf32>
    %876 = math.tanh %870 : vector<8x128xf32>
    %877 = vector.extract_strided_slice %875 {offsets = [0, 0], sizes = [8, 32], strides = [1, 1]} : vector<8x128xf32> to vector<8x32xf32>
    %878 = vector.extract_strided_slice %875 {offsets = [0, 32], sizes = [8, 32], strides = [1, 1]} : vector<8x128xf32> to vector<8x32xf32>
    %879 = vector.extract_strided_slice %876 {offsets = [0, 64], sizes = [8, 32], strides = [1, 1]} : vector<8x128xf32> to vector<8x32xf32>
    %880 = vector.extract_strided_slice %875 {offsets = [0, 96], sizes = [8, 32], strides = [1, 1]} : vector<8x128xf32> to vector<8x32xf32>
    %881 = arith.mulf %878, %838 : vector<8x32xf32>
    %882 = arith.mulf %877, %879 : vector<8x32xf32>
    %883 = arith.addf %881, %882 : vector<8x32xf32>
    %884 = math.tanh %883 : vector<8x32xf32>
    %885 = arith.mulf %880, %884 : vector<8x32xf32>
    %886 = vector.shape_cast %16 : vector<8x1xi1> to vector<8x1xi1>
    %887 = vector.broadcast %886 : vector<8x1xi1> to vector<8x32xi1>
    %888 = arith.select %887, %885, %841 : vector<8x32xi1>, vector<8x32xf32>
    %c0_201 = arith.constant 0 : index
    %c128_202 = arith.constant 128 : index
    %889 = vector.load %arg12[%c0_201, %c128_202] : memref<64x256xf32, #tpu.memory_space<vmem>>, vector<8x128xf32>
    %890 = arith.truncf %866 : vector<8x32xf32> to vector<8x32xbf16>
    %cst_203 = arith.constant dense<0.000000e+00> : vector<8x128xf32>
    %891 = tpu.matmul %890, %512, %cst_203 {dimension_numbers = #tpu.dot_dimension_numbers<[1], [0], [0], [1], [0, 0, 1, 1], [], []>} : vector<8x32xbf16>, vector<32x128xbf16>, vector<8x128xf32> -> vector<8x128xf32>
    %892 = arith.addf %889, %891 : vector<8x128xf32>
    %893 = arith.negf %892 : vector<8x128xf32>
    %894 = math.exp %893 : vector<8x128xf32>
    %cst_204 = arith.constant 1.000000e+00 : f32
    %895 = vector.broadcast %cst_204 : f32 to vector<8x128xf32>
    %896 = arith.addf %895, %894 : vector<8x128xf32>
    %897 = arith.divf %895, %896 : vector<8x128xf32>
    %898 = math.tanh %892 : vector<8x128xf32>
    %899 = vector.extract_strided_slice %897 {offsets = [0, 0], sizes = [8, 32], strides = [1, 1]} : vector<8x128xf32> to vector<8x32xf32>
    %900 = vector.extract_strided_slice %897 {offsets = [0, 32], sizes = [8, 32], strides = [1, 1]} : vector<8x128xf32> to vector<8x32xf32>
    %901 = vector.extract_strided_slice %898 {offsets = [0, 64], sizes = [8, 32], strides = [1, 1]} : vector<8x128xf32> to vector<8x32xf32>
    %902 = vector.extract_strided_slice %897 {offsets = [0, 96], sizes = [8, 32], strides = [1, 1]} : vector<8x128xf32> to vector<8x32xf32>
    %903 = arith.mulf %900, %863 : vector<8x32xf32>
    %904 = arith.mulf %899, %901 : vector<8x32xf32>
    %905 = arith.addf %903, %904 : vector<8x32xf32>
    %906 = math.tanh %905 : vector<8x32xf32>
    %907 = arith.mulf %902, %906 : vector<8x32xf32>
    %908 = vector.shape_cast %2 : vector<8x1xi1> to vector<8x1xi1>
    %909 = vector.broadcast %908 : vector<8x1xi1> to vector<8x32xi1>
    %910 = arith.select %909, %907, %866 : vector<8x32xi1>, vector<8x32xf32>
    %c0_205 = arith.constant 0 : index
    %c0_206 = arith.constant 0 : index
    %911 = vector.load %arg10[%c0_205, %c0_206] : memref<1x3xf32, #tpu.memory_space<vmem>>, vector<1x3xf32>
    %c0_207 = arith.constant 0 : index
    %c0_208 = arith.constant 0 : index
    %912 = vector.load %arg9[%c0_207, %c0_208] : memref<64x3xf32, #tpu.memory_space<vmem>>, vector<32x3xf32>
    %cst_209 = arith.constant dense<0.000000e+00> : vector<8x3xf32>
    %913 = tpu.matmul %888, %912, %cst_209 {dimension_numbers = #tpu.dot_dimension_numbers<[1], [0], [0], [1], [0, 0, 1, 1], [], []>} : vector<8x32xf32>, vector<32x3xf32>, vector<8x3xf32> -> vector<8x3xf32>
    %914 = vector.broadcast %911 : vector<1x3xf32> to vector<8x3xf32>
    %915 = arith.addf %914, %913 : vector<8x3xf32>
    %c32_210 = arith.constant 32 : index
    %c0_211 = arith.constant 0 : index
    %916 = vector.load %arg9[%c32_210, %c0_211] : memref<64x3xf32, #tpu.memory_space<vmem>>, vector<32x3xf32>
    %cst_212 = arith.constant dense<0.000000e+00> : vector<8x3xf32>
    %917 = tpu.matmul %910, %916, %cst_212 {dimension_numbers = #tpu.dot_dimension_numbers<[1], [0], [0], [1], [0, 0, 1, 1], [], []>} : vector<8x32xf32>, vector<32x3xf32>, vector<8x3xf32> -> vector<8x3xf32>
    %918 = arith.addf %915, %917 : vector<8x3xf32>
    %c0_213 = arith.constant 0 : index
    %c0_214 = arith.constant 0 : index
    %919 = vector.load %arg11[%c0_213, %c0_214] : memref<8x3xf32, #tpu.memory_space<vmem>>, vector<8x3xf32>
    tpu.vector_store %arg11[%c0_213, %c0_214], %918 {strides = array<i32>} : memref<8x3xf32, #tpu.memory_space<vmem>>, vector<8x3xf32>,
    return
  }
  func.func @transform_0(%arg0: i32) -> (i32, i32) {
    %c0_i32 = arith.constant 0 : i32
    %c0_i32_0 = arith.constant 0 : i32
    %c0_i32_1 = arith.constant 0 : i32
    return %c0_i32, %c0_i32_0 : i32, i32
  }
  func.func @transform_1(%arg0: i32) -> (i32, i32) {
    %c0_i32 = arith.constant 0 : i32
    %c0_i32_0 = arith.constant 0 : i32
    %c0_i32_1 = arith.constant 0 : i32
    return %c0_i32, %c0_i32_0 : i32, i32
  }
  func.func @transform_2(%arg0: i32) -> (i32, i32) {
    %c0_i32 = arith.constant 0 : i32
    %c0_i32_0 = arith.constant 0 : i32
    %c0_i32_1 = arith.constant 0 : i32
    return %c0_i32, %c0_i32_0 : i32, i32
  }
  func.func @transform_3(%arg0: i32) -> (i32, i32, i32) {
    %c0_i32 = arith.constant 0 : i32
    %c0_i32_0 = arith.constant 0 : i32
    %c0_i32_1 = arith.constant 0 : i32
    %c0_i32_2 = arith.constant 0 : i32
    return %c0_i32, %c0_i32_0, %c0_i32_1 : i32, i32, i32
  }
  func.func @transform_4(%arg0: i32) -> (i32, i32) {
    %c0_i32 = arith.constant 0 : i32
    %c0_i32_0 = arith.constant 0 : i32
    %c0_i32_1 = arith.constant 0 : i32
    return %c0_i32, %c0_i32_0 : i32, i32
  }
  func.func @transform_5(%arg0: i32) -> (i32, i32) {
    %c0_i32 = arith.constant 0 : i32
    %c0_i32_0 = arith.constant 0 : i32
    %c0_i32_1 = arith.constant 0 : i32
    return %c0_i32, %c0_i32_0 : i32, i32
  }
  func.func @transform_6(%arg0: i32) -> (i32, i32, i32) {
    %c0_i32 = arith.constant 0 : i32
    %c0_i32_0 = arith.constant 0 : i32
    %c0_i32_1 = arith.constant 0 : i32
    %c0_i32_2 = arith.constant 0 : i32
    return %c0_i32, %c0_i32_0, %c0_i32_1 : i32, i32, i32
  }
  func.func @transform_7(%arg0: i32) -> (i32, i32) {
    %c0_i32 = arith.constant 0 : i32
    %c0_i32_0 = arith.constant 0 : i32
    %c0_i32_1 = arith.constant 0 : i32
    return %c0_i32, %c0_i32_0 : i32, i32
  }
  func.func @transform_8(%arg0: i32) -> (i32, i32) {
    %c0_i32 = arith.constant 0 : i32
    %c0_i32_0 = arith.constant 0 : i32
    %c0_i32_1 = arith.constant 0 : i32
    return %c0_i32, %c0_i32_0 : i32, i32
  }
  func.func @transform_9(%arg0: i32) -> (i32, i32) {
    %c0_i32 = arith.constant 0 : i32
    %c0_i32_0 = arith.constant 0 : i32
    %c0_i32_1 = arith.constant 0 : i32
    return %c0_i32, %c0_i32_0 : i32, i32
  }
  func.func @transform_10(%arg0: i32) -> (i32, i32) {
    %c0_i32 = arith.constant 0 : i32
    %c0_i32_0 = arith.constant 0 : i32
    %c0_i32_1 = arith.constant 0 : i32
    return %c0_i32, %c0_i32_0 : i32, i32
  }
}

</mosaic_0001>

<bundles_post_ra>
// kernel: tpu_custom_call.1
= control target key start
LH: loop header
LB: loop body
LE: loop exit
PB: predicated region body
PF: predicated region fallthrough
CT: control target
= control target key end

     0   :  { %v2947_v3 = vmov 0   ;;  %vm75_vm0 = vcmask 130048   ;;  %vm184_vm13 = vcmask 261120   ;;  %s4129_s2 = inlined_call_operand.vmem [shape: bf16[16,256], index: 2, kind: input, shape index: {}]   ;;  %s4130_s3 = inlined_call_operand.vmem [shape: bf16[2,32,128], index: 3, kind: input, shape index: {}]   ;;  %s4131_s0 = inlined_call_operand.vmem [shape: f32[64,16], index: 0, kind: input, shape index: {}]   ;;  %s4132_s4 = inlined_call_operand.vmem [shape: f32[1,256], index: 4, kind: input, shape index: {}]   ;;  %s4133_s1 = inlined_call_operand.vmem [shape: s32[8,1], index: 1, kind: input, shape index: {}]   ;;  %s4134_s5 = inlined_call_operand.vmem [shape: bf16[64,256], index: 5, kind: input, shape index: {}]   ;;  %s4135_s6 = inlined_call_operand.vmem [shape: bf16[2,32,128], index: 6, kind: input, shape index: {}]   ;;  %s4136_s7 = inlined_call_operand.vmem [shape: f32[1,256], index: 7, kind: input, shape index: {}]   ;;  %s4137_s8 = inlined_call_operand.vmem [shape: f32[64,3], index: 8, kind: input, shape index: {}]   ;;  %s4138_s9 = inlined_call_operand.vmem [shape: f32[1,3], index: 9, kind: input, shape index: {}]   ;;  %s4139_s10 = inlined_call_operand.vmem [shape: f32[8,3], index: 10, kind: output, shape index: {}]  }
   0x1   :  { %v2666_v0 = vld [vmem:[%s4129_s2 + $0x4] sm:$0xf]  ;;  %v2512_v1 = vld [vmem:[%s4129_s2 + $0x8] sm:$0xf0]  ;;  %2687 = vset.pattern.permute.xlu2 %v2947_v3  ;;  %2688 = vset.pattern.permute.xlu0 %v2947_v3  ;;  %v2510_v9 = vld [vmem:[%s4129_s2] sm:$0xf] }
   0x2   :  { %v3014_v2 = vld [vmem:[%s4130_s3 + $0x8] sm:$0xff]  ;;  %v2515_v4 = vor.u32 %v2666_v0, %v2512_v1  ;;  %v45_v5 = vld [vmem:[%s4131_s0] sm:$0xff]  ;;  %2689 = vset.pattern.permute.xlu1 %v2947_v3  ;;  %v3042_v12 = vld [vmem:[%s4130_s3 + $0x18] sm:$0xff] }
   0x3   :  { %v46_v6 = vld [vmem:[%s4131_s0 + $0x8] sm:$0xff]  ;;  %194 = vmatpush.bf16.msra.mxu2 %v3014_v2  ;;  %v3029_v8 = vld [vmem:[%s4130_s3] sm:$0xff]  ;;  %270 = vmatpush.bf16.msra.mxu3 %v3042_v12  ;;  %v3051_v13 = vld [vmem:[%s4130_s3 + $0x10] sm:$0xff] }
   0x4   :  { %v53_v7 = vpack.c.bf16 %v46_v6, %v45_v5  ;;  %v2667_v10 = vld [vmem:[%s4129_s2 + $0x4] sm:$0xf0]  ;;  %124 = vmatpush.bf16.msra.mxu1 %v2515_v4  ;;  %v47_v14 = vld [vmem:[%s4131_s0 + $0x10] sm:$0xff]  ;;  %v48_v15 = vld [vmem:[%s4131_s0 + $0x18] sm:$0xff] }
   0x5   :  { %v2511_v11 = vor.u32 %v2667_v10, %v2510_v9  ;;  %v54_v16 = vpack.c.bf16 %v48_v15, %v47_v14  ;;  %v49_v17 = vld [vmem:[%s4131_s0 + $0x20] sm:$0xff]  ;;  %v50_v18 = vld [vmem:[%s4131_s0 + $0x28] sm:$0xff]  ;;  %v51_v20 = vld [vmem:[%s4131_s0 + $0x30] sm:$0xff] }
   0x6   :  { %v55_v19 = vpack.c.bf16 %v50_v18, %v49_v17  ;;  %v52_v21 = vld [vmem:[%s4131_s0 + $0x38] sm:$0xff]  ;;  %v59_v24 = vld [vmem:[%s4132_s4] sm:$0x3]  ;;  %s2948_s0 = smov 64   ;;  %s2949_s4 = smov 32  }
   0x7   :  { %95 = vmatpush.bf16.msra.mxu0 %v2511_v11  ;;  %2520 = vmatmul.msk.bf16.vlgmr.msra.gmra.mxu1 %vm75_vm0, %v53_v7  ;;  %v56_v22 = vpack.c.bf16 %v52_v21, %v51_v20  ;;  %v3099_v25 = vperm.slane %v59_v24, 0  ;;  %v3102_v28 = vperm.slane %v59_v24, 1 }
   0x8   :  { %195 = vmatpush.bf16.msra.mxu2 %v3029_v8  ;;  %841 = vmatpush.bf16.msrb.mxu1 %v3042_v12 }
   0x9   :  { %271 = vmatpush.bf16.msra.mxu3 %v3051_v13 }
   0xa   :  { %2516 = vmatmul.msk.bf16.vlgmr.msra.gmra.mxu0 %vm75_vm0, %v53_v7 }
   0xb   :  { %774 = vmatpush.bf16.msrb.mxu0 %v3014_v2  ;;  %196 = vmatmul.bf16.vlgmr.msra.gmra.mxu2 %v2947_v3 }
   0xc   :  { %342 = vmatpush.bf16.msrb.mxu2 %v3014_v2  ;;  %842 = vmatpush.bf16.msrb.mxu1 %v3051_v13 }
   0xd   :  { %414 = vmatpush.bf16.msrb.mxu3 %v3042_v12 }
   0xe   :  { %272 = vmatmul.bf16.vlgmr.msra.gmra.mxu3 %v2947_v3 }
   0xf   :  { %775 = vmatpush.bf16.msrb.mxu0 %v3029_v8 }
  0x10   :  { %343 = vmatpush.bf16.msrb.mxu2 %v3029_v8  ;;  %1109 = vmatpush.bf16.msra.mxu1 %v3042_v12 }
  0x11   :  { %415 = vmatpush.bf16.msrb.mxu3 %v3051_v13 }
  0x13   :  { %1042 = vmatpush.bf16.msra.mxu0 %v3014_v2 }
  0x14   :  { %486 = vmatpush.bf16.msra.mxu2 %v3014_v2  ;;  %1110 = vmatpush.bf16.msra.mxu1 %v3051_v13 }
  0x15   :  { %558 = vmatpush.bf16.msra.mxu3 %v3042_v12 }
  0x17   :  { %1043 = vmatpush.bf16.msra.mxu0 %v3029_v8  ;;  %2521 = vmatmul.msk.bf16.gmra.mxu1 %vm75_vm0, %v54_v16 }
  0x18   :  { %487 = vmatpush.bf16.msra.mxu2 %v3029_v8 }
  0x19   :  { %559 = vmatpush.bf16.msra.mxu3 %v3051_v13 }
  0x1a   :  { %2517 = vmatmul.msk.bf16.gmra.mxu0 %vm75_vm0, %v54_v16 }
  0x27   :  { %2522 = vmatmul.msk.bf16.gmra.mxu1 %vm75_vm0, %v55_v19 }
  0x2a   :  { %2518 = vmatmul.msk.bf16.gmra.mxu0 %vm75_vm0, %v55_v19 }
  0x37   :  { %2523 = vmatmul.msk.bf16.gmra.mxu1 %vm75_vm0, %v56_v22 }
  0x3a   :  { %2519 = vmatmul.msk.bf16.gmra.mxu0 %vm75_vm0, %v56_v22 }
  0x84   :  { %v3094_v23 = vpop.f32.mrf.mxu1 }
  0x87   :  { %v97_v26 = vpop.f32.mrf.mxu0 }
  0x88   :  { %v98_v27 = vadd.f32 %v97_v26, %v3099_v25 }
  0x8c   :  { %v128_v29 = vpop.f32.mrf.mxu1 }
  0x8d   :  { %v3105_v30 = vadd.f32 %v128_v29, %v3102_v28 }
  0x8e   :  { %v197_v31 = vpop.f32.mrf.mxu2 }
  0x8f   :  { %v201_v32 = vadd.f32 %v197_v31, %v98_v27 }
  0x91   :  { %2691 = vtanh.f32 %v201_v32  ;;  %v273_v35 = vpop.f32.mrf.mxu3  ;;  %v2536_v51 = vmul.f32 -1.442695, %v201_v32 }
  0x94   :  { %v131_v33 = vpop.f32.mrf.mxu1 }
  0x95   :  { %v3108_v34 = vadd.f32 %v131_v33, %v3102_v28 }
  0x96   :  { %v199_v36 = vpop.f32.mrf.mxu2 }
  0x97   :  { %v2692_v37 = vpop.eup %2691 }
  0x98   :  { %224 = vrot.lane.b32.xlu1 %v2692_v37, %s2948_s0 }
  0x99   :  { %v275_v40 = vpop.f32.mrf.mxu3 }
  0x9c   :  { %v133_v38 = vpop.f32.mrf.mxu1 }
  0x9d   :  { %v3112_v39 = vadd.f32 %v133_v38, %v3102_v28 }
  0xa4   :  { %v136_v41 = vpop.f32.mrf.mxu1 }
  0xa5   :  { %v3115_v42 = vadd.f32 %v136_v41, %v3102_v28 }
  0xac   :  { %v138_v43 = vpop.f32.mrf.mxu1 }
  0xad   :  { %v3118_v44 = vadd.f32 %v138_v43, %v3102_v28 }
  0xb4   :  { %v141_v45 = vpop.f32.mrf.mxu1 }
  0xb5   :  { %v3121_v46 = vadd.f32 %v141_v45, %v3102_v28 }
  0xbc   :  { %v143_v47 = vpop.f32.mrf.mxu1 }
  0xbd   :  { %v144_v48 = vadd.f32 %v143_v47, %v3102_v28 }
  0xbf   :  { %v277_v49 = vadd.f32 %v273_v35, %v144_v48  ;;  %v3137_v35 = vld [vmem:[%s4133_s1] sm:$0xff] }
  0xc0   :  { %vm44_vm9 = vcmp.gt.s32.totalorder %v3137_v35, 7  ;;  %vm37_vm10 = vcmp.gt.s32.totalorder %v3137_v35, 0  ;;  %vm43_vm14 = vcmp.gt.s32.totalorder %v3137_v35, 6 }
  0xc1   :  { %2693 = vtanh.f32 %v277_v49  ;;  %v2545_v4 = vmul.f32 -1.442695, %v277_v49  ;;  %v315_v36 = vsel %vm44_vm9, 1, %v2947_v3  ;;  %v239_v37 = vsel %vm37_vm10, 1, %v2947_v3 }
  0xc2   :  { %2695 = vpow2.f32 %v2536_v51  ;;  %vm42_vm10 = vcmp.gt.s32.totalorder %v3137_v35, 5 }
  0xc7   :  { %v2694_v50 = vpop.eup %2693 }
  0xc8   :  { %300 = vrot.lane.b32.xlu0 %v2694_v50, %s2948_s0  ;;  %v2696_v52 = vpop.eup %2695 }
  0xc9   :  { %v205_v53 = vadd.f32 1.0, %v2696_v52 }
  0xcb   :  { %2697 = vrcp.f32 %v205_v53  ;;  %vm211_vm1 = vweird.f32 %v205_v53  ;;  %v217_v58 = vand.u32 2147483648, %v205_v53  ;;  %v215_v60 = vand.u32 2147483647, %v205_v53 }
  0xcc   :  { %2699 = vpow2.f32 %v2545_v4 }
  0xcd   :  { %v218_v61 = vor.u32 1.1754944e-38, %v217_v58  ;;  %vm216_vm4 = vcmp.eq.f32.partialorder %v215_v60, 8.507059e+37 }
  0xd1   :  { %v2698_v54 = vpop.eup %2697 }
  0xd2   :  { %v207_v55 = vmul.f32 %v2698_v54, %v205_v53  ;;  %vm212_vm2 = vweird.f32 %v2698_v54  ;;  %v2700_v5 = vpop.eup %2699 }
  0xd3   :  { %vm213_vm3 = vmor %vm211_vm1, %vm212_vm2  ;;  %v281_v6 = vadd.f32 1.0, %v2700_v5 }
  0xd4   :  { %v208_v56 = vsub.f32 1.0, %v207_v55 }
  0xd5   :  { %2701 = vrcp.f32 %v281_v6  ;;  %v293_v15 = vand.u32 2147483648, %v281_v6  ;;  %vm287_vm6 = vweird.f32 %v281_v6  ;;  %v291_v16 = vand.u32 2147483647, %v281_v6 }
  0xd6   :  { %v209_v57 = vmul.f32 %v2698_v54, %v208_v56  ;;  %v99_v56 = vpop.f32.mrf.mxu0 }
  0xd7   :  { %v294_v18 = vor.u32 1.1754944e-38, %v293_v15  ;;  %vm292_vm8 = vcmp.eq.f32.partialorder %v291_v16, 8.507059e+37 }
  0xd8   :  { %v210_v59 = vadd.f32 %v2698_v54, %v209_v57  ;;  %v100_v57 = vadd.f32 %v99_v56, %v3099_v25 }
  0xda   :  { %v214_v62 = vsel %vm213_vm3, %v2698_v54, %v210_v59 }
  0xdb   :  { %v219_v63 = vsel %vm216_vm4, %v218_v61, %v214_v62  ;;  %v2702_v7 = vpop.eup %2701 }
  0xdc   :  { %v283_v9 = vmul.f32 %v2702_v7, %v281_v6  ;;  %vm288_vm5 = vweird.f32 %v2702_v7  ;;  %v222_v22 = vmul.f32 0.0, %v219_v63 }
  0xdd   :  { %vm289_vm7 = vmor %vm287_vm6, %vm288_vm5 }
  0xde   :  { %v284_v10 = vsub.f32 1.0, %v283_v9 }
  0xe0   :  { %v285_v11 = vmul.f32 %v2702_v7, %v284_v10 }
  0xe2   :  { %v286_v14 = vadd.f32 %v2702_v7, %v285_v11 }
  0xe4   :  { %v290_v17 = vsel %vm289_vm7, %v2702_v7, %v286_v14 }
  0xe5   :  { %v295_v20 = vsel %vm292_vm8, %v294_v18, %v290_v17  ;;  %vm38_vm8 = vcmp.gt.s32.totalorder %v3137_v35, 1 }
  0xe6   :  { %v298_v29 = vmul.f32 0.0, %v295_v20 }
 0x10a   :  { %v225_v0 = vpop.permute.xlu1 %224 }
 0x10b   :  { %v227_v1 = vmul.f32 %v225_v0, %v219_v63  ;;  %v459_v0 = vsel %vm43_vm14, 1, %v2947_v3 }
 0x10d   :  { %229 = vrot.lane.b32.xlu1 %v227_v1, %s2949_s4 }
 0x13a   :  { %v301_v19 = vpop.permute.xlu0 %300 }
 0x13b   :  { %v303_v21 = vmul.f32 %v301_v19, %v295_v20 }
 0x13d   :  { %305 = vrot.lane.b32.xlu0 %v303_v21, %s2949_s4 }
 0x17f   :  { %v230_v24 = vpop.permute.xlu1 %229 }
 0x180   :  { %v3127_v26 = vadd.f32 %v230_v24, %v222_v22 }
 0x182   :  { %2703 = vtanh.f32 %v3127_v26 }
 0x188   :  { %v2704_v27 = vpop.eup %2703 }
 0x189   :  { %235 = vrot.lane.b32.xlu1 %v2704_v27, %s2948_s0 }
 0x1af   :  { %v306_v31 = vpop.permute.xlu0 %305 }
 0x1b0   :  { %v3131_v32 = vadd.f32 %v306_v31, %v298_v29 }
 0x1b2   :  { %2705 = vtanh.f32 %v3131_v32 }
 0x1b8   :  { %v2706_v33 = vpop.eup %2705 }
 0x1b9   :  { %311 = vrot.lane.b32.xlu2 %v2706_v33, %s2948_s0 }
 0x1c1   :  { %317 = vperm.xlu2 %2687, %v315_v36  }
 0x1c9   :  { %241 = vperm.xlu2 %2687, %v239_v37  }
 0x1fb   :  { %v236_v47 = vpop.permute.xlu1 %235 }
 0x1fc   :  { %v238_v48 = vmul.f32 %v236_v47, %v219_v63 }
 0x213   :  { %v312_v38 = vpop.permute.xlu2 %311 }
 0x214   :  { %v314_v40 = vmul.f32 %v312_v38, %v295_v20 }
 0x21b   :  { %v3144_v41 = vpop.permute.xlu2 %317 }
 0x21c   :  { %vm319_vm11 = vcmp.eq.s32.totalorder %v3144_v41, 1  ;;  %v2439_v41 = vld [vmem:[%s4137_s8] sm:$0xff] }
 0x21d   :  { %v3149_v43 = vsel %vm319_vm11, %v314_v40, 0.0 }
 0x21e   :  { %v401_v45 = vpack.c.bf16 %v3149_v43, %v3149_v43 }
 0x220   :  { %403 = vrot.lane.b32.xlu0 %v401_v45, %s2949_s4 }
 0x223   :  { %v3154_v49 = vpop.permute.xlu2 %241 }
 0x224   :  { %vm243_vm12 = vcmp.eq.s32.totalorder %v3154_v49, 1  ;;  %v2690_v49 = vld [vmem:[%s4138_s9] ss:$0 sm:$0xff] }
 0x225   :  { %v3159_v50 = vsel %vm243_vm12, %v238_v48, 0.0  ;;  %v3191_v56 = vsel %vm243_vm12, %v3127_v26, 0.0 }
 0x226   :  { %v329_v51 = vpack.c.bf16 %v3159_v50, %v3159_v50 }
 0x228   :  { %331 = vrot.lane.b32.xlu0 %v329_v51, %s2949_s4  ;;  %v3181_v51 = vsel %vm319_vm11, %v3131_v32, 0.0 }
 0x292   :  { %v404_v52 = vpop.permute.xlu0 %403 }
 0x293   :  { %2548 = vmatmul.msk.bf16.vlgmr.msrb.gmra.mxu3 %vm184_vm13, %v404_v52 }
 0x294   :  { %702 = vmatpush.bf16.msrb.mxu3 %v3042_v12 }
 0x298   :  { %703 = vmatpush.bf16.msrb.mxu3 %v3051_v13 }
 0x29a   :  { %v332_v53 = vpop.permute.xlu0 %331 }
 0x29b   :  { %2546 = vmatmul.msk.bf16.vlgmr.msrb.gmra.mxu2 %vm184_vm13, %v332_v53 }
 0x29c   :  { %630 = vmatpush.bf16.msrb.mxu2 %v3014_v2 }
 0x2a0   :  { %631 = vmatpush.bf16.msrb.mxu2 %v3029_v8 }
 0x316   :  { %v417_v54 = vpop.f32.mrf.mxu3 }
 0x317   :  { %v421_v55 = vadd.f32 %v417_v54, %v3121_v46 }
 0x319   :  { %2707 = vtanh.f32 %v421_v55  ;;  %v2549_v46 = vmul.f32 -1.442695, %v421_v55 }
 0x31e   :  { %v345_v58 = vpop.f32.mrf.mxu2  ;;  %v419_v59 = vpop.f32.mrf.mxu3 }
 0x31f   :  { %v2708_v60 = vpop.eup %2707  ;;  %v349_v61 = vadd.f32 %v345_v58, %v100_v57 }
 0x320   :  { %444 = vrot.lane.b32.xlu1 %v2708_v60, %s2948_s0 }
 0x321   :  { %2709 = vtanh.f32 %v349_v61  ;;  %v2547_v1 = vmul.f32 -1.442695, %v349_v61 }
 0x322   :  { %2711 = vpow2.f32 %v2549_v46 }
 0x323   :  { %2713 = vpow2.f32 %v2547_v1 }
 0x326   :  { %v347_v62 = vpop.f32.mrf.mxu2 }
 0x327   :  { %v2710_v63 = vpop.eup %2709 }
 0x328   :  { %372 = vrot.lane.b32.xlu0 %v2710_v63, %s2948_s0  ;;  %v2712_v4 = vpop.eup %2711 }
 0x329   :  { %v425_v5 = vadd.f32 1.0, %v2712_v4  ;;  %v2714_v6 = vpop.eup %2713 }
 0x32a   :  { %v353_v7 = vadd.f32 1.0, %v2714_v6 }
 0x32b   :  { %2715 = vrcp.f32 %v425_v5  ;;  %v437_v19 = vand.u32 2147483648, %v425_v5  ;;  %vm431_vm0 = vweird.f32 %v425_v5  ;;  %v435_v20 = vand.u32 2147483647, %v425_v5 }
 0x32c   :  { %2717 = vrcp.f32 %v353_v7  ;;  %v365_v36 = vand.u32 2147483648, %v353_v7  ;;  %vm359_vm4 = vweird.f32 %v353_v7  ;;  %v363_v37 = vand.u32 2147483647, %v353_v7 }
 0x32d   :  { %v438_v24 = vor.u32 1.1754944e-38, %v437_v19  ;;  %vm436_vm2 = vcmp.eq.f32.partialorder %v435_v20, 8.507059e+37  ;;  %v102_v19 = vpop.f32.mrf.mxu0 }
 0x32e   :  { %v366_v40 = vor.u32 1.1754944e-38, %v365_v36  ;;  %vm364_vm6 = vcmp.eq.f32.partialorder %v363_v37, 8.507059e+37  ;;  %v103_v20 = vadd.f32 %v102_v19, %v3099_v25  ;;  %v603_v37 = vsel %vm42_vm10, 1, %v2947_v3 }
 0x330   :  { %461 = vperm.xlu0 %2688, %v459_v0   ;;  %v387_v0 = vsel %vm38_vm8, 1, %v2947_v3 }
 0x331   :  { %v2716_v9 = vpop.eup %2715 }
 0x332   :  { %v427_v10 = vmul.f32 %v2716_v9, %v425_v5  ;;  %v2718_v14 = vpop.eup %2717  ;;  %vm432_vm15 = vweird.f32 %v2716_v9 }
 0x333   :  { %v355_v16 = vmul.f32 %v2718_v14, %v353_v7  ;;  %vm433_vm1 = vmor %vm431_vm0, %vm432_vm15  ;;  %vm360_vm3 = vweird.f32 %v2718_v14 }
 0x334   :  { %v428_v11 = vsub.f32 1.0, %v427_v10  ;;  %vm361_vm5 = vmor %vm359_vm4, %vm360_vm3 }
 0x335   :  { %v356_v18 = vsub.f32 1.0, %v355_v16 }
 0x336   :  { %v429_v15 = vmul.f32 %v2716_v9, %v428_v11 }
 0x337   :  { %v357_v22 = vmul.f32 %v2718_v14, %v356_v18 }
 0x338   :  { %v430_v17 = vadd.f32 %v2716_v9, %v429_v15 }
 0x339   :  { %v358_v33 = vadd.f32 %v2718_v14, %v357_v22 }
 0x33a   :  { %v434_v21 = vsel %vm433_vm1, %v2716_v9, %v430_v17 }
 0x33b   :  { %v439_v27 = vsel %vm436_vm2, %v438_v24, %v434_v21  ;;  %v362_v38 = vsel %vm361_vm5, %v2718_v14, %v358_v33  ;;  %vm39_vm2 = vcmp.gt.s32.totalorder %v3137_v35, 2 }
 0x33c   :  { %v367_v47 = vsel %vm364_vm6, %v366_v40, %v362_v38  ;;  %v442_v52 = vmul.f32 %v439_v27, %v3181_v51 }
 0x33d   :  { %v370_v57 = vmul.f32 %v367_v47, %v3191_v56 }
 0x392   :  { %v445_v29 = vpop.permute.xlu1 %444 }
 0x393   :  { %v447_v31 = vmul.f32 %v445_v29, %v439_v27 }
 0x395   :  { %449 = vrot.lane.b32.xlu2 %v447_v31, %s2949_s4 }
 0x39a   :  { %v373_v45 = vpop.permute.xlu0 %372 }
 0x39b   :  { %v375_v48 = vmul.f32 %v373_v45, %v367_v47 }
 0x39d   :  { %377 = vrot.lane.b32.xlu1 %v375_v48, %s2949_s4 }
 0x3a2   :  { %v3198_v60 = vpop.permute.xlu0 %461 }
 0x3a3   :  { %vm463_vm7 = vcmp.eq.s32.totalorder %v3198_v60, 1 }
 0x3ef   :  { %v450_v53 = vpop.permute.xlu2 %449 }
 0x3f0   :  { %v3184_v54 = vadd.f32 %v450_v53, %v442_v52 }
 0x3f2   :  { %2719 = vtanh.f32 %v3184_v54 }
 0x3f8   :  { %v2720_v55 = vpop.eup %2719 }
 0x3f9   :  { %455 = vrot.lane.b32.xlu2 %v2720_v55, %s2948_s0  ;;  %v531_v55 = vsel %vm39_vm2, 1, %v2947_v3 }
 0x40f   :  { %v378_v58 = vpop.permute.xlu1 %377 }
 0x410   :  { %v3194_v32 = vadd.f32 %v378_v58, %v370_v57 }
 0x412   :  { %2721 = vtanh.f32 %v3194_v32 }
 0x418   :  { %v2722_v59 = vpop.eup %2721 }
 0x419   :  { %383 = vrot.lane.b32.xlu2 %v2722_v59, %s2948_s0 }
 0x453   :  { %v456_v61 = vpop.permute.xlu2 %455 }
 0x454   :  { %v3200_v62 = vmul.f32 %v456_v61, %v439_v27 }
 0x456   :  { %v3207_v26 = vsel %vm463_vm7, %v3200_v62, %v3149_v43 }
 0x457   :  { %v545_v63 = vpack.c.bf16 %v3207_v26, %v3207_v26 }
 0x459   :  { %547 = vrot.lane.b32.xlu1 %v545_v63, %s2949_s4 }
 0x461   :  { %389 = vperm.xlu1 %2689, %v387_v0  }
 0x473   :  { %v384_v1 = vpop.permute.xlu2 %383 }
 0x474   :  { %v3217_v4 = vmul.f32 %v384_v1, %v367_v47 }
 0x4cb   :  { %v548_v46 = vpop.permute.xlu1 %547 }
 0x4cc   :  { %2552 = vmatmul.msk.bf16.vlgmr.msra.gmra.mxu3 %vm184_vm13, %v548_v46 }
 0x4cd   :  { %975 = vmatpush.bf16.msra.mxu3 %v3042_v12 }
 0x4d1   :  { %976 = vmatpush.bf16.msra.mxu3 %v3051_v13 }
 0x4d3   :  { %v3219_v5 = vpop.permute.xlu1 %389 }
 0x4d4   :  { %vm391_vm9 = vcmp.eq.s32.totalorder %v3219_v5, 1  ;;  %v2442_v5 = vld [vmem:[%s4137_s8 + $0x18] sm:$0xff] }
 0x4d5   :  { %v3226_v6 = vsel %vm391_vm9, %v3217_v4, %v3159_v50 }
 0x4d6   :  { %v473_v7 = vpack.c.bf16 %v3226_v6, %v3226_v6 }
 0x4d8   :  { %475 = vrot.lane.b32.xlu2 %v473_v7, %s2949_s4 }
 0x532   :  { %v476_v9 = vpop.permute.xlu2 %475 }
 0x533   :  { %2550 = vmatmul.msk.bf16.vlgmr.msra.gmra.mxu2 %vm184_vm13, %v476_v9 }
 0x534   :  { %908 = vmatpush.bf16.msra.mxu2 %v3014_v2 }
 0x538   :  { %909 = vmatpush.bf16.msra.mxu2 %v3029_v8 }
 0x54f   :  { %v561_v10 = vpop.f32.mrf.mxu3 }
 0x550   :  { %v565_v11 = vadd.f32 %v561_v10, %v3118_v44 }
 0x552   :  { %2723 = vtanh.f32 %v565_v11  ;;  %v2553_v16 = vmul.f32 -1.442695, %v565_v11 }
 0x554   :  { %2725 = vpow2.f32 %v2553_v16 }
 0x557   :  { %v563_v14 = vpop.f32.mrf.mxu3 }
 0x558   :  { %v2724_v15 = vpop.eup %2723 }
 0x559   :  { %588 = vrot.lane.b32.xlu0 %v2724_v15, %s2948_s0 }
 0x55a   :  { %v2726_v17 = vpop.eup %2725 }
 0x55b   :  { %v569_v18 = vadd.f32 1.0, %v2726_v17  ;;  %v3248_v17 = vsel %vm463_vm7, %v3184_v54, %v3181_v51 }
 0x55d   :  { %2727 = vrcp.f32 %v569_v18  ;;  %v581_v38 = vand.u32 2147483648, %v569_v18  ;;  %vm575_vm15 = vweird.f32 %v569_v18  ;;  %v579_v40 = vand.u32 2147483647, %v569_v18 }
 0x55f   :  { %v582_v47 = vor.u32 1.1754944e-38, %v581_v38  ;;  %vm580_vm1 = vcmp.eq.f32.partialorder %v579_v40, 8.507059e+37 }
 0x563   :  { %v2728_v21 = vpop.eup %2727 }
 0x564   :  { %v571_v27 = vmul.f32 %v2728_v21, %v569_v18  ;;  %vm576_vm14 = vweird.f32 %v2728_v21 }
 0x565   :  { %vm577_vm0 = vmor %vm575_vm15, %vm576_vm14  ;;  %vm41_vm14 = vcmp.gt.s32.totalorder %v3137_v35, 4  ;;  %vm40_vm15 = vcmp.gt.s32.totalorder %v3137_v35, 3 }
 0x566   :  { %v572_v29 = vsub.f32 1.0, %v571_v27 }
 0x568   :  { %v573_v33 = vmul.f32 %v2728_v21, %v572_v29 }
 0x56a   :  { %v574_v36 = vadd.f32 %v2728_v21, %v573_v33 }
 0x56c   :  { %v578_v45 = vsel %vm577_vm0, %v2728_v21, %v574_v36 }
 0x56d   :  { %v583_v52 = vsel %vm580_vm1, %v582_v47, %v578_v45 }
 0x56e   :  { %v586_v18 = vmul.f32 %v583_v52, %v3248_v17 }
 0x5b6   :  { %v489_v22 = vpop.f32.mrf.mxu2 }
 0x5b7   :  { %v493_v24 = vadd.f32 %v489_v22, %v103_v20  ;;  %v3259_v22 = vsel %vm391_vm9, %v3194_v32, %v3191_v56 }
 0x5b9   :  { %2729 = vtanh.f32 %v493_v24  ;;  %v2551_v57 = vmul.f32 -1.442695, %v493_v24 }
 0x5bb   :  { %2731 = vpow2.f32 %v2551_v57 }
 0x5be   :  { %v491_v44 = vpop.f32.mrf.mxu2 }
 0x5bf   :  { %v2730_v31 = vpop.eup %2729 }
 0x5c0   :  { %516 = vrot.lane.b32.xlu2 %v2730_v31, %s2948_s0 }
 0x5c1   :  { %v2732_v58 = vpop.eup %2731 }
 0x5c2   :  { %v497_v59 = vadd.f32 1.0, %v2732_v58 }
 0x5c4   :  { %2733 = vrcp.f32 %v497_v59  ;;  %v509_v7 = vand.u32 2147483648, %v497_v59  ;;  %vm503_vm4 = vweird.f32 %v497_v59  ;;  %v507_v9 = vand.u32 2147483647, %v497_v59 }
 0x5c6   :  { %v510_v11 = vor.u32 1.1754944e-38, %v509_v7  ;;  %vm508_vm6 = vcmp.eq.f32.partialorder %v507_v9, 8.507059e+37 }
 0x5c8   :  { %605 = vperm.xlu2 %2687, %v603_v37  }
 0x5ca   :  { %v2734_v61 = vpop.eup %2733 }
 0x5cb   :  { %v589_v48 = vpop.permute.xlu0 %588  ;;  %v499_v63 = vmul.f32 %v2734_v61, %v497_v59  ;;  %vm504_vm3 = vweird.f32 %v2734_v61 }
 0x5cc   :  { %v591_v53 = vmul.f32 %v589_v48, %v583_v52  ;;  %vm505_vm5 = vmor %vm503_vm4, %vm504_vm3 }
 0x5cd   :  { %v500_v0 = vsub.f32 1.0, %v499_v63  ;;  %v675_v63 = vsel %vm40_vm15, 1, %v2947_v3 }
 0x5ce   :  { %593 = vrot.lane.b32.xlu1 %v591_v53, %s2949_s4  ;;  %v104_v53 = vpop.f32.mrf.mxu0 }
 0x5cf   :  { %v501_v46 = vmul.f32 %v2734_v61, %v500_v0 }
 0x5d0   :  { %533 = vperm.xlu2 %2687, %v531_v55  }
 0x5d1   :  { %v502_v1 = vadd.f32 %v2734_v61, %v501_v46 }
 0x5d3   :  { %v506_v10 = vsel %vm505_vm5, %v2734_v61, %v502_v1 }
 0x5d4   :  { %v511_v15 = vsel %vm508_vm6, %v510_v11, %v506_v10 }
 0x5d5   :  { %v514_v24 = vmul.f32 %v511_v15, %v3259_v22 }
 0x61a   :  { %v517_v14 = vpop.permute.xlu2 %516 }
 0x61b   :  { %v519_v16 = vmul.f32 %v517_v14, %v511_v15 }
 0x61d   :  { %521 = vrot.lane.b32.xlu0 %v519_v16, %s2949_s4 }
 0x622   :  { %v3266_v29 = vpop.permute.xlu2 %605 }
 0x623   :  { %vm607_vm8 = vcmp.eq.s32.totalorder %v3266_v29, 1 }
 0x62a   :  { %v3280_v33 = vpop.permute.xlu2 %533 }
 0x62b   :  { %vm535_vm10 = vcmp.eq.s32.totalorder %v3280_v33, 1 }
 0x640   :  { %v594_v19 = vpop.permute.xlu1 %593 }
 0x641   :  { %v3251_v20 = vadd.f32 %v594_v19, %v586_v18 }
 0x643   :  { %2735 = vtanh.f32 %v3251_v20 }
 0x649   :  { %v2736_v21 = vpop.eup %2735 }
 0x64a   :  { %599 = vrot.lane.b32.xlu1 %v2736_v21, %s2948_s0 }
 0x68f   :  { %v522_v51 = vpop.permute.xlu0 %521 }
 0x690   :  { %v3262_v54 = vadd.f32 %v522_v51, %v514_v24 }
 0x692   :  { %2737 = vtanh.f32 %v3262_v54 }
 0x698   :  { %v2738_v27 = vpop.eup %2737 }
 0x699   :  { %527 = vrot.lane.b32.xlu1 %v2738_v27, %s2948_s0 }
 0x6bc   :  { %v600_v44 = vpop.permute.xlu1 %599 }
 0x6bd   :  { %v3268_v31 = vmul.f32 %v600_v44, %v583_v52 }
 0x6bf   :  { %v3275_v56 = vsel %vm607_vm8, %v3268_v31, %v3207_v26 }
 0x6c0   :  { %v689_v32 = vpack.c.bf16 %v3275_v56, %v3275_v56 }
 0x6c2   :  { %691 = vrot.lane.b32.xlu0 %v689_v32, %s2949_s4 }
 0x70b   :  { %v528_v36 = vpop.permute.xlu1 %527 }
 0x70c   :  { %v3282_v37 = vmul.f32 %v528_v36, %v511_v15 }
 0x70e   :  { %v3289_v38 = vsel %vm535_vm10, %v3282_v37, %v3226_v6 }
 0x70f   :  { %v617_v26 = vpack.c.bf16 %v3289_v38, %v3289_v38 }
 0x711   :  { %619 = vrot.lane.b32.xlu0 %v617_v26, %s2949_s4 }
 0x734   :  { %v692_v40 = vpop.permute.xlu0 %691 }
 0x735   :  { %2556 = vmatmul.msk.bf16.vlgmr.msrb.gmra.mxu3 %vm184_vm13, %v692_v40 }
 0x736   :  { %1241 = vmatpush.bf16.msrb.mxu3 %v3042_v12  ;;  %v105_v12 = vadd.f32 %v104_v53, %v3099_v25 }
 0x73a   :  { %1242 = vmatpush.bf16.msrb.mxu3 %v3051_v13 }
 0x783   :  { %v620_v45 = vpop.permute.xlu0 %619 }
 0x784   :  { %2554 = vmatmul.msk.bf16.vlgmr.msrb.gmra.mxu2 %vm184_vm13, %v620_v45 }
 0x785   :  { %1176 = vmatpush.bf16.msrb.mxu2 %v3014_v2 }
 0x789   :  { %1177 = vmatpush.bf16.msrb.mxu2 %v3029_v8 }
 0x7b8   :  { %v705_v6 = vpop.f32.mrf.mxu3 }
 0x7b9   :  { %v709_v47 = vadd.f32 %v705_v6, %v3115_v42  ;;  %v747_v42 = vsel %vm41_vm14, 1, %v2947_v3 }
 0x7bb   :  { %2739 = vtanh.f32 %v709_v47  ;;  %v2557_v55 = vmul.f32 -1.442695, %v709_v47 }
 0x7c0   :  { %v707_v48 = vpop.f32.mrf.mxu3 }
 0x7c1   :  { %v2740_v52 = vpop.eup %2739 }
 0x7c2   :  { %732 = vrot.lane.b32.xlu1 %v2740_v52, %s2948_s0  ;;  %v3314_v52 = vsel %vm607_vm8, %v3251_v20, %v3248_v17  ;;  %v3329_v17 = vsel %vm535_vm10, %v3262_v54, %v3259_v22 }
 0x807   :  { %v633_v13 = vpop.f32.mrf.mxu2 }
 0x808   :  { %v637_v57 = vadd.f32 %v633_v13, %v105_v12 }
 0x80a   :  { %2741 = vtanh.f32 %v637_v57  ;;  %v2555_v35 = vmul.f32 -1.442695, %v637_v57 }
 0x80b   :  { %2743 = vpow2.f32 %v2557_v55 }
 0x80f   :  { %v635_v58 = vpop.f32.mrf.mxu2 }
 0x810   :  { %v2742_v2 = vpop.eup %2741 }
 0x811   :  { %v2744_v59 = vpop.eup %2743  ;;  %660 = vrot.lane.b32.xlu0 %v2742_v2, %s2948_s0 }
 0x812   :  { %v713_v8 = vadd.f32 1.0, %v2744_v59 }
 0x814   :  { %2745 = vrcp.f32 %v713_v8  ;;  %v725_v9 = vand.u32 2147483648, %v713_v8  ;;  %vm719_vm1 = vweird.f32 %v713_v8  ;;  %v723_v10 = vand.u32 2147483647, %v713_v8 }
 0x815   :  { %2747 = vpow2.f32 %v2555_v35 }
 0x816   :  { %v726_v14 = vor.u32 1.1754944e-38, %v725_v9  ;;  %vm724_vm3 = vcmp.eq.f32.partialorder %v723_v10, 8.507059e+37 }
 0x819   :  { %749 = vperm.xlu0 %2688, %v747_v42  }
 0x81a   :  { %v2746_v61 = vpop.eup %2745 }
 0x81b   :  { %v715_v0 = vmul.f32 %v2746_v61, %v713_v8  ;;  %vm720_vm0 = vweird.f32 %v2746_v61  ;;  %v2748_v19 = vpop.eup %2747 }
 0x81c   :  { %vm721_vm2 = vmor %vm719_vm1, %vm720_vm0  ;;  %v641_v21 = vadd.f32 1.0, %v2748_v19 }
 0x81d   :  { %v716_v46 = vsub.f32 1.0, %v715_v0 }
 0x81e   :  { %2749 = vrcp.f32 %v641_v21  ;;  %v653_v36 = vand.u32 2147483648, %v641_v21  ;;  %vm647_vm5 = vweird.f32 %v641_v21  ;;  %v651_v26 = vand.u32 2147483647, %v641_v21 }
 0x81f   :  { %v717_v1 = vmul.f32 %v2746_v61, %v716_v46 }
 0x820   :  { %v654_v45 = vor.u32 1.1754944e-38, %v653_v36  ;;  %vm652_vm14 = vcmp.eq.f32.partialorder %v651_v26, 8.507059e+37 }
 0x821   :  { %677 = vperm.xlu0 %2688, %v675_v63   ;;  %v718_v7 = vadd.f32 %v2746_v61, %v717_v1 }
 0x823   :  { %v722_v11 = vsel %vm721_vm2, %v2746_v61, %v718_v7 }
 0x824   :  { %v727_v15 = vsel %vm724_vm3, %v726_v14, %v722_v11  ;;  %v2750_v24 = vpop.eup %2749 }
 0x825   :  { %v643_v51 = vmul.f32 %v2750_v24, %v641_v21  ;;  %vm648_vm4 = vweird.f32 %v2750_v24  ;;  %v730_v53 = vmul.f32 %v727_v15, %v3314_v52 }
 0x826   :  { %vm649_vm6 = vmor %vm647_vm5, %vm648_vm4 }
 0x827   :  { %v644_v27 = vsub.f32 1.0, %v643_v51 }
 0x829   :  { %v645_v44 = vmul.f32 %v2750_v24, %v644_v27 }
 0x82b   :  { %v646_v32 = vadd.f32 %v2750_v24, %v645_v44 }
 0x82d   :  { %v650_v40 = vsel %vm649_vm6, %v2750_v24, %v646_v32 }
 0x82e   :  { %v655_v47 = vsel %vm652_vm14, %v654_v45, %v650_v40 }
 0x82f   :  { %v658_v20 = vmul.f32 %v655_v47, %v3329_v17 }
 0x834   :  { %v733_v16 = vpop.permute.xlu1 %732 }
 0x835   :  { %v735_v18 = vmul.f32 %v733_v16, %v727_v15  ;;  %v107_v16 = vpop.f32.mrf.mxu0 }
 0x837   :  { %737 = vrot.lane.b32.xlu2 %v735_v18, %s2949_s4 }
 0x83d   :  { %v3364_v35 = vpop.f32.mrf.mxu0 }
 0x845   :  { %v3366_v24 = vpop.f32.mrf.mxu0 }
 0x84d   :  { %v3368_v32 = vpop.f32.mrf.mxu0 }
 0x883   :  { %v661_v6 = vpop.permute.xlu0 %660 }
 0x884   :  { %v663_v48 = vmul.f32 %v661_v6, %v655_v47 }
 0x886   :  { %665 = vrot.lane.b32.xlu1 %v663_v48, %s2949_s4  ;;  %v108_v48 = vadd.f32 %v107_v16, %v3099_v25 }
 0x88b   :  { %v3321_v57 = vpop.permute.xlu0 %749 }
 0x88c   :  { %vm751_vm15 = vcmp.eq.s32.totalorder %v3321_v57, 1 }
 0x891   :  { %v738_v12 = vpop.permute.xlu2 %737 }
 0x892   :  { %v3317_v55 = vadd.f32 %v738_v12, %v730_v53 }
 0x893   :  { %v3346_v54 = vpop.permute.xlu0 %677 }
 0x894   :  { %2751 = vtanh.f32 %v3317_v55  ;;  %vm679_vm0 = vcmp.eq.s32.totalorder %v3346_v54, 1 }
 0x89a   :  { %v2752_v13 = vpop.eup %2751 }
 0x89b   :  { %743 = vrot.lane.b32.xlu2 %v2752_v13, %s2948_s0 }
 0x8f5   :  { %v744_v58 = vpop.permute.xlu2 %743 }
 0x8f6   :  { %v3323_v2 = vmul.f32 %v744_v58, %v727_v15 }
 0x8f8   :  { %v666_v59 = vpop.permute.xlu1 %665  ;;  %v3337_v8 = vsel %vm751_vm15, %v3323_v2, %v3275_v56 }
 0x8f9   :  { %v3339_v42 = vadd.f32 %v666_v59, %v658_v20  ;;  %v828_v61 = vpack.c.bf16 %v3337_v8, %v3337_v8 }
 0x8fb   :  { %2753 = vtanh.f32 %v3339_v42  ;;  %830 = vrot.lane.b32.xlu1 %v828_v61, %s2949_s4 }
 0x901   :  { %v2754_v22 = vpop.eup %2753 }
 0x902   :  { %671 = vrot.lane.b32.xlu2 %v2754_v22, %s2948_s0 }
 0x95c   :  { %v672_v63 = vpop.permute.xlu2 %671 }
 0x95d   :  { %v3348_v0 = vmul.f32 %v672_v63, %v655_v47 }
 0x95f   :  { %v3355_v56 = vsel %vm679_vm0, %v3348_v0, %v3289_v38 }
 0x960   :  { %v761_v46 = vpack.c.bf16 %v3355_v56, %v3355_v56 }
 0x962   :  { %763 = vrot.lane.b32.xlu1 %v761_v46, %s2949_s4 }
 0x96d   :  { %v831_v1 = vpop.permute.xlu1 %830 }
 0x96e   :  { %2560 = vmatmul.msk.bf16.vlgmr.msrb.gmra.mxu1 %vm184_vm13, %v831_v1  ;;  %v3377_v1 = vsel %vm751_vm15, %v3317_v55, %v3314_v52 }
 0x9d4   :  { %v764_v7 = vpop.permute.xlu1 %763 }
 0x9d5   :  { %2558 = vmatmul.msk.bf16.vlgmr.msrb.gmra.mxu0 %vm184_vm13, %v764_v7 }
 0x9eb   :  { %v844_v9 = vpop.f32.mrf.mxu1 }
 0x9ec   :  { %v848_v10 = vadd.f32 %v844_v9, %v3112_v39 }
 0x9ee   :  { %2755 = vtanh.f32 %v848_v10  ;;  %v2561_v38 = vmul.f32 -1.442695, %v848_v10 }
 0x9f0   :  { %2757 = vpow2.f32 %v2561_v38 }
 0x9f3   :  { %v846_v11 = vpop.f32.mrf.mxu1 }
 0x9f4   :  { %v2756_v14 = vpop.eup %2755 }
 0x9f5   :  { %871 = vrot.lane.b32.xlu2 %v2756_v14, %s2948_s0 }
 0x9f6   :  { %v2758_v15 = vpop.eup %2757 }
 0x9f7   :  { %v852_v18 = vadd.f32 1.0, %v2758_v15 }
 0x9f9   :  { %2759 = vrcp.f32 %v852_v18  ;;  %v864_v44 = vand.u32 2147483648, %v852_v18  ;;  %vm858_vm2 = vweird.f32 %v852_v18  ;;  %v862_v36 = vand.u32 2147483647, %v852_v18 }
 0x9fb   :  { %v865_v40 = vor.u32 1.1754944e-38, %v864_v44  ;;  %vm863_vm4 = vcmp.eq.f32.partialorder %v862_v36, 8.507059e+37 }
 0x9ff   :  { %v2760_v19 = vpop.eup %2759 }
 0xa00   :  { %v854_v21 = vmul.f32 %v2760_v19, %v852_v18  ;;  %vm859_vm1 = vweird.f32 %v2760_v19 }
 0xa01   :  { %vm860_vm3 = vmor %vm858_vm2, %vm859_vm1 }
 0xa02   :  { %v855_v51 = vsub.f32 1.0, %v854_v21 }
 0xa04   :  { %v856_v27 = vmul.f32 %v2760_v19, %v855_v51  ;;  %v3389_v51 = vsel %vm679_vm0, %v3339_v42, %v3329_v17 }
 0xa06   :  { %v857_v39 = vadd.f32 %v2760_v19, %v856_v27 }
 0xa08   :  { %v861_v26 = vsel %vm860_vm3, %v2760_v19, %v857_v39 }
 0xa09   :  { %v866_v6 = vsel %vm863_vm4, %v865_v40, %v861_v26 }
 0xa0a   :  { %v869_v7 = vmul.f32 %v866_v6, %v3377_v1 }
 0xa4f   :  { %v872_v45 = vpop.permute.xlu2 %871 }
 0xa50   :  { %v874_v47 = vmul.f32 %v872_v45, %v866_v6 }
 0xa52   :  { %876 = vrot.lane.b32.xlu0 %v874_v47, %s2949_s4  ;;  %v777_v53 = vpop.f32.mrf.mxu0 }
 0xa53   :  { %v781_v12 = vadd.f32 %v777_v53, %v108_v48 }
 0xa55   :  { %2761 = vtanh.f32 %v781_v12  ;;  %v2559_v20 = vmul.f32 -1.442695, %v781_v12 }
 0xa57   :  { %2763 = vpow2.f32 %v2559_v20 }
 0xa5a   :  { %v779_v13 = vpop.f32.mrf.mxu0 }
 0xa5b   :  { %v2762_v58 = vpop.eup %2761 }
 0xa5c   :  { %804 = vrot.lane.b32.xlu1 %v2762_v58, %s2948_s0 }
 0xa5d   :  { %v2764_v59 = vpop.eup %2763 }
 0xa5e   :  { %v785_v61 = vadd.f32 1.0, %v2764_v59 }
 0xa60   :  { %2765 = vrcp.f32 %v785_v61  ;;  %v797_v38 = vand.u32 2147483648, %v785_v61  ;;  %vm791_vm6 = vweird.f32 %v785_v61  ;;  %v795_v15 = vand.u32 2147483647, %v785_v61 }
 0xa62   :  { %v798_v18 = vor.u32 1.1754944e-38, %v797_v38  ;;  %vm796_vm1 = vcmp.eq.f32.partialorder %v795_v15, 8.507059e+37 }
 0xa66   :  { %v2766_v22 = vpop.eup %2765 }
 0xa67   :  { %v787_v63 = vmul.f32 %v2766_v22, %v785_v61  ;;  %vm792_vm5 = vweird.f32 %v2766_v22 }
 0xa68   :  { %vm793_vm14 = vmor %vm791_vm6, %vm792_vm5 }
 0xa69   :  { %v788_v46 = vsub.f32 1.0, %v787_v63 }
 0xa6b   :  { %v789_v9 = vmul.f32 %v2766_v22, %v788_v46 }
 0xa6d   :  { %v790_v14 = vadd.f32 %v2766_v22, %v789_v9 }
 0xa6f   :  { %v794_v16 = vsel %vm793_vm14, %v2766_v22, %v790_v14 }
 0xa70   :  { %v799_v55 = vsel %vm796_vm1, %v798_v18, %v794_v16 }
 0xa71   :  { %v802_v27 = vmul.f32 %v799_v55, %v3389_v51 }
 0xac4   :  { %v877_v10 = vpop.permute.xlu0 %876 }
 0xac5   :  { %v3380_v11 = vadd.f32 %v877_v10, %v869_v7 }
 0xac7   :  { %2767 = vtanh.f32 %v3380_v11 }
 0xacd   :  { %v2768_v19 = vpop.eup %2767 }
 0xace   :  { %882 = vrot.lane.b32.xlu0 %v2768_v19, %s2948_s0  ;;  %v805_v52 = vpop.permute.xlu1 %804 }
 0xacf   :  { %v807_v21 = vmul.f32 %v805_v52, %v799_v55 }
 0xad1   :  { %809 = vrot.lane.b32.xlu2 %v807_v21, %s2949_s4 }
 0xb2b   :  { %v810_v39 = vpop.permute.xlu2 %809 }
 0xb2c   :  { %v3392_v44 = vadd.f32 %v810_v39, %v802_v27 }
 0xb2e   :  { %2769 = vtanh.f32 %v3392_v44 }
 0xb34   :  { %v2770_v36 = vpop.eup %2769 }
 0xb35   :  { %815 = vrot.lane.b32.xlu2 %v2770_v36, %s2948_s0 }
 0xb40   :  { %v883_v26 = vpop.permute.xlu0 %882 }
 0xb41   :  { %v3396_v40 = vmul.f32 %v883_v26, %v866_v6 }
 0xb43   :  { %v3402_v45 = vsel %vm679_vm0, %v3396_v40, %v3337_v8 }
 0xb44   :  { %v962_v17 = vpack.c.bf16 %v3402_v45, %v3402_v45 }
 0xb46   :  { %964 = vrot.lane.b32.xlu1 %v962_v17, %s2949_s4 }
 0xb8f   :  { %v816_v42 = vpop.permute.xlu2 %815 }
 0xb90   :  { %v3407_v47 = vmul.f32 %v816_v42, %v799_v55 }
 0xb92   :  { %v3413_v6 = vsel %vm751_vm15, %v3407_v47, %v3355_v56  ;;  %v110_v56 = vadd.f32 %v3364_v35, %v3099_v25 }
 0xb93   :  { %v895_v48 = vpack.c.bf16 %v3413_v6, %v3413_v6 }
 0xb95   :  { %897 = vrot.lane.b32.xlu0 %v895_v48, %s2949_s4 }
 0xbb8   :  { %v965_v8 = vpop.permute.xlu1 %964 }
 0xbb9   :  { %2564 = vmatmul.msk.bf16.vlgmr.msra.gmra.mxu3 %vm184_vm13, %v965_v8 }
 0xc07   :  { %v898_v53 = vpop.permute.xlu0 %897 }
 0xc08   :  { %2562 = vmatmul.msk.bf16.vlgmr.msra.gmra.mxu2 %vm184_vm13, %v898_v53 }
 0xc3c   :  { %v978_v12 = vpop.f32.mrf.mxu3 }
 0xc3d   :  { %v982_v13 = vadd.f32 %v978_v12, %v3108_v34 }
 0xc3f   :  { %2771 = vtanh.f32 %v982_v13  ;;  %v2565_v59 = vmul.f32 -1.442695, %v982_v13 }
 0xc44   :  { %v980_v58 = vpop.f32.mrf.mxu3 }
 0xc45   :  { %v2772_v20 = vpop.eup %2771 }
 0xc46   :  { %1005 = vrot.lane.b32.xlu1 %v2772_v20, %s2948_s0 }
 0xc8b   :  { %v911_v61 = vpop.f32.mrf.mxu2 }
 0xc8c   :  { %v915_v22 = vadd.f32 %v911_v61, %v110_v56  ;;  %v3431_v61 = vsel %vm679_vm0, %v3380_v11, %v3377_v1 }
 0xc8e   :  { %2773 = vtanh.f32 %v915_v22  ;;  %v2563_v27 = vmul.f32 -1.442695, %v915_v22 }
 0xc8f   :  { %2775 = vpow2.f32 %v2565_v59 }
 0xc93   :  { %v913_v63 = vpop.f32.mrf.mxu2 }
 0xc94   :  { %v2774_v46 = vpop.eup %2773 }
 0xc95   :  { %v2776_v7 = vpop.eup %2775  ;;  %938 = vrot.lane.b32.xlu0 %v2774_v46, %s2948_s0 }
 0xc96   :  { %v986_v9 = vadd.f32 1.0, %v2776_v7 }
 0xc98   :  { %2777 = vrcp.f32 %v986_v9  ;;  %v998_v16 = vand.u32 2147483648, %v986_v9  ;;  %vm992_vm3 = vweird.f32 %v986_v9  ;;  %v996_v35 = vand.u32 2147483647, %v986_v9 }
 0xc99   :  { %2779 = vpow2.f32 %v2563_v27 }
 0xc9a   :  { %v999_v19 = vor.u32 1.1754944e-38, %v998_v16  ;;  %vm997_vm5 = vcmp.eq.f32.partialorder %v996_v35, 8.507059e+37 }
 0xc9e   :  { %v2778_v34 = vpop.eup %2777 }
 0xc9f   :  { %v988_v10 = vmul.f32 %v2778_v34, %v986_v9  ;;  %vm993_vm2 = vweird.f32 %v2778_v34  ;;  %v2780_v39 = vpop.eup %2779 }
 0xca0   :  { %vm994_vm4 = vmor %vm992_vm3, %vm993_vm2  ;;  %v919_v36 = vadd.f32 1.0, %v2780_v39 }
 0xca1   :  { %v989_v14 = vsub.f32 1.0, %v988_v10  ;;  %v3444_v10 = vsel %vm751_vm15, %v3392_v44, %v3389_v51 }
 0xca2   :  { %2781 = vrcp.f32 %v919_v36  ;;  %v931_v53 = vand.u32 2147483648, %v919_v36  ;;  %vm925_vm14 = vweird.f32 %v919_v36  ;;  %v929_v12 = vand.u32 2147483647, %v919_v36 }
 0xca3   :  { %v990_v38 = vmul.f32 %v2778_v34, %v989_v14 }
 0xca4   :  { %v932_v58 = vor.u32 1.1754944e-38, %v931_v53  ;;  %vm930_vm2 = vcmp.eq.f32.partialorder %v929_v12, 8.507059e+37 }
 0xca5   :  { %v991_v15 = vadd.f32 %v2778_v34, %v990_v38 }
 0xca7   :  { %v995_v18 = vsel %vm994_vm4, %v2778_v34, %v991_v15 }
 0xca8   :  { %v1000_v55 = vsel %vm997_vm5, %v999_v19, %v995_v18  ;;  %v2782_v26 = vpop.eup %2781 }
 0xca9   :  { %v921_v17 = vmul.f32 %v2782_v26, %v919_v36  ;;  %vm926_vm6 = vweird.f32 %v2782_v26  ;;  %v1003_v22 = vmul.f32 %v1000_v55, %v3431_v61 }
 0xcaa   :  { %vm927_vm1 = vmor %vm925_vm14, %vm926_vm6 }
 0xcab   :  { %v922_v42 = vsub.f32 1.0, %v921_v17  ;;  %v113_v17 = vadd.f32 %v3366_v24, %v3099_v25 }
 0xcad   :  { %v923_v48 = vmul.f32 %v2782_v26, %v922_v42 }
 0xcaf   :  { %v924_v8 = vadd.f32 %v2782_v26, %v923_v48 }
 0xcb1   :  { %v928_v13 = vsel %vm927_vm1, %v2782_v26, %v924_v8 }
 0xcb2   :  { %v933_v56 = vsel %vm930_vm2, %v932_v58, %v928_v13 }
 0xcb3   :  { %v936_v1 = vmul.f32 %v933_v56, %v3444_v10 }
 0xcb8   :  { %v1006_v52 = vpop.permute.xlu1 %1005 }
 0xcb9   :  { %v1008_v21 = vmul.f32 %v1006_v52, %v1000_v55 }
 0xcbb   :  { %1010 = vrot.lane.b32.xlu2 %v1008_v21, %s2949_s4 }
 0xd07   :  { %v939_v20 = vpop.permute.xlu0 %938 }
 0xd08   :  { %v941_v59 = vmul.f32 %v939_v20, %v933_v56 }
 0xd0a   :  { %943 = vrot.lane.b32.xlu1 %v941_v59, %s2949_s4 }
 0xd15   :  { %v1011_v63 = vpop.permute.xlu2 %1010 }
 0xd16   :  { %v3434_v46 = vadd.f32 %v1011_v63, %v1003_v22 }
 0xd18   :  { %2783 = vtanh.f32 %v3434_v46 }
 0xd1e   :  { %v2784_v7 = vpop.eup %2783 }
 0xd1f   :  { %1016 = vrot.lane.b32.xlu2 %v2784_v7, %s2948_s0 }
 0xd79   :  { %v1017_v9 = vpop.permute.xlu2 %1016 }
 0xd7a   :  { %v3438_v34 = vmul.f32 %v1017_v9, %v1000_v55 }
 0xd7c   :  { %v944_v11 = vpop.permute.xlu1 %943  ;;  %v3451_v14 = vsel %vm535_vm10, %v3438_v34, %v3402_v45 }
 0xd7d   :  { %v3453_v38 = vadd.f32 %v944_v11, %v936_v1  ;;  %v1096_v15 = vpack.c.bf16 %v3451_v14, %v3451_v14 }
 0xd7f   :  { %2785 = vtanh.f32 %v3453_v38  ;;  %1098 = vrot.lane.b32.xlu0 %v1096_v15, %s2949_s4 }
 0xd85   :  { %v2786_v51 = vpop.eup %2785 }
 0xd86   :  { %949 = vrot.lane.b32.xlu1 %v2786_v51, %s2948_s0 }
 0xdf1   :  { %v1099_v44 = vpop.permute.xlu0 %1098 }
 0xdf2   :  { %2568 = vmatmul.msk.bf16.vlgmr.msra.gmra.mxu1 %vm184_vm13, %v1099_v44 }
 0xdf8   :  { %v950_v16 = vpop.permute.xlu1 %949 }
 0xdf9   :  { %v3461_v35 = vmul.f32 %v950_v16, %v933_v56 }
 0xdfb   :  { %v3467_v45 = vsel %vm607_vm8, %v3461_v35, %v3413_v6 }
 0xdfc   :  { %v1029_v18 = vpack.c.bf16 %v3467_v45, %v3467_v45 }
 0xdfe   :  { %1031 = vrot.lane.b32.xlu2 %v1029_v18, %s2949_s4 }
 0xe58   :  { %v1032_v19 = vpop.permute.xlu2 %1031 }
 0xe59   :  { %2566 = vmatmul.msk.bf16.vlgmr.msra.gmra.mxu0 %vm184_vm13, %v1032_v19 }
 0xe6f   :  { %v1112_v52 = vpop.f32.mrf.mxu1 }
 0xe70   :  { %v1116_v55 = vadd.f32 %v1112_v52, %v3105_v30 }
 0xe72   :  { %2787 = vtanh.f32 %v1116_v55  ;;  %v2569_v39 = vmul.f32 -1.442695, %v1116_v55 }
 0xe74   :  { %2789 = vpow2.f32 %v2569_v39 }
 0xe77   :  { %v1114_v21 = vpop.f32.mrf.mxu1 }
 0xe78   :  { %v2788_v27 = vpop.eup %2787 }
 0xe79   :  { %1139 = vrot.lane.b32.xlu0 %v2788_v27, %s2948_s0 }
 0xe7a   :  { %v2790_v6 = vpop.eup %2789 }
 0xe7b   :  { %v1120_v36 = vadd.f32 1.0, %v2790_v6 }
 0xe7d   :  { %2791 = vrcp.f32 %v1120_v36  ;;  %v1132_v20 = vand.u32 2147483648, %v1120_v36  ;;  %vm1126_vm4 = vweird.f32 %v1120_v36  ;;  %v1130_v56 = vand.u32 2147483647, %v1120_v36 }
 0xe7f   :  { %v1133_v22 = vor.u32 1.1754944e-38, %v1132_v20  ;;  %vm1131_vm6 = vcmp.eq.f32.partialorder %v1130_v56, 8.507059e+37 }
 0xe83   :  { %v2792_v26 = vpop.eup %2791 }
 0xe84   :  { %v1122_v8 = vmul.f32 %v2792_v26, %v1120_v36  ;;  %vm1127_vm3 = vweird.f32 %v2792_v26  ;;  %v3484_v36 = vsel %vm535_vm10, %v3434_v46, %v3431_v61 }
 0xe85   :  { %vm1128_vm5 = vmor %vm1126_vm4, %vm1127_vm3 }
 0xe86   :  { %v1123_v53 = vsub.f32 1.0, %v1122_v8  ;;  %v3495_v8 = vsel %vm607_vm8, %v3453_v38, %v3444_v10 }
 0xe88   :  { %v1124_v13 = vmul.f32 %v2792_v26, %v1123_v53 }
 0xe8a   :  { %v1125_v58 = vadd.f32 %v2792_v26, %v1124_v13 }
 0xe8c   :  { %v1129_v59 = vsel %vm1128_vm5, %v2792_v26, %v1125_v58 }
 0xe8d   :  { %v1134_v63 = vsel %vm1131_vm6, %v1133_v22, %v1129_v59 }
 0xe8e   :  { %v1137_v26 = vmul.f32 %v1134_v63, %v3484_v36 }
 0xed6   :  { %v1045_v42 = vpop.f32.mrf.mxu0 }
 0xed7   :  { %v1049_v48 = vadd.f32 %v1045_v42, %v113_v17 }
 0xed9   :  { %2793 = vtanh.f32 %v1049_v48  ;;  %v2567_v9 = vmul.f32 -1.442695, %v1049_v48 }
 0xedb   :  { %2795 = vpow2.f32 %v2567_v9 }
 0xede   :  { %v1047_v30 = vpop.f32.mrf.mxu0 }
 0xedf   :  { %v2794_v12 = vpop.eup %2793 }
 0xee0   :  { %1072 = vrot.lane.b32.xlu2 %v2794_v12, %s2948_s0 }
 0xee1   :  { %v2796_v1 = vpop.eup %2795 }
 0xee2   :  { %v1053_v11 = vadd.f32 1.0, %v2796_v1 }
 0xee4   :  { %2797 = vrcp.f32 %v1053_v11  ;;  %v1065_v19 = vand.u32 2147483648, %v1053_v11  ;;  %vm1059_vm1 = vweird.f32 %v1053_v11  ;;  %v1063_v52 = vand.u32 2147483647, %v1053_v11 }
 0xee6   :  { %v1066_v21 = vor.u32 1.1754944e-38, %v1065_v19  ;;  %vm1064_vm3 = vcmp.eq.f32.partialorder %v1063_v52, 8.507059e+37 }
 0xeea   :  { %v2798_v15 = vpop.eup %2797 }
 0xeeb   :  { %v1140_v24 = vpop.permute.xlu0 %1139  ;;  %v1055_v51 = vmul.f32 %v2798_v15, %v1053_v11  ;;  %vm1060_vm14 = vweird.f32 %v2798_v15 }
 0xeec   :  { %v1142_v7 = vmul.f32 %v1140_v24, %v1134_v63  ;;  %vm1061_vm2 = vmor %vm1059_vm1, %vm1060_vm14 }
 0xeed   :  { %v1056_v44 = vsub.f32 1.0, %v1055_v51 }
 0xeee   :  { %1144 = vrot.lane.b32.xlu1 %v1142_v7, %s2949_s4 }
 0xeef   :  { %v1057_v16 = vmul.f32 %v2798_v15, %v1056_v44 }
 0xef1   :  { %v1058_v18 = vadd.f32 %v2798_v15, %v1057_v16 }
 0xef3   :  { %v1062_v55 = vsel %vm1061_vm2, %v2798_v15, %v1058_v18 }
 0xef4   :  { %v1067_v39 = vsel %vm1064_vm3, %v1066_v21, %v1062_v55 }
 0xef5   :  { %v1070_v53 = vmul.f32 %v1067_v39, %v3495_v8 }
 0xf3a   :  { %v1073_v27 = vpop.permute.xlu2 %1072 }
 0xf3b   :  { %v1075_v6 = vmul.f32 %v1073_v27, %v1067_v39 }
 0xf3d   :  { %1077 = vrot.lane.b32.xlu0 %v1075_v6, %s2949_s4  ;;  %v115_v6 = vadd.f32 %v3368_v32, %v3099_v25 }
 0xf60   :  { %v1145_v17 = vpop.permute.xlu1 %1144 }
 0xf61   :  { %v3487_v42 = vadd.f32 %v1145_v17, %v1137_v26 }
 0xf63   :  { %2799 = vtanh.f32 %v3487_v42  ;;  %v1154_v32 = vsel %vm391_vm9, %v3487_v42, %v3484_v36 }
 0xf69   :  { %v2800_v48 = vpop.eup %2799 }
 0xf6a   :  { %1150 = vrot.lane.b32.xlu1 %v2800_v48, %s2948_s0 }
 0xfaf   :  { %v1078_v61 = vpop.permute.xlu0 %1077 }
 0xfb0   :  { %v3498_v46 = vadd.f32 %v1078_v61, %v1070_v53 }
 0xfb2   :  { %2801 = vtanh.f32 %v3498_v46 }
 0xfb8   :  { %v2802_v30 = vpop.eup %2801 }
 0xfb9   :  { %1083 = vrot.lane.b32.xlu0 %v2802_v30, %s2948_s0 }
 0xfdc   :  { %v1151_v12 = vpop.permute.xlu1 %1150 }
 0xfdd   :  { %v3502_v13 = vmul.f32 %v1151_v12, %v1134_v63 }
 0xfdf   :  { %v1155_v58 = vsel %vm391_vm9, %v3502_v13, %v3451_v14  ;;  %v127_v14 = vadd.f32 %v3094_v23, %v3102_v28  ;;  %v1156_v42 = vsel %vm391_vm9, %v3502_v13, 0.0  ;;  %v1022_v13 = vsel %vm535_vm10, %v3438_v34, 0.0 }
 0xfe0   :  { %v1228_v10 = vpack.c.bf16 %v1155_v58, %v1155_v58 }
 0xfe2   :  { %1230 = vrot.lane.b32.xlu2 %v1228_v10, %s2949_s4 }
0x102b   :  { %v1084_v38 = vpop.permute.xlu0 %1083 }
0x102c   :  { %v3509_v20 = vmul.f32 %v1084_v38, %v1067_v39 }
0x102e   :  { %v1088_v56 = vsel %vm463_vm7, %v3509_v20, %v3467_v45 }
0x102f   :  { %v1163_v59 = vpack.c.bf16 %v1088_v56, %v1088_v56 }
0x1031   :  { %1165 = vrot.lane.b32.xlu1 %v1163_v59, %s2949_s4 }
0x103c   :  { %v1231_v22 = vpop.permute.xlu2 %1230 }
0x103d   :  { %2572 = vmatmul.msk.bf16.vlgmr.msrb.gmra.mxu3 %vm184_vm13, %v1231_v22 }
0x10a3   :  { %v1166_v24 = vpop.permute.xlu1 %1165 }
0x10a4   :  { %2570 = vmatmul.msk.bf16.vlgmr.msrb.gmra.mxu2 %vm184_vm13, %v1166_v24 }
0x10c0   :  { %v1244_v63 = vpop.f32.mrf.mxu3 }
0x10c1   :  { %v1248_v7 = vadd.f32 %v1244_v63, %v127_v14 }
0x10c3   :  { %2803 = vtanh.f32 %v1248_v7  ;;  %v2573_v45 = vmul.f32 -1.442695, %v1248_v7 }
0x10c5   :  { %2805 = vpow2.f32 %v2573_v45 }
0x10c8   :  { %v1246_v9 = vpop.f32.mrf.mxu3 }
0x10c9   :  { %v2804_v1 = vpop.eup %2803 }
0x10ca   :  { %1271 = vrot.lane.b32.xlu2 %v2804_v1, %s2948_s0 }
0x10cb   :  { %v2806_v11 = vpop.eup %2805 }
0x10cc   :  { %v1252_v15 = vadd.f32 1.0, %v2806_v11 }
0x10ce   :  { %2807 = vrcp.f32 %v1252_v15  ;;  %v1264_v52 = vand.u32 2147483648, %v1252_v15  ;;  %vm1258_vm5 = vweird.f32 %v1252_v15  ;;  %v1262_v23 = vand.u32 2147483647, %v1252_v15 }
0x10d0   :  { %v1265_v55 = vor.u32 1.1754944e-38, %v1264_v52  ;;  %vm1263_vm14 = vcmp.eq.f32.partialorder %v1262_v23, 8.507059e+37  ;;  %v754_v23 = vsel %vm751_vm15, %v3323_v2, 0.0  ;;  %v610_v2 = vsel %vm607_vm8, %v3268_v31, 0.0  ;;  %v2600_v31 = vld [vmem:[%s4134_s5 + $0x30] sm:$0xf] }
0x10d4   :  { %v2808_v51 = vpop.eup %2807 }
0x10d5   :  { %v1254_v44 = vmul.f32 %v2808_v51, %v1252_v15  ;;  %vm1259_vm4 = vweird.f32 %v2808_v51  ;;  %v394_v15 = vsel %vm391_vm9, %v3217_v4, 0.0  ;;  %v466_v4 = vsel %vm463_vm7, %v3200_v62, 0.0 }
0x10d6   :  { %vm1260_vm6 = vmor %vm1258_vm5, %vm1259_vm4  ;;  %v888_v62 = vsel %vm679_vm0, %v3396_v40, 0.0  ;;  %vm326_vm5 = vcmask 523520   ;;  %v682_v40 = vsel %vm679_vm0, %v3348_v0, 0.0  ;;  %v955_v0 = vsel %vm607_vm8, %v3461_v35, 0.0  ;;  %v2679_v35 = vld [vmem:[%s4134_s5 + $0x34] sm:$0xf0] }
0x10d7   :  { %v1255_v16 = vsub.f32 1.0, %v1254_v44  ;;  %v821_v44 = vsel %vm751_vm15, %v3407_v47, 0.0 }
0x10d9   :  { %v1256_v18 = vmul.f32 %v2808_v51, %v1255_v16 }
0x10db   :  { %v1257_v19 = vadd.f32 %v2808_v51, %v1256_v18 }
0x10dd   :  { %v1261_v28 = vsel %vm1260_vm6, %v2808_v51, %v1257_v19  ;;  %v538_v51 = vsel %vm535_vm10, %v3282_v37, 0.0  ;;  %v1087_v37 = vsel %vm463_vm7, %v3498_v46, %v3495_v8  ;;  %vm1358_vm6 = vcmask 523264  }
0x10de   :  { %v3521_v27 = vsel %vm1263_vm14, %v1265_v55, %v1261_v28 }
0x10df   :  { %v1269_v38 = vmul.f32 %v3521_v27, %v1154_v32 }
0x1124   :  { %v1272_v21 = vpop.permute.xlu2 %1271 }
0x1125   :  { %v1274_v39 = vmul.f32 %v1272_v21, %v3521_v27 }
0x1127   :  { %1276 = vrot.lane.b32.xlu0 %v1274_v39, %s2949_s4  ;;  %v1179_v26 = vpop.f32.mrf.mxu2 }
0x1128   :  { %v1183_v17 = vadd.f32 %v1179_v26, %v115_v6  ;;  %v2678_v6 = vld [vmem:[%s4134_s5 + $0x34] sm:$0xf]  ;;  %v2601_v26 = vor.u32 %v2679_v35, %v2600_v31 }
0x112a   :  { %2809 = vtanh.f32 %v1183_v17  ;;  %v2571_v61 = vmul.f32 -1.442695, %v1183_v17  ;;  %v2592_v17 = vld [vmem:[%s4134_s5 + $0x20] sm:$0xf]  ;;  %1375 = vmatpush.bf16.msrb.mxu0 %v2601_v26 }
0x112c   :  { %2811 = vpow2.f32 %v2571_v61  ;;  %v2676_v61 = vld [vmem:[%s4134_s5 + $0x24] sm:$0xf] }
0x112f   :  { %v1181_v48 = vpop.f32.mrf.mxu2 }
0x1130   :  { %v2810_v53 = vpop.eup %2809  ;;  %v2677_v48 = vld [vmem:[%s4134_s5 + $0x24] sm:$0xf0] }
0x1131   :  { %1206 = vrot.lane.b32.xlu1 %v2810_v53, %s2948_s0 }
0x1132   :  { %v2812_v30 = vpop.eup %2811 }
0x1133   :  { %v1187_v12 = vadd.f32 1.0, %v2812_v30  ;;  %v2594_v30 = vld [vmem:[%s4134_s5 + $0x28] sm:$0xf0] }
0x1135   :  { %2813 = vrcp.f32 %v1187_v12  ;;  %v1199_v24 = vand.u32 2147483648, %v1187_v12  ;;  %vm1193_vm2 = vweird.f32 %v1187_v12  ;;  %v1197_v14 = vand.u32 2147483647, %v1187_v12 }
0x1137   :  { %v1200_v7 = vor.u32 1.1754944e-38, %v1199_v24  ;;  %vm1198_vm4 = vcmp.eq.f32.partialorder %v1197_v14, 8.507059e+37  ;;  %v2586_v14 = vld [vmem:[%s4134_s5 + $0x18] sm:$0xf0] }
0x1139   :  { %247 = vrot.lane.b32.xlu1 %v3159_v50, %s2949_s4 }
0x113b   :  { %v2814_v58 = vpop.eup %2813 }
0x113c   :  { %v1189_v10 = vmul.f32 %v2814_v58, %v1187_v12  ;;  %vm1194_vm1 = vweird.f32 %v2814_v58  ;;  %v3633_v12 = vld [vmem:[%s4135_s6 + $0x8] sm:$0xff] }
0x113d   :  { %vm1195_vm3 = vmor %vm1193_vm2, %vm1194_vm1  ;;  %1473 = vmatpush.bf16.msra.mxu2 %v3633_v12 }
0x113e   :  { %v1190_v25 = vsub.f32 1.0, %v1189_v10  ;;  %v2597_v10 = vor.u32 %v2676_v61, %v2594_v30 }
0x1140   :  { %v1191_v56 = vmul.f32 %v2814_v58, %v1190_v25 }
0x1142   :  { %v1192_v50 = vadd.f32 %v2814_v58, %v1191_v56 }
0x1144   :  { %v1196_v63 = vsel %vm1195_vm3, %v2814_v58, %v1192_v50  ;;  %v2593_v58 = vor.u32 %v2677_v48, %v2592_v17  ;;  %v2674_v50 = vld [vmem:[%s4134_s5 + $0x14] sm:$0xf] }
0x1145   :  { %v3535_v45 = vsel %vm1198_vm4, %v1200_v7, %v1196_v63  ;;  %v3655_v63 = vld [vmem:[%s4135_s6] sm:$0xff] }
0x1146   :  { %v1204_v34 = vmul.f32 %v3535_v45, %v1087_v37  ;;  %1376 = vmatpush.bf16.msrb.mxu0 %v2593_v58  ;;  %v2576_v7 = vld [vmem:[%s4134_s5] sm:$0xf]  ;;  %1474 = vmatpush.bf16.msra.mxu2 %v3655_v63 }
0x1149   :  { %1475 = vmatmul.bf16.vlgmr.msra.gmra.mxu2 %v2947_v3 }
0x114a   :  { %1600 = vmatpush.bf16.msrb.mxu2 %v3633_v12 }
0x114e   :  { %1601 = vmatpush.bf16.msrb.mxu2 %v3655_v63 }
0x1152   :  { %1722 = vmatpush.bf16.msra.mxu2 %v3633_v12 }
0x1156   :  { %1723 = vmatpush.bf16.msra.mxu2 %v3655_v63 }
0x1199   :  { %v1277_v59 = vpop.permute.xlu0 %1276 }
0x119a   :  { %v1279_v22 = vadd.f32 %v1277_v59, %v1269_v38  ;;  %v2584_v59 = vld [vmem:[%s4134_s5 + $0x10] sm:$0xf] }
0x119c   :  { %2815 = vtanh.f32 %v1279_v22  ;;  %v2675_v22 = vld [vmem:[%s4134_s5 + $0x14] sm:$0xf0] }
0x119d   :  { %v2585_v24 = vor.u32 %v2675_v22, %v2584_v59 }
0x119f   :  { %1377 = vmatpush.bf16.msrb.mxu0 %v2585_v24 }
0x11a2   :  { %v2816_v9 = vpop.eup %2815 }
0x11a3   :  { %v1207_v1 = vpop.permute.xlu1 %1206  ;;  %1282 = vrot.lane.b32.xlu0 %v2816_v9, %s2948_s0  ;;  %v2589_v9 = vor.u32 %v2674_v50, %v2586_v14 }
0x11a4   :  { %v1209_v36 = vmul.f32 %v1207_v1, %v3535_v45  ;;  %v2673_v1 = vld [vmem:[%s4134_s5 + $0x4] sm:$0xf0] }
0x11a6   :  { %1211 = vrot.lane.b32.xlu2 %v1209_v36, %s2949_s4  ;;  %v2578_v36 = vld [vmem:[%s4134_s5 + $0x8] sm:$0xf0] }
0x11ab   :  { %v248_v11 = vpop.permute.xlu1 %247  ;;  %1158 = vrot.lane.b32.xlu0 %v1156_v42, %s2948_s0  ;;  %v2577_v42 = vor.u32 %v2673_v1, %v2576_v7 }
0x11ac   :  { %250 = vst.msk [vmem:[#allocation3] sm:$0xff] %vm184_vm13, %v248_v11 }
0x11ad   :  { %1378 = vmatpush.bf16.msrb.mxu0 %v2577_v42 }
0x11ae   :  { %396 = vrot.lane.b32.xlu2 %v394_v15, %s2949_s4 }
0x11b1   :  { %1966 = vmatpush.bf16.msra.mxu0 %v3633_v12 }
0x11b3   :  { %540 = vrot.lane.b32.xlu0 %v538_v51, %s2949_s4 }
0x11b5   :  { %1967 = vmatpush.bf16.msra.mxu0 %v3655_v63 }
0x11bb   :  { %1024 = vrot.lane.b32.xlu0 %v1022_v13, %s2948_s0 }
0x11c3   :  { %823 = vrot.lane.b32.xlu0 %v821_v44, %s2949_s4 }
0x11cb   :  { %468 = vrot.lane.b32.xlu0 %v466_v4, %s2948_s0 }
0x1200   :  { %v1212_v16 = vpop.permute.xlu2 %1211 }
0x1201   :  { %v1214_v18 = vadd.f32 %v1212_v16, %v1204_v34  ;;  %v3688_v16 = vld [vmem:[%s4135_s6 + $0x18] sm:$0xff] }
0x1202   :  { %1539 = vmatpush.bf16.msra.mxu3 %v3688_v16 }
0x1203   :  { %2817 = vtanh.f32 %v1214_v18 }
0x1208   :  { %v397_v19 = vpop.permute.xlu2 %396 }
0x1209   :  { %v2818_v47 = vpop.eup %2817  ;;  %399 = vst.msk [vmem:[#allocation3 + $0x8] sm:$0xff] %vm184_vm13, %v397_v19 }
0x120a   :  { %1217 = vrot.lane.b32.xlu2 %v2818_v47, %s2948_s0 }
0x1212   :  { %890 = vrot.lane.b32.xlu2 %v888_v62, %s2948_s0 }
0x1215   :  { %v1283_v52 = vpop.permute.xlu0 %1282 }
0x1216   :  { %v1285_v8 = vmul.f32 %v1283_v52, %v3521_v27  ;;  %v3698_v52 = vld [vmem:[%s4135_s6 + $0x10] sm:$0xff] }
0x1217   :  { %1540 = vmatpush.bf16.msra.mxu3 %v3698_v52 }
0x1218   :  { %v1286_v46 = vsel %vm243_vm12, %v1285_v8, 0.0 }
0x1219   :  { %1288 = vrot.lane.b32.xlu1 %v1286_v46, %s2948_s0 }
0x121a   :  { %756 = vrot.lane.b32.xlu2 %v754_v23, %s2948_s0  ;;  %1541 = vmatmul.bf16.vlgmr.msra.gmra.mxu3 %v2947_v3 }
0x121b   :  { %1661 = vmatpush.bf16.msrb.mxu3 %v3688_v16 }
0x121d   :  { %v1159_v28 = vpop.permute.xlu0 %1158 }
0x121e   :  { %1161 = vst.msk [vmem:[#allocation3 + $0x8] sm:$0xff] %vm326_vm5, %v1159_v28 }
0x121f   :  { %1662 = vmatpush.bf16.msrb.mxu3 %v3698_v52 }
0x1221   :  { %684 = vrot.lane.b32.xlu1 %v682_v40, %s2949_s4 }
0x1222   :  { %323 = vrot.lane.b32.xlu2 %v3149_v43, %s2948_s0  ;;  %v1089_v43 = vsel %vm463_vm7, %v3509_v20, 0.0  ;;  %v2602_v20 = vld [vmem:[%s4134_s5 + $0x38] sm:$0xf0] }
0x1223   :  { %v2605_v53 = vor.u32 %v2678_v6, %v2602_v20  ;;  %1783 = vmatpush.bf16.msra.mxu3 %v3688_v16 }
0x1225   :  { %v541_v55 = vpop.permute.xlu0 %540  ;;  %1404 = vmatpush.bf16.msrb.mxu1 %v2605_v53  ;;  %v1293_v37 = vld [vmem:[#allocation3 + $0x8] sm:$0xff] }
0x1226   :  { %543 = vst.msk [vmem:[#allocation3 + $0x10] sm:$0xff] %vm184_vm13, %v541_v55 }
0x1227   :  { %1784 = vmatpush.bf16.msra.mxu3 %v3698_v52 }
0x1229   :  { %612 = vrot.lane.b32.xlu1 %v610_v2, %s2948_s0  ;;  %1405 = vmatpush.bf16.msrb.mxu1 %v2597_v10 }
0x122d   :  { %v1025_v21 = vpop.permute.xlu0 %1024  ;;  %1406 = vmatpush.bf16.msrb.mxu1 %v2589_v9 }
0x122e   :  { %1027 = vst.msk [vmem:[#allocation3 + $0x10] sm:$0xff] %vm326_vm5, %v1025_v21 }
0x1231   :  { %957 = vrot.lane.b32.xlu1 %v955_v0, %s2949_s4  ;;  %v1476_v0 = vpop.f32.mrf.mxu2 }
0x1235   :  { %v824_v27 = vpop.permute.xlu0 %823  ;;  %v1294_v62 = vld [vmem:[#allocation3 + $0x10] sm:$0xff] }
0x1239   :  { %1091 = vrot.lane.b32.xlu1 %v1089_v43, %s2949_s4  ;;  %v1312_v43 = vld [vmem:[%s4136_s7] sm:$0x3] }
0x123a   :  { %v1315_v31 = vperm.slane %v1312_v43, 1 }
0x123d   :  { %v469_v39 = vpop.permute.xlu0 %468 }
0x123e   :  { %471 = vst.msk [vmem:[#allocation3 + $0x30] sm:$0xff] %vm326_vm5, %v469_v39  ;;  %v3721_v39 = vperm.slane %v1312_v43, 0 }
0x1264   :  { %v1218_v25 = vpop.permute.xlu2 %1217 }
0x1265   :  { %v1220_v32 = vmul.f32 %v1218_v25, %v3535_v45  ;;  %v2672_v45 = vld [vmem:[%s4134_s5 + $0x4] sm:$0xf] }
0x1266   :  { %v2581_v11 = vor.u32 %v2672_v45, %v2578_v36 }
0x1267   :  { %v1221_v38 = vsel %vm319_vm11, %v1220_v32, 0.0 }
0x1268   :  { %1223 = vrot.lane.b32.xlu2 %v1221_v38, %s2949_s4  ;;  %1407 = vmatpush.bf16.msrb.mxu1 %v2581_v11 }
0x126c   :  { %v891_v56 = vpop.permute.xlu2 %890  ;;  %2027 = vmatpush.bf16.msra.mxu1 %v3688_v16 }
0x1270   :  { %2028 = vmatpush.bf16.msra.mxu1 %v3698_v52 }
0x1274   :  { %v757_v15 = vpop.permute.xlu2 %756 }
0x1275   :  { %759 = vst.msk [vmem:[#allocation3 + $0x20] sm:$0xff] %vm326_vm5, %v757_v15 }
0x1276   :  { %826 = vst.msk [vmem:[#allocation3 + $0x20] sm:$0xff] %vm184_vm13, %v824_v27  ;;  %v1478_v27 = vpop.f32.mrf.mxu2 }
0x127c   :  { %v324_v51 = vpop.permute.xlu2 %323 }
0x127d   :  { %327 = vst.msk [vmem:[#allocation3 + $0x38] sm:$0xff] %vm326_vm5, %v324_v51  ;;  %v1296_v28 = vld [vmem:[#allocation3 + $0x20] sm:$0xff] }
0x128b   :  { %v1289_v13 = vpop.permute.xlu1 %1288 }
0x128c   :  { %1291 = vst.msk [vmem:[#allocation3] sm:$0xff] %vm326_vm5, %v1289_v13 }
0x1293   :  { %v685_v44 = vpop.permute.xlu1 %684  ;;  %v1292_v4 = vld [vmem:[#allocation3] sm:$0xff] }
0x1294   :  { %687 = vst.msk [vmem:[#allocation3 + $0x18] sm:$0xff] %vm184_vm13, %v685_v44  ;;  %v1300_v34 = vpack.c.bf16 %v1293_v37, %v1292_v4 }
0x1295   :  { %893 = vst.msk [vmem:[#allocation3 + $0x18] sm:$0xff] %vm326_vm5, %v891_v56 }
0x1296   :  { %2606 = vmatmul.msk.bf16.vlgmr.msrb.gmra.mxu0 %vm1358_vm6, %v1300_v34  ;;  %2610 = vmatmul.msk.bf16.vlgmr.msrb.gmra.mxu1 %vm1358_vm6, %v1300_v34 }
0x1297   :  { %2210 = vmatpush.bf16.msrb.mxu0 %v3633_v12  ;;  %2271 = vmatpush.bf16.msrb.mxu1 %v3688_v16 }
0x129b   :  { %v613_v18 = vpop.permute.xlu1 %612  ;;  %2211 = vmatpush.bf16.msrb.mxu0 %v3655_v63  ;;  %2272 = vmatpush.bf16.msrb.mxu1 %v3698_v52 }
0x129c   :  { %615 = vst.msk [vmem:[#allocation3 + $0x28] sm:$0xff] %vm326_vm5, %v613_v18  ;;  %v1295_v19 = vld [vmem:[#allocation3 + $0x18] sm:$0xff] }
0x129d   :  { %v1301_v8 = vpack.c.bf16 %v1295_v19, %v1294_v62  ;;  %v1542_v59 = vpop.f32.mrf.mxu3 }
0x12a3   :  { %v958_v47 = vpop.permute.xlu1 %957 }
0x12a4   :  { %960 = vst.msk [vmem:[#allocation3 + $0x28] sm:$0xff] %vm184_vm13, %v958_v47 }
0x12a5   :  { %v1544_v14 = vpop.f32.mrf.mxu3 }
0x12a6   :  { %2607 = vmatmul.msk.bf16.gmra.mxu0 %vm1358_vm6, %v1301_v8  ;;  %2611 = vmatmul.msk.bf16.gmra.mxu1 %vm1358_vm6, %v1301_v8 }
0x12ab   :  { %v1092_v46 = vpop.permute.xlu1 %1091  ;;  %v1297_v23 = vld [vmem:[#allocation3 + $0x28] sm:$0xff] }
0x12ac   :  { %1094 = vst.msk [vmem:[#allocation3 + $0x30] sm:$0xff] %vm184_vm13, %v1092_v46  ;;  %v1302_v40 = vpack.c.bf16 %v1297_v23, %v1296_v28 }
0x12b3   :  { %v1298_v3 = vld [vmem:[#allocation3 + $0x30] sm:$0xff] }
0x12b6   :  { %2608 = vmatmul.msk.bf16.gmra.mxu0 %vm1358_vm6, %v1302_v40  ;;  %2612 = vmatmul.msk.bf16.gmra.mxu1 %vm1358_vm6, %v1302_v40 }
0x12c2   :  { %v1224_v55 = vpop.permute.xlu2 %1223 }
0x12c3   :  { %1226 = vst.msk [vmem:[#allocation3 + $0x38] sm:$0xff] %vm184_vm13, %v1224_v55 }
0x12ca   :  { %v1299_v2 = vld [vmem:[#allocation3 + $0x38] sm:$0xff] }
0x12cb   :  { %v1303_v21 = vpack.c.bf16 %v1299_v2, %v1298_v3 }
0x12cd   :  { %2609 = vmatmul.msk.bf16.gmra.mxu0 %vm1358_vm6, %v1303_v21  ;;  %2613 = vmatmul.msk.bf16.gmra.mxu1 %vm1358_vm6, %v1303_v21 }
0x1313   :  { %v1380_v35 = vpop.f32.mrf.mxu0  ;;  %v1409_v6 = vpop.f32.mrf.mxu1 }
0x1314   :  { %v1381_v26 = vadd.f32 %v1380_v35, %v3721_v39  ;;  %v3724_v20 = vadd.f32 %v1409_v6, %v1315_v31 }
0x1316   :  { %v1480_v17 = vadd.f32 %v1476_v0, %v1381_v26 }
0x1318   :  { %2819 = vtanh.f32 %v1480_v17  ;;  %v2626_v37 = vmul.f32 -1.442695, %v1480_v17 }
0x131b   :  { %v3726_v48 = vpop.f32.mrf.mxu0  ;;  %v1411_v53 = vpop.f32.mrf.mxu1 }
0x131c   :  { %v3728_v61 = vadd.f32 %v1411_v53, %v1315_v31 }
0x131e   :  { %v2820_v30 = vpop.eup %2819 }
0x131f   :  { %1503 = vrot.lane.b32.xlu0 %v2820_v30, %s2948_s0 }
0x1323   :  { %v3731_v58 = vpop.f32.mrf.mxu0  ;;  %v1414_v10 = vpop.f32.mrf.mxu1 }
0x1324   :  { %v3733_v25 = vadd.f32 %v1414_v10, %v1315_v31 }
0x132b   :  { %v3735_v32 = vpop.f32.mrf.mxu0  ;;  %v1416_v38 = vpop.f32.mrf.mxu1 }
0x132c   :  { %v3737_v56 = vadd.f32 %v1416_v38, %v1315_v31 }
0x1333   :  { %v3739_v22 = vpop.f32.mrf.mxu0  ;;  %v1419_v50 = vpop.f32.mrf.mxu1 }
0x1334   :  { %v3741_v24 = vadd.f32 %v1419_v50, %v1315_v31 }
0x133b   :  { %v1392_v7 = vpop.f32.mrf.mxu0  ;;  %v1421_v9 = vpop.f32.mrf.mxu1 }
0x133c   :  { %v3744_v1 = vadd.f32 %v1392_v7, %v3721_v39  ;;  %v3746_v45 = vadd.f32 %v1421_v9, %v1315_v31 }
0x134a   :  { %v1395_v36 = vpop.f32.mrf.mxu0  ;;  %v1424_v42 = vpop.f32.mrf.mxu1 }
0x134b   :  { %v3749_v11 = vadd.f32 %v1395_v36, %v3721_v39  ;;  %v3751_v15 = vadd.f32 %v1424_v42, %v1315_v31 }
0x1352   :  { %v1426_v51 = vpop.f32.mrf.mxu1 }
0x1353   :  { %v1427_v13 = vadd.f32 %v1426_v51, %v1315_v31 }
0x1355   :  { %v1546_v44 = vadd.f32 %v1542_v59, %v1427_v13 }
0x1357   :  { %2821 = vtanh.f32 %v1546_v44  ;;  %v2635_v0 = vmul.f32 -1.442695, %v1546_v44 }
0x1358   :  { %2823 = vpow2.f32 %v2626_v37 }
0x135d   :  { %v2822_v4 = vpop.eup %2821 }
0x135e   :  { %1569 = vrot.lane.b32.xlu1 %v2822_v4, %s2948_s0  ;;  %v2824_v34 = vpop.eup %2823 }
0x135f   :  { %v1484_v18 = vadd.f32 1.0, %v2824_v34 }
0x1361   :  { %2825 = vrcp.f32 %v1484_v18  ;;  %v1496_v23 = vand.u32 2147483648, %v1484_v18  ;;  %vm1490_vm1 = vweird.f32 %v1484_v18  ;;  %v1494_v28 = vand.u32 2147483647, %v1484_v18 }
0x1362   :  { %2827 = vpow2.f32 %v2635_v0 }
0x1363   :  { %v1497_v55 = vor.u32 1.1754944e-38, %v1496_v23  ;;  %vm1495_vm3 = vcmp.eq.f32.partialorder %v1494_v28, 8.507059e+37 }
0x1367   :  { %v2826_v19 = vpop.eup %2825 }
0x1368   :  { %v1486_v47 = vmul.f32 %v2826_v19, %v1484_v18  ;;  %vm1491_vm14 = vweird.f32 %v2826_v19  ;;  %v2828_v27 = vpop.eup %2827 }
0x1369   :  { %vm1492_vm2 = vmor %vm1490_vm1, %vm1491_vm14  ;;  %v1550_v43 = vadd.f32 1.0, %v2828_v27 }
0x136a   :  { %v1487_v62 = vsub.f32 1.0, %v1486_v47 }
0x136b   :  { %2829 = vrcp.f32 %v1550_v43  ;;  %v1562_v53 = vand.u32 2147483648, %v1550_v43  ;;  %vm1556_vm5 = vweird.f32 %v1550_v43  ;;  %v1560_v30 = vand.u32 2147483647, %v1550_v43 }
0x136c   :  { %v1488_v8 = vmul.f32 %v2826_v19, %v1487_v62 }
0x136d   :  { %v1563_v38 = vor.u32 1.1754944e-38, %v1562_v53  ;;  %vm1561_vm14 = vcmp.eq.f32.partialorder %v1560_v30, 8.507059e+37 }
0x136e   :  { %v1489_v46 = vadd.f32 %v2826_v19, %v1488_v8 }
0x1370   :  { %v1493_v40 = vsel %vm1492_vm2, %v2826_v19, %v1489_v46 }
0x1371   :  { %v1498_v2 = vsel %vm1495_vm3, %v1497_v55, %v1493_v40  ;;  %v2830_v31 = vpop.eup %2829  ;;  %v1383_v40 = vadd.f32 %v3726_v48, %v3721_v39 }
0x1372   :  { %v1552_v35 = vmul.f32 %v2830_v31, %v1550_v43  ;;  %vm1557_vm4 = vweird.f32 %v2830_v31  ;;  %v1501_v7 = vmul.f32 0.0, %v1498_v2 }
0x1373   :  { %vm1558_vm6 = vmor %vm1556_vm5, %vm1557_vm4 }
0x1374   :  { %v1553_v6 = vsub.f32 1.0, %v1552_v35 }
0x1376   :  { %v1554_v26 = vmul.f32 %v2830_v31, %v1553_v6 }
0x1378   :  { %v1555_v17 = vadd.f32 %v2830_v31, %v1554_v26 }
0x137a   :  { %v1559_v10 = vsel %vm1558_vm6, %v2830_v31, %v1555_v17 }
0x137b   :  { %v1564_v50 = vsel %vm1561_vm14, %v1563_v38, %v1559_v10 }
0x137c   :  { %v1567_v51 = vmul.f32 0.0, %v1564_v50 }
0x1391   :  { %v1504_v3 = vpop.permute.xlu0 %1503 }
0x1392   :  { %v1506_v21 = vmul.f32 %v1504_v3, %v1498_v2 }
0x1394   :  { %1508 = vrot.lane.b32.xlu2 %v1506_v21, %s2949_s4 }
0x13d0   :  { %v1570_v59 = vpop.permute.xlu1 %1569 }
0x13d1   :  { %v1572_v14 = vmul.f32 %v1570_v59, %v1564_v50 }
0x13d3   :  { %1574 = vrot.lane.b32.xlu0 %v1572_v14, %s2949_s4 }
0x13ee   :  { %v1509_v9 = vpop.permute.xlu2 %1508 }
0x13ef   :  { %v3756_v36 = vadd.f32 %v1509_v9, %v1501_v7 }
0x13f1   :  { %2831 = vtanh.f32 %v3756_v36 }
0x13f7   :  { %v2832_v42 = vpop.eup %2831 }
0x13f8   :  { %1514 = vrot.lane.b32.xlu1 %v2832_v42, %s2948_s0 }
0x1445   :  { %v1575_v13 = vpop.permute.xlu0 %1574 }
0x1446   :  { %v3760_v44 = vadd.f32 %v1575_v13, %v1567_v51 }
0x1448   :  { %2833 = vtanh.f32 %v3760_v44 }
0x144e   :  { %v2834_v4 = vpop.eup %2833 }
0x144f   :  { %1580 = vrot.lane.b32.xlu2 %v2834_v4, %s2948_s0 }
0x146a   :  { %v1515_v37 = vpop.permute.xlu1 %1514 }
0x146b   :  { %v1517_v34 = vmul.f32 %v1515_v37, %v1498_v2 }
0x146d   :  { %v3766_v18 = vsel %vm243_vm12, %v1517_v34, 0.0 }
0x146e   :  { %v1587_v19 = vpack.c.bf16 %v3766_v18, %v3766_v18 }
0x1470   :  { %1589 = vrot.lane.b32.xlu0 %v1587_v19, %s2949_s4 }
0x14a9   :  { %v1581_v47 = vpop.permute.xlu2 %1580 }
0x14aa   :  { %v1583_v62 = vmul.f32 %v1581_v47, %v1564_v50 }
0x14ac   :  { %v3773_v8 = vsel %vm319_vm11, %v1583_v62, 0.0 }
0x14ad   :  { %v1648_v46 = vpack.c.bf16 %v3773_v8, %v3773_v8 }
0x14af   :  { %1650 = vrot.lane.b32.xlu1 %v1648_v46, %s2949_s4 }
0x14e2   :  { %v1590_v23 = vpop.permute.xlu0 %1589 }
0x14e3   :  { %2636 = vmatmul.msk.bf16.vlgmr.msrb.gmra.mxu2 %vm184_vm13, %v1590_v23 }
0x14e4   :  { %1844 = vmatpush.bf16.msrb.mxu2 %v3633_v12 }
0x14e8   :  { %1845 = vmatpush.bf16.msrb.mxu2 %v3655_v63 }
0x1521   :  { %v1651_v28 = vpop.permute.xlu1 %1650 }
0x1522   :  { %2638 = vmatmul.msk.bf16.vlgmr.msrb.gmra.mxu3 %vm184_vm13, %v1651_v28 }
0x1523   :  { %1905 = vmatpush.bf16.msrb.mxu3 %v3688_v16 }
0x1527   :  { %1906 = vmatpush.bf16.msrb.mxu3 %v3698_v52 }
0x1566   :  { %v1603_v55 = vpop.f32.mrf.mxu2 }
0x1567   :  { %v1607_v3 = vadd.f32 %v1603_v55, %v1383_v40 }
0x1569   :  { %2835 = vtanh.f32 %v1607_v3  ;;  %v2637_v0 = vmul.f32 -1.442695, %v1607_v3 }
0x156b   :  { %2837 = vpow2.f32 %v2637_v0 }
0x156e   :  { %v1605_v2 = vpop.f32.mrf.mxu2 }
0x156f   :  { %v2836_v21 = vpop.eup %2835  ;;  %v3794_v2 = vsel %vm243_vm12, %v3756_v36, 0.0 }
0x1570   :  { %1630 = vrot.lane.b32.xlu2 %v2836_v21, %s2948_s0 }
0x1571   :  { %v2838_v31 = vpop.eup %2837 }
0x1572   :  { %v1611_v35 = vadd.f32 1.0, %v2838_v31  ;;  %v3804_v31 = vsel %vm319_vm11, %v3760_v44, 0.0 }
0x1574   :  { %v1623_v38 = vand.u32 2147483648, %v1611_v35  ;;  %vm1617_vm2 = vweird.f32 %v1611_v35  ;;  %v1621_v59 = vand.u32 2147483647, %v1611_v35 }
0x1576   :  { %vm1622_vm4 = vcmp.eq.f32.partialorder %v1621_v59, 8.507059e+37 }
0x15a5   :  { %v1664_v27 = vpop.f32.mrf.mxu3 }
0x15a6   :  { %v1668_v43 = vadd.f32 %v1664_v27, %v3751_v15  ;;  %v1624_v15 = vor.u32 1.1754944e-38, %v1623_v38 }
0x15a8   :  { %2839 = vtanh.f32 %v1668_v43  ;;  %v2639_v42 = vmul.f32 -1.442695, %v1668_v43 }
0x15a9   :  { %2841 = vrcp.f32 %v1611_v35 }
0x15aa   :  { %2843 = vpow2.f32 %v2639_v42 }
0x15ad   :  { %v1666_v6 = vpop.f32.mrf.mxu3 }
0x15ae   :  { %v2840_v26 = vpop.eup %2839 }
0x15af   :  { %1691 = vrot.lane.b32.xlu0 %v2840_v26, %s2948_s0  ;;  %v2842_v48 = vpop.eup %2841 }
0x15b0   :  { %v1613_v17 = vmul.f32 %v2842_v48, %v1611_v35  ;;  %vm1618_vm1 = vweird.f32 %v2842_v48  ;;  %v2844_v51 = vpop.eup %2843 }
0x15b1   :  { %vm1619_vm3 = vmor %vm1617_vm2, %vm1618_vm1  ;;  %v1672_v13 = vadd.f32 1.0, %v2844_v51 }
0x15b2   :  { %v1614_v53 = vsub.f32 1.0, %v1613_v17 }
0x15b3   :  { %2845 = vrcp.f32 %v1672_v13  ;;  %v1684_v62 = vand.u32 2147483648, %v1672_v13  ;;  %vm1678_vm6 = vweird.f32 %v1672_v13  ;;  %v1682_v46 = vand.u32 2147483647, %v1672_v13 }
0x15b4   :  { %v1615_v30 = vmul.f32 %v2842_v48, %v1614_v53 }
0x15b5   :  { %v1685_v28 = vor.u32 1.1754944e-38, %v1684_v62  ;;  %vm1683_vm1 = vcmp.eq.f32.partialorder %v1682_v46, 8.507059e+37 }
0x15b6   :  { %v1616_v10 = vadd.f32 %v2842_v48, %v1615_v30 }
0x15b8   :  { %v1620_v50 = vsel %vm1619_vm3, %v2842_v48, %v1616_v10 }
0x15b9   :  { %v1625_v7 = vsel %vm1622_vm4, %v1624_v15, %v1620_v50  ;;  %v2846_v4 = vpop.eup %2845 }
0x15ba   :  { %v1674_v37 = vmul.f32 %v2846_v4, %v1672_v13  ;;  %vm1679_vm5 = vweird.f32 %v2846_v4  ;;  %v1628_v21 = vmul.f32 %v1625_v7, %v3794_v2 }
0x15bb   :  { %vm1680_vm14 = vmor %vm1678_vm6, %vm1679_vm5 }
0x15bc   :  { %v1675_v34 = vsub.f32 1.0, %v1674_v37 }
0x15be   :  { %v1676_v19 = vmul.f32 %v2846_v4, %v1675_v34 }
0x15c0   :  { %v1677_v47 = vadd.f32 %v2846_v4, %v1676_v19 }
0x15c2   :  { %v1681_v23 = vsel %vm1680_vm14, %v2846_v4, %v1677_v47 }
0x15c3   :  { %v1686_v55 = vsel %vm1683_vm1, %v1685_v28, %v1681_v23 }
0x15c4   :  { %v1689_v35 = vmul.f32 %v1686_v55, %v3804_v31 }
0x15ca   :  { %v1631_v14 = vpop.permute.xlu2 %1630 }
0x15cb   :  { %v1633_v9 = vmul.f32 %v1631_v14, %v1625_v7 }
0x15cd   :  { %1635 = vrot.lane.b32.xlu1 %v1633_v9, %s2949_s4 }
0x1621   :  { %v1692_v40 = vpop.permute.xlu0 %1691 }
0x1622   :  { %v1694_v3 = vmul.f32 %v1692_v40, %v1686_v55 }
0x1624   :  { %1696 = vrot.lane.b32.xlu2 %v1694_v3, %s2949_s4 }
0x163f   :  { %v1636_v0 = vpop.permute.xlu1 %1635 }
0x1640   :  { %v3797_v27 = vadd.f32 %v1636_v0, %v1628_v21 }
0x1642   :  { %2847 = vtanh.f32 %v3797_v27 }
0x1648   :  { %v2848_v43 = vpop.eup %2847 }
0x1649   :  { %1641 = vrot.lane.b32.xlu0 %v2848_v43, %s2948_s0 }
0x167e   :  { %v1697_v6 = vpop.permute.xlu2 %1696 }
0x167f   :  { %v3807_v36 = vadd.f32 %v1697_v6, %v1689_v35 }
0x1681   :  { %2849 = vtanh.f32 %v3807_v36 }
0x1687   :  { %v2850_v26 = vpop.eup %2849 }
0x1688   :  { %1702 = vrot.lane.b32.xlu1 %v2850_v26, %s2948_s0 }
0x16bb   :  { %v1642_v48 = vpop.permute.xlu0 %1641 }
0x16bc   :  { %v1644_v17 = vmul.f32 %v1642_v48, %v1625_v7 }
0x16be   :  { %v3814_v53 = vsel %vm391_vm9, %v1644_v17, %v3766_v18 }
0x16bf   :  { %v1709_v44 = vpack.c.bf16 %v3814_v53, %v3814_v53 }
0x16c1   :  { %1711 = vrot.lane.b32.xlu2 %v1709_v44, %s2949_s4 }
0x16fa   :  { %v1703_v30 = vpop.permute.xlu1 %1702 }
0x16fb   :  { %v1705_v10 = vmul.f32 %v1703_v30, %v1686_v55 }
0x16fd   :  { %v3822_v38 = vsel %vm463_vm7, %v1705_v10, %v3773_v8  ;;  %v1386_v8 = vadd.f32 %v3731_v58, %v3721_v39 }
0x16fe   :  { %v1770_v59 = vpack.c.bf16 %v3822_v38, %v3822_v38 }
0x1700   :  { %1772 = vrot.lane.b32.xlu0 %v1770_v59, %s2949_s4 }
0x171b   :  { %v1712_v50 = vpop.permute.xlu2 %1711 }
0x171c   :  { %2640 = vmatmul.msk.bf16.vlgmr.msra.gmra.mxu2 %vm184_vm13, %v1712_v50 }
0x171d   :  { %2088 = vmatpush.bf16.msra.mxu2 %v3633_v12 }
0x1721   :  { %2089 = vmatpush.bf16.msra.mxu2 %v3655_v63 }
0x1772   :  { %v1773_v18 = vpop.permute.xlu0 %1772 }
0x1773   :  { %2642 = vmatmul.msk.bf16.vlgmr.msra.gmra.mxu3 %vm184_vm13, %v1773_v18 }
0x1774   :  { %2149 = vmatpush.bf16.msra.mxu3 %v3688_v16 }
0x1778   :  { %2150 = vmatpush.bf16.msra.mxu3 %v3698_v52 }
0x179f   :  { %v1725_v15 = vpop.f32.mrf.mxu2 }
0x17a0   :  { %v1729_v14 = vadd.f32 %v1725_v15, %v1386_v8 }
0x17a2   :  { %2851 = vtanh.f32 %v1729_v14  ;;  %v2641_v42 = vmul.f32 -1.442695, %v1729_v14 }
0x17a4   :  { %2853 = vpow2.f32 %v2641_v42 }
0x17a7   :  { %v1727_v7 = vpop.f32.mrf.mxu2 }
0x17a8   :  { %v2852_v9 = vpop.eup %2851  ;;  %v3844_v7 = vsel %vm391_vm9, %v3797_v27, %v3794_v2 }
0x17a9   :  { %1752 = vrot.lane.b32.xlu1 %v2852_v9, %s2948_s0 }
0x17aa   :  { %v2854_v4 = vpop.eup %2853 }
0x17ab   :  { %v1733_v37 = vadd.f32 1.0, %v2854_v4  ;;  %v3855_v4 = vsel %vm463_vm7, %v3807_v36, %v3804_v31 }
0x17ad   :  { %v1745_v28 = vand.u32 2147483648, %v1733_v37  ;;  %vm1739_vm3 = vweird.f32 %v1733_v37  ;;  %v1743_v40 = vand.u32 2147483647, %v1733_v37 }
0x17af   :  { %vm1744_vm5 = vcmp.eq.f32.partialorder %v1743_v40, 8.507059e+37 }
0x17f6   :  { %v1786_v51 = vpop.f32.mrf.mxu3 }
0x17f7   :  { %v1790_v13 = vadd.f32 %v1786_v51, %v3746_v45  ;;  %v1746_v45 = vor.u32 1.1754944e-38, %v1745_v28 }
0x17f9   :  { %2855 = vtanh.f32 %v1790_v13  ;;  %v2643_v43 = vmul.f32 -1.442695, %v1790_v13 }
0x17fa   :  { %2857 = vrcp.f32 %v1733_v37 }
0x17fb   :  { %2859 = vpow2.f32 %v2643_v43 }
0x17fe   :  { %v1788_v34 = vpop.f32.mrf.mxu3 }
0x17ff   :  { %v2856_v19 = vpop.eup %2855 }
0x1800   :  { %1813 = vrot.lane.b32.xlu2 %v2856_v19, %s2948_s0  ;;  %v2858_v58 = vpop.eup %2857 }
0x1801   :  { %v1735_v47 = vmul.f32 %v2858_v58, %v1733_v37  ;;  %vm1740_vm2 = vweird.f32 %v2858_v58  ;;  %v2860_v35 = vpop.eup %2859 }
0x1802   :  { %vm1741_vm4 = vmor %vm1739_vm3, %vm1740_vm2  ;;  %v1794_v6 = vadd.f32 1.0, %v2860_v35 }
0x1803   :  { %v1736_v62 = vsub.f32 1.0, %v1735_v47 }
0x1804   :  { %2861 = vrcp.f32 %v1794_v6  ;;  %v1806_v10 = vand.u32 2147483648, %v1794_v6  ;;  %vm1800_vm14 = vweird.f32 %v1794_v6  ;;  %v1804_v59 = vand.u32 2147483647, %v1794_v6 }
0x1805   :  { %v1737_v46 = vmul.f32 %v2858_v58, %v1736_v62 }
0x1806   :  { %v1807_v18 = vor.u32 1.1754944e-38, %v1806_v10  ;;  %vm1805_vm2 = vcmp.eq.f32.partialorder %v1804_v59, 8.507059e+37 }
0x1807   :  { %v1738_v23 = vadd.f32 %v2858_v58, %v1737_v46 }
0x1809   :  { %v1742_v55 = vsel %vm1741_vm4, %v2858_v58, %v1738_v23 }
0x180a   :  { %v1747_v3 = vsel %vm1744_vm5, %v1746_v45, %v1742_v55  ;;  %v2862_v26 = vpop.eup %2861 }
0x180b   :  { %v1796_v48 = vmul.f32 %v2862_v26, %v1794_v6  ;;  %vm1801_vm6 = vweird.f32 %v2862_v26  ;;  %v1750_v9 = vmul.f32 %v1747_v3, %v3844_v7 }
0x180c   :  { %vm1802_vm1 = vmor %vm1800_vm14, %vm1801_vm6 }
0x180d   :  { %v1797_v17 = vsub.f32 1.0, %v1796_v48 }
0x180f   :  { %v1798_v44 = vmul.f32 %v2862_v26, %v1797_v17 }
0x1811   :  { %v1799_v30 = vadd.f32 %v2862_v26, %v1798_v44 }
0x1813   :  { %v1803_v50 = vsel %vm1802_vm1, %v2862_v26, %v1799_v30 }
0x1814   :  { %v1808_v15 = vsel %vm1805_vm2, %v1807_v18, %v1803_v50 }
0x1815   :  { %v1811_v37 = vmul.f32 %v1808_v15, %v3855_v4 }
0x181b   :  { %v1753_v21 = vpop.permute.xlu1 %1752 }
0x181c   :  { %v1755_v0 = vmul.f32 %v1753_v21, %v1747_v3 }
0x181e   :  { %1757 = vrot.lane.b32.xlu0 %v1755_v0, %s2949_s4 }
0x185a   :  { %v1814_v8 = vpop.permute.xlu2 %1813 }
0x185b   :  { %v1816_v14 = vmul.f32 %v1814_v8, %v1808_v15 }
0x185d   :  { %1818 = vrot.lane.b32.xlu1 %v1816_v14, %s2949_s4 }
0x1890   :  { %v1758_v42 = vpop.permute.xlu0 %1757 }
0x1891   :  { %v3847_v51 = vadd.f32 %v1758_v42, %v1750_v9 }
0x1893   :  { %2863 = vtanh.f32 %v3847_v51 }
0x1899   :  { %v2864_v13 = vpop.eup %2863 }
0x189a   :  { %1763 = vrot.lane.b32.xlu2 %v2864_v13, %s2948_s0 }
0x18cf   :  { %v1819_v2 = vpop.permute.xlu1 %1818 }
0x18d0   :  { %v3858_v27 = vadd.f32 %v1819_v2, %v1811_v37 }
0x18d2   :  { %2865 = vtanh.f32 %v3858_v27 }
0x18d8   :  { %v2866_v34 = vpop.eup %2865 }
0x18d9   :  { %1824 = vrot.lane.b32.xlu0 %v2866_v34, %s2948_s0 }
0x18f4   :  { %v1764_v19 = vpop.permute.xlu2 %1763 }
0x18f5   :  { %v1766_v58 = vmul.f32 %v1764_v19, %v1747_v3 }
0x18f7   :  { %v3865_v47 = vsel %vm535_vm10, %v1766_v58, %v3814_v53 }
0x18f8   :  { %v1831_v31 = vpack.c.bf16 %v3865_v47, %v3865_v47 }
0x18fa   :  { %1833 = vrot.lane.b32.xlu1 %v1831_v31, %s2949_s4 }
0x194b   :  { %v1825_v36 = vpop.permute.xlu0 %1824 }
0x194c   :  { %v1827_v62 = vmul.f32 %v1825_v36, %v1808_v15 }
0x194e   :  { %v3873_v46 = vsel %vm607_vm8, %v1827_v62, %v3822_v38  ;;  %v1388_v38 = vadd.f32 %v3735_v32, %v3721_v39 }
0x194f   :  { %v1892_v23 = vpack.c.bf16 %v3873_v46, %v3873_v46 }
0x1951   :  { %1894 = vrot.lane.b32.xlu2 %v1892_v23, %s2949_s4  ;;  %v3895_v23 = vsel %vm535_vm10, %v3847_v51, %v3844_v7 }
0x196c   :  { %v1834_v28 = vpop.permute.xlu1 %1833 }
0x196d   :  { %2644 = vmatmul.msk.bf16.vlgmr.msrb.gmra.mxu2 %vm184_vm13, %v1834_v28 }
0x196e   :  { %2332 = vmatpush.bf16.msrb.mxu2 %v3633_v12 }
0x1972   :  { %2333 = vmatpush.bf16.msrb.mxu2 %v3655_v63 }
0x19ab   :  { %v1895_v53 = vpop.permute.xlu2 %1894 }
0x19ac   :  { %2646 = vmatmul.msk.bf16.vlgmr.msrb.gmra.mxu3 %vm184_vm13, %v1895_v53 }
0x19ad   :  { %2392 = vmatpush.bf16.msrb.mxu3 %v3688_v16 }
0x19b1   :  { %2393 = vmatpush.bf16.msrb.mxu3 %v3698_v52 }
0x19f0   :  { %v1847_v40 = vpop.f32.mrf.mxu2 }
0x19f1   :  { %v1851_v55 = vadd.f32 %v1847_v40, %v1388_v38 }
0x19f3   :  { %2867 = vtanh.f32 %v1851_v55  ;;  %v2645_v16 = vmul.f32 -1.442695, %v1851_v55  ;;  %v3906_v55 = vsel %vm607_vm8, %v3858_v27, %v3855_v4 }
0x19f8   :  { %v1849_v45 = vpop.f32.mrf.mxu2 }
0x19f9   :  { %v2868_v3 = vpop.eup %2867 }
0x19fa   :  { %1874 = vrot.lane.b32.xlu0 %v2868_v3, %s2948_s0 }
0x1a2f   :  { %v1908_v12 = vpop.f32.mrf.mxu3 }
0x1a30   :  { %v1912_v63 = vadd.f32 %v1908_v12, %v3741_v24 }
0x1a32   :  { %2869 = vtanh.f32 %v1912_v63  ;;  %v2647_v18 = vmul.f32 -1.442695, %v1912_v63 }
0x1a33   :  { %2871 = vpow2.f32 %v2645_v16 }
0x1a37   :  { %v1910_v21 = vpop.f32.mrf.mxu3 }
0x1a38   :  { %v2870_v0 = vpop.eup %2869 }
0x1a39   :  { %1935 = vrot.lane.b32.xlu1 %v2870_v0, %s2948_s0  ;;  %v2872_v52 = vpop.eup %2871 }
0x1a3a   :  { %v1855_v43 = vadd.f32 1.0, %v2872_v52 }
0x1a3c   :  { %2873 = vrcp.f32 %v1855_v43  ;;  %v1867_v17 = vand.u32 2147483648, %v1855_v43  ;;  %vm1861_vm4 = vweird.f32 %v1855_v43  ;;  %v1865_v44 = vand.u32 2147483647, %v1855_v43 }
0x1a3d   :  { %2875 = vpow2.f32 %v2647_v18 }
0x1a3e   :  { %v1868_v30 = vor.u32 1.1754944e-38, %v1867_v17  ;;  %vm1866_vm6 = vcmp.eq.f32.partialorder %v1865_v44, 8.507059e+37 }
0x1a42   :  { %v2874_v32 = vpop.eup %2873 }
0x1a43   :  { %v1857_v35 = vmul.f32 %v2874_v32, %v1855_v43  ;;  %vm1862_vm3 = vweird.f32 %v2874_v32  ;;  %v2876_v8 = vpop.eup %2875 }
0x1a44   :  { %vm1863_vm5 = vmor %vm1861_vm4, %vm1862_vm3  ;;  %v1916_v15 = vadd.f32 1.0, %v2876_v8 }
0x1a45   :  { %v1858_v6 = vsub.f32 1.0, %v1857_v35  ;;  %v1391_v35 = vadd.f32 %v3739_v22, %v3721_v39 }
0x1a46   :  { %2877 = vrcp.f32 %v1916_v15  ;;  %v1928_v2 = vand.u32 2147483648, %v1916_v15  ;;  %vm1922_vm1 = vweird.f32 %v1916_v15  ;;  %v1926_v34 = vand.u32 2147483647, %v1916_v15 }
0x1a47   :  { %v1859_v26 = vmul.f32 %v2874_v32, %v1858_v6 }
0x1a48   :  { %v1929_v58 = vor.u32 1.1754944e-38, %v1928_v2  ;;  %vm1927_vm3 = vcmp.eq.f32.partialorder %v1926_v34, 8.507059e+37 }
0x1a49   :  { %v1860_v48 = vadd.f32 %v2874_v32, %v1859_v26 }
0x1a4b   :  { %v1864_v24 = vsel %vm1863_vm5, %v2874_v32, %v1860_v48  ;;  %v3931_v32 = vpop.f32.mrf.mxu0 }
0x1a4c   :  { %v1869_v59 = vsel %vm1866_vm6, %v1868_v30, %v1864_v24  ;;  %v2878_v14 = vpop.eup %2877 }
0x1a4d   :  { %v1918_v9 = vmul.f32 %v2878_v14, %v1916_v15  ;;  %vm1923_vm14 = vweird.f32 %v2878_v14  ;;  %v1872_v28 = vmul.f32 %v1869_v59, %v3895_v23 }
0x1a4e   :  { %vm1924_vm2 = vmor %vm1922_vm1, %vm1923_vm14 }
0x1a4f   :  { %v1919_v42 = vsub.f32 1.0, %v1918_v9 }
0x1a51   :  { %v1920_v13 = vmul.f32 %v2878_v14, %v1919_v42 }
0x1a53   :  { %v1921_v37 = vadd.f32 %v2878_v14, %v1920_v13 }
0x1a55   :  { %v1925_v19 = vsel %vm1924_vm2, %v2878_v14, %v1921_v37 }
0x1a56   :  { %v1930_v31 = vsel %vm1927_vm3, %v1929_v58, %v1925_v19 }
0x1a57   :  { %v1933_v45 = vmul.f32 %v1930_v31, %v3906_v55 }
0x1a6c   :  { %v1875_v10 = vpop.permute.xlu0 %1874 }
0x1a6d   :  { %v1877_v50 = vmul.f32 %v1875_v10, %v1869_v59 }
0x1a6f   :  { %1879 = vrot.lane.b32.xlu2 %v1877_v50, %s2949_s4 }
0x1aab   :  { %v1936_v36 = vpop.permute.xlu1 %1935 }
0x1aac   :  { %v1938_v62 = vmul.f32 %v1936_v36, %v1930_v31 }
0x1aae   :  { %1940 = vrot.lane.b32.xlu0 %v1938_v62, %s2949_s4 }
0x1ac9   :  { %v1880_v53 = vpop.permute.xlu2 %1879 }
0x1aca   :  { %v3898_v38 = vadd.f32 %v1880_v53, %v1872_v28 }
0x1acc   :  { %2879 = vtanh.f32 %v3898_v38 }
0x1ad2   :  { %v2880_v40 = vpop.eup %2879 }
0x1ad3   :  { %1885 = vrot.lane.b32.xlu1 %v2880_v40, %s2948_s0 }
0x1b20   :  { %v1941_v7 = vpop.permute.xlu0 %1940 }
0x1b21   :  { %v3909_v51 = vadd.f32 %v1941_v7, %v1933_v45 }
0x1b23   :  { %2881 = vtanh.f32 %v3909_v51 }
0x1b29   :  { %v2882_v3 = vpop.eup %2881 }
0x1b2a   :  { %1946 = vrot.lane.b32.xlu2 %v2882_v3, %s2948_s0 }
0x1b45   :  { %v1886_v12 = vpop.permute.xlu1 %1885 }
0x1b46   :  { %v1888_v63 = vmul.f32 %v1886_v12, %v1869_v59 }
0x1b48   :  { %v3916_v21 = vsel %vm679_vm0, %v1888_v63, %v3865_v47 }
0x1b49   :  { %v1953_v4 = vpack.c.bf16 %v3916_v21, %v3916_v21 }
0x1b4b   :  { %1955 = vrot.lane.b32.xlu0 %v1953_v4, %s2949_s4 }
0x1b84   :  { %v1947_v27 = vpop.permute.xlu2 %1946 }
0x1b85   :  { %v1949_v0 = vmul.f32 %v1947_v27, %v1930_v31 }
0x1b87   :  { %v3924_v16 = vsel %vm751_vm15, %v1949_v0, %v3873_v46  ;;  %v3944_v0 = vsel %vm679_vm0, %v3898_v38, %v3895_v23 }
0x1b88   :  { %v2014_v52 = vpack.c.bf16 %v3924_v16, %v3924_v16 }
0x1b8a   :  { %2016 = vrot.lane.b32.xlu1 %v2014_v52, %s2949_s4 }
0x1bbd   :  { %v1956_v43 = vpop.permute.xlu0 %1955 }
0x1bbe   :  { %2648 = vmatmul.msk.bf16.vlgmr.msra.gmra.mxu0 %vm184_vm13, %v1956_v43 }
0x1bbf   :  { %2460 = vmatpush.msra.mxu0 %v2442_v5 }
0x1bfc   :  { %v2017_v47 = vpop.permute.xlu1 %2016 }
0x1bfd   :  { %2650 = vmatmul.msk.bf16.vlgmr.msra.gmra.mxu1 %vm184_vm13, %v2017_v47 }
0x1c3b   :  { %v1969_v6 = vpop.f32.mrf.mxu0 }
0x1c3c   :  { %v1973_v26 = vadd.f32 %v1969_v6, %v1391_v35  ;;  %v3955_v6 = vsel %vm751_vm15, %v3909_v51, %v3906_v55 }
0x1c3e   :  { %2883 = vtanh.f32 %v1973_v26  ;;  %v2649_v17 = vmul.f32 -1.442695, %v1973_v26 }
0x1c40   :  { %2885 = vpow2.f32 %v2649_v17 }
0x1c43   :  { %v1971_v46 = vpop.f32.mrf.mxu0 }
0x1c44   :  { %v2884_v48 = vpop.eup %2883 }
0x1c45   :  { %1996 = vrot.lane.b32.xlu2 %v2884_v48, %s2948_s0 }
0x1c46   :  { %v2886_v30 = vpop.eup %2885 }
0x1c47   :  { %v1977_v10 = vadd.f32 1.0, %v2886_v30 }
0x1c49   :  { %v1989_v9 = vand.u32 2147483648, %v1977_v10  ;;  %vm1983_vm5 = vweird.f32 %v1977_v10  ;;  %v1987_v42 = vand.u32 2147483647, %v1977_v10 }
0x1c4b   :  { %vm1988_vm14 = vcmp.eq.f32.partialorder %v1987_v42, 8.507059e+37 }
0x1c7a   :  { %v2030_v44 = vpop.f32.mrf.mxu1 }
0x1c7b   :  { %v2034_v24 = vadd.f32 %v2030_v44, %v3737_v56  ;;  %v1990_v56 = vor.u32 1.1754944e-38, %v1989_v9 }
0x1c7d   :  { %2887 = vtanh.f32 %v2034_v24  ;;  %v2651_v19 = vmul.f32 -1.442695, %v2034_v24 }
0x1c7e   :  { %2889 = vrcp.f32 %v1977_v10 }
0x1c7f   :  { %2891 = vpow2.f32 %v2651_v19 }
0x1c82   :  { %v2032_v59 = vpop.f32.mrf.mxu1 }
0x1c83   :  { %v2888_v50 = vpop.eup %2887 }
0x1c84   :  { %2057 = vrot.lane.b32.xlu0 %v2888_v50, %s2948_s0  ;;  %v2890_v22 = vpop.eup %2889 }
0x1c85   :  { %v1979_v18 = vmul.f32 %v2890_v22, %v1977_v10  ;;  %vm1984_vm4 = vweird.f32 %v2890_v22  ;;  %v2892_v58 = vpop.eup %2891 }
0x1c86   :  { %vm1985_vm6 = vmor %vm1983_vm5, %vm1984_vm4  ;;  %v2038_v31 = vadd.f32 1.0, %v2892_v58 }
0x1c87   :  { %v1980_v8 = vsub.f32 1.0, %v1979_v18 }
0x1c88   :  { %2893 = vrcp.f32 %v2038_v31  ;;  %v2050_v45 = vand.u32 2147483648, %v2038_v31  ;;  %vm2044_vm2 = vweird.f32 %v2038_v31  ;;  %v2048_v7 = vand.u32 2147483647, %v2038_v31 }
0x1c89   :  { %v1981_v15 = vmul.f32 %v2890_v22, %v1980_v8 }
0x1c8a   :  { %v2051_v12 = vor.u32 1.1754944e-38, %v2050_v45  ;;  %vm2049_vm4 = vcmp.eq.f32.partialorder %v2048_v7, 8.507059e+37 }
0x1c8b   :  { %v1982_v14 = vadd.f32 %v2890_v22, %v1981_v15 }
0x1c8d   :  { %v1986_v13 = vsel %vm1985_vm6, %v2890_v22, %v1982_v14 }
0x1c8e   :  { %v1991_v2 = vsel %vm1988_vm14, %v1990_v56, %v1986_v13  ;;  %v2894_v36 = vpop.eup %2893 }
0x1c8f   :  { %v2040_v62 = vmul.f32 %v2894_v36, %v2038_v31  ;;  %vm2045_vm1 = vweird.f32 %v2894_v36  ;;  %v1994_v52 = vmul.f32 %v1991_v2, %v3944_v0 }
0x1c90   :  { %vm2046_vm3 = vmor %vm2044_vm2, %vm2045_vm1 }
0x1c91   :  { %v2041_v28 = vsub.f32 1.0, %v2040_v62 }
0x1c93   :  { %v2042_v53 = vmul.f32 %v2894_v36, %v2041_v28 }
0x1c95   :  { %v2043_v40 = vadd.f32 %v2894_v36, %v2042_v53 }
0x1c97   :  { %v2047_v3 = vsel %vm2046_vm3, %v2894_v36, %v2043_v40 }
0x1c98   :  { %v2052_v4 = vsel %vm2049_vm4, %v2051_v12, %v2047_v3 }
0x1c99   :  { %v2055_v26 = vmul.f32 %v2052_v4, %v3955_v6 }
0x1c9f   :  { %v1997_v37 = vpop.permute.xlu2 %1996 }
0x1ca0   :  { %v1999_v34 = vmul.f32 %v1997_v37, %v1991_v2 }
0x1ca2   :  { %2001 = vrot.lane.b32.xlu1 %v1999_v34, %s2949_s4 }
0x1cf6   :  { %v2058_v63 = vpop.permute.xlu0 %2057 }
0x1cf7   :  { %v2060_v27 = vmul.f32 %v2058_v63, %v2052_v4 }
0x1cf9   :  { %2062 = vrot.lane.b32.xlu2 %v2060_v27, %s2949_s4 }
0x1d14   :  { %v2002_v43 = vpop.permute.xlu1 %2001 }
0x1d15   :  { %v3947_v47 = vadd.f32 %v2002_v43, %v1994_v52 }
0x1d17   :  { %2895 = vtanh.f32 %v3947_v47 }
0x1d1d   :  { %v2896_v35 = vpop.eup %2895 }
0x1d1e   :  { %2007 = vrot.lane.b32.xlu0 %v2896_v35, %s2948_s0 }
0x1d53   :  { %v2063_v23 = vpop.permute.xlu2 %2062 }
0x1d54   :  { %v3958_v38 = vadd.f32 %v2063_v23, %v2055_v26 }
0x1d56   :  { %2897 = vtanh.f32 %v3958_v38 }
0x1d5c   :  { %v2898_v46 = vpop.eup %2897 }
0x1d5d   :  { %2068 = vrot.lane.b32.xlu1 %v2898_v46, %s2948_s0 }
0x1d90   :  { %v2008_v48 = vpop.permute.xlu0 %2007 }
0x1d91   :  { %v2010_v17 = vmul.f32 %v2008_v48, %v1991_v2 }
0x1d93   :  { %v3965_v44 = vsel %vm751_vm15, %v2010_v17, %v3916_v21  ;;  %v3990_v17 = vsel %vm751_vm15, %v3947_v47, %v3944_v0 }
0x1d94   :  { %v2075_v55 = vpack.c.bf16 %v3965_v44, %v3965_v44 }
0x1d96   :  { %2077 = vrot.lane.b32.xlu2 %v2075_v55, %s2949_s4 }
0x1dcf   :  { %v2069_v51 = vpop.permute.xlu1 %2068 }
0x1dd0   :  { %v2071_v24 = vmul.f32 %v2069_v51, %v2052_v4 }
0x1dd2   :  { %v3973_v30 = vsel %vm679_vm0, %v2071_v24, %v3924_v16 }
0x1dd3   :  { %v2136_v10 = vpack.c.bf16 %v3973_v30, %v3973_v30 }
0x1dd5   :  { %2138 = vrot.lane.b32.xlu0 %v2136_v10, %s2949_s4 }
0x1df0   :  { %v2078_v59 = vpop.permute.xlu2 %2077 }
0x1df1   :  { %2652 = vmatmul.msk.bf16.vlgmr.msra.gmra.mxu2 %vm184_vm13, %v2078_v59  ;;  %v4001_v59 = vsel %vm679_vm0, %v3958_v38, %v3955_v6 }
0x1e47   :  { %v2139_v21 = vpop.permute.xlu0 %2138 }
0x1e48   :  { %2654 = vmatmul.msk.bf16.vlgmr.msra.gmra.mxu3 %vm184_vm13, %v2139_v21 }
0x1e74   :  { %v2091_v50 = vpop.f32.mrf.mxu2 }
0x1e75   :  { %v2095_v22 = vadd.f32 %v2091_v50, %v3744_v1 }
0x1e77   :  { %2899 = vtanh.f32 %v2095_v22  ;;  %v2653_v16 = vmul.f32 -1.442695, %v2095_v22 }
0x1e79   :  { %2901 = vpow2.f32 %v2653_v16 }
0x1e7c   :  { %v2093_v18 = vpop.f32.mrf.mxu2 }
0x1e7d   :  { %v2900_v8 = vpop.eup %2899 }
0x1e7e   :  { %2118 = vrot.lane.b32.xlu1 %v2900_v8, %s2948_s0 }
0x1e7f   :  { %v2902_v9 = vpop.eup %2901 }
0x1e80   :  { %v2099_v42 = vadd.f32 1.0, %v2902_v9 }
0x1e82   :  { %v2111_v58 = vand.u32 2147483648, %v2099_v42  ;;  %vm2105_vm6 = vweird.f32 %v2099_v42  ;;  %v2109_v31 = vand.u32 2147483647, %v2099_v42 }
0x1e84   :  { %vm2110_vm1 = vcmp.eq.f32.partialorder %v2109_v31, 8.507059e+37 }
0x1ecb   :  { %v2152_v15 = vpop.f32.mrf.mxu3 }
0x1ecc   :  { %v2156_v14 = vadd.f32 %v2152_v15, %v3733_v25  ;;  %v2112_v25 = vor.u32 1.1754944e-38, %v2111_v58 }
0x1ece   :  { %2903 = vtanh.f32 %v2156_v14  ;;  %v2655_v40 = vmul.f32 -1.442695, %v2156_v14 }
0x1ecf   :  { %2905 = vrcp.f32 %v2099_v42 }
0x1ed0   :  { %2907 = vpow2.f32 %v2655_v40 }
0x1ed3   :  { %v2154_v13 = vpop.f32.mrf.mxu3 }
0x1ed4   :  { %v2904_v56 = vpop.eup %2903 }
0x1ed5   :  { %2179 = vrot.lane.b32.xlu2 %v2904_v56, %s2948_s0  ;;  %v2906_v37 = vpop.eup %2905 }
0x1ed6   :  { %v2101_v1 = vmul.f32 %v2906_v37, %v2099_v42  ;;  %vm2106_vm5 = vweird.f32 %v2906_v37  ;;  %v2908_v45 = vpop.eup %2907 }
0x1ed7   :  { %vm2107_vm14 = vmor %vm2105_vm6, %vm2106_vm5  ;;  %v2160_v7 = vadd.f32 1.0, %v2908_v45 }
0x1ed8   :  { %v2102_v2 = vsub.f32 1.0, %v2101_v1 }
0x1ed9   :  { %2909 = vrcp.f32 %v2160_v7  ;;  %v2172_v52 = vand.u32 2147483648, %v2160_v7  ;;  %vm2166_vm3 = vweird.f32 %v2160_v7  ;;  %v2170_v43 = vand.u32 2147483647, %v2160_v7 }
0x1eda   :  { %v2103_v34 = vmul.f32 %v2906_v37, %v2102_v2 }
0x1edb   :  { %v2173_v26 = vor.u32 1.1754944e-38, %v2172_v52  ;;  %vm2171_vm5 = vcmp.eq.f32.partialorder %v2170_v43, 8.507059e+37 }
0x1edc   :  { %v2104_v19 = vadd.f32 %v2906_v37, %v2103_v34 }
0x1ede   :  { %v2108_v36 = vsel %vm2107_vm14, %v2906_v37, %v2104_v19 }
0x1edf   :  { %v2113_v62 = vsel %vm2110_vm1, %v2112_v25, %v2108_v36  ;;  %v2910_v3 = vpop.eup %2909 }
0x1ee0   :  { %v2162_v12 = vmul.f32 %v2910_v3, %v2160_v7  ;;  %vm2167_vm2 = vweird.f32 %v2910_v3  ;;  %v2116_v55 = vmul.f32 %v2113_v62, %v3990_v17 }
0x1ee1   :  { %vm2168_vm4 = vmor %vm2166_vm3, %vm2167_vm2 }
0x1ee2   :  { %v2163_v63 = vsub.f32 1.0, %v2162_v12 }
0x1ee4   :  { %v2164_v4 = vmul.f32 %v2910_v3, %v2163_v63 }
0x1ee6   :  { %v2165_v27 = vadd.f32 %v2910_v3, %v2164_v4 }
0x1ee8   :  { %v2169_v35 = vsel %vm2168_vm4, %v2910_v3, %v2165_v27 }
0x1ee9   :  { %v2174_v46 = vsel %vm2171_vm5, %v2173_v26, %v2169_v35 }
0x1eea   :  { %v2177_v57 = vmul.f32 %v2174_v46, %v4001_v59 }
0x1ef0   :  { %v2119_v28 = vpop.permute.xlu1 %2118 }
0x1ef1   :  { %v2121_v53 = vmul.f32 %v2119_v28, %v2113_v62 }
0x1ef3   :  { %2123 = vrot.lane.b32.xlu0 %v2121_v53, %s2949_s4 }
0x1f2f   :  { %v2180_v23 = vpop.permute.xlu2 %2179 }
0x1f30   :  { %v2182_v48 = vmul.f32 %v2180_v23, %v2174_v46 }
0x1f32   :  { %2184 = vrot.lane.b32.xlu1 %v2182_v48, %s2949_s4 }
0x1f65   :  { %v2124_v51 = vpop.permute.xlu0 %2123 }
0x1f66   :  { %v3993_v24 = vadd.f32 %v2124_v51, %v2116_v55 }
0x1f68   :  { %2911 = vtanh.f32 %v3993_v24 }
0x1f6e   :  { %v2912_v10 = vpop.eup %2911 }
0x1f6f   :  { %2129 = vrot.lane.b32.xlu2 %v2912_v10, %s2948_s0 }
0x1fa4   :  { %v2185_v0 = vpop.permute.xlu1 %2184 }
0x1fa5   :  { %v4004_v47 = vadd.f32 %v2185_v0, %v2177_v57  ;;  %v4036_v57 = vsel %vm607_vm8, %v3993_v24, %v3990_v17 }
0x1fa7   :  { %2913 = vtanh.f32 %v4004_v47 }
0x1fad   :  { %v2914_v21 = vpop.eup %2913 }
0x1fae   :  { %2190 = vrot.lane.b32.xlu0 %v2914_v21, %s2948_s0 }
0x1fc9   :  { %v2130_v50 = vpop.permute.xlu2 %2129 }
0x1fca   :  { %v2132_v22 = vmul.f32 %v2130_v50, %v2113_v62 }
0x1fcc   :  { %v4011_v18 = vsel %vm607_vm8, %v2132_v22, %v3965_v44 }
0x1fcd   :  { %v2197_v54 = vpack.c.bf16 %v4011_v18, %v4011_v18 }
0x1fcf   :  { %2199 = vrot.lane.b32.xlu1 %v2197_v54, %s2949_s4  ;;  %v4047_v54 = vsel %vm535_vm10, %v4004_v47, %v4001_v59 }
0x2020   :  { %v2191_v6 = vpop.permute.xlu0 %2190 }
0x2021   :  { %v2193_v38 = vmul.f32 %v2191_v6, %v2174_v46 }
0x2023   :  { %v4019_v8 = vsel %vm535_vm10, %v2193_v38, %v3973_v30 }
0x2024   :  { %v2258_v16 = vpack.c.bf16 %v4019_v8, %v4019_v8 }
0x2026   :  { %2260 = vrot.lane.b32.xlu2 %v2258_v16, %s2949_s4 }
0x2041   :  { %v2200_v15 = vpop.permute.xlu1 %2199 }
0x2042   :  { %2656 = vmatmul.msk.bf16.vlgmr.msrb.gmra.mxu0 %vm184_vm13, %v2200_v15 }
0x2080   :  { %v2261_v44 = vpop.permute.xlu2 %2260 }
0x2081   :  { %2658 = vmatmul.msk.bf16.vlgmr.msrb.gmra.mxu1 %vm184_vm13, %v2261_v44 }
0x20bf   :  { %v2213_v14 = vpop.f32.mrf.mxu0 }
0x20c0   :  { %v2217_v9 = vadd.f32 %v2213_v14, %v3749_v11 }
0x20c2   :  { %2915 = vtanh.f32 %v2217_v9  ;;  %v2657_v2 = vmul.f32 -1.442695, %v2217_v9 }
0x20c7   :  { %v2215_v42 = vpop.f32.mrf.mxu0 }
0x20c8   :  { %v2916_v13 = vpop.eup %2915  ;;  %v1398_v42 = vadd.f32 %v3931_v32, %v3721_v39 }
0x20c9   :  { %2240 = vrot.lane.b32.xlu0 %v2916_v13, %s2948_s0 }
0x20fe   :  { %v2274_v30 = vpop.f32.mrf.mxu1 }
0x20ff   :  { %v2278_v56 = vadd.f32 %v2274_v30, %v3728_v61 }
0x2101   :  { %2917 = vtanh.f32 %v2278_v56  ;;  %v2659_v3 = vmul.f32 -1.442695, %v2278_v56 }
0x2102   :  { %2919 = vpow2.f32 %v2657_v2 }
0x2106   :  { %v2276_v37 = vpop.f32.mrf.mxu1 }
0x2107   :  { %v2918_v1 = vpop.eup %2917 }
0x2108   :  { %2301 = vrot.lane.b32.xlu1 %v2918_v1, %s2948_s0  ;;  %v2920_v34 = vpop.eup %2919 }
0x2109   :  { %v2221_v19 = vadd.f32 1.0, %v2920_v34 }
0x210b   :  { %2921 = vrcp.f32 %v2221_v19  ;;  %v2233_v62 = vand.u32 2147483648, %v2221_v19  ;;  %vm2227_vm0 = vweird.f32 %v2221_v19  ;;  %v2231_v28 = vand.u32 2147483647, %v2221_v19 }
0x210c   :  { %2923 = vpow2.f32 %v2659_v3 }
0x210d   :  { %v2234_v53 = vor.u32 1.1754944e-38, %v2233_v62  ;;  %vm2232_vm14 = vcmp.eq.f32.partialorder %v2231_v28, 8.507059e+37 }
0x2111   :  { %v2922_v58 = vpop.eup %2921 }
0x2112   :  { %v2223_v11 = vmul.f32 %v2922_v58, %v2221_v19  ;;  %vm2228_vm15 = vweird.f32 %v2922_v58  ;;  %v2924_v12 = vpop.eup %2923 }
0x2113   :  { %vm2229_vm6 = vmor %vm2227_vm0, %vm2228_vm15  ;;  %v2282_v63 = vadd.f32 1.0, %v2924_v12 }
0x2114   :  { %v2224_v31 = vsub.f32 1.0, %v2223_v11 }
0x2115   :  { %2925 = vrcp.f32 %v2282_v63  ;;  %v2294_v26 = vand.u32 2147483648, %v2282_v63  ;;  %vm2288_vm2 = vweird.f32 %v2282_v63  ;;  %v2292_v23 = vand.u32 2147483647, %v2282_v63 }
0x2116   :  { %v2225_v36 = vmul.f32 %v2922_v58, %v2224_v31 }
0x2117   :  { %v2295_v48 = vor.u32 1.1754944e-38, %v2294_v26  ;;  %vm2293_vm4 = vcmp.eq.f32.partialorder %v2292_v23, 8.507059e+37 }
0x2118   :  { %v2226_v25 = vadd.f32 %v2922_v58, %v2225_v36 }
0x211a   :  { %v2230_v61 = vsel %vm2229_vm6, %v2922_v58, %v2226_v25 }
0x211b   :  { %v2235_v45 = vsel %vm2232_vm14, %v2234_v53, %v2230_v61  ;;  %v2926_v4 = vpop.eup %2925 }
0x211c   :  { %v2284_v27 = vmul.f32 %v2926_v4, %v2282_v63  ;;  %vm2289_vm1 = vweird.f32 %v2926_v4  ;;  %v2238_v0 = vmul.f32 %v2235_v45, %v4036_v57 }
0x211d   :  { %vm2290_vm3 = vmor %vm2288_vm2, %vm2289_vm1 }
0x211e   :  { %v2285_v52 = vsub.f32 1.0, %v2284_v27 }
0x2120   :  { %v2286_v43 = vmul.f32 %v2926_v4, %v2285_v52 }
0x2122   :  { %v2287_v35 = vadd.f32 %v2926_v4, %v2286_v43 }
0x2124   :  { %v2291_v46 = vsel %vm2290_vm3, %v2926_v4, %v2287_v35 }
0x2125   :  { %v2296_v55 = vsel %vm2293_vm4, %v2295_v48, %v2291_v46 }
0x2126   :  { %v2299_v29 = vmul.f32 %v2296_v55, %v4047_v54 }
0x213b   :  { %v2241_v40 = vpop.permute.xlu0 %2240 }
0x213c   :  { %v2243_v7 = vmul.f32 %v2241_v40, %v2235_v45 }
0x213e   :  { %2245 = vrot.lane.b32.xlu2 %v2243_v7, %s2949_s4 }
0x217a   :  { %v2302_v51 = vpop.permute.xlu1 %2301 }
0x217b   :  { %v2304_v10 = vmul.f32 %v2302_v51, %v2296_v55 }
0x217d   :  { %2306 = vrot.lane.b32.xlu0 %v2304_v10, %s2949_s4 }
0x2198   :  { %v2246_v21 = vpop.permute.xlu2 %2245 }
0x2199   :  { %v4039_v50 = vadd.f32 %v2246_v21, %v2238_v0 }
0x219b   :  { %2927 = vtanh.f32 %v4039_v50  ;;  %v2255_v10 = vsel %vm463_vm7, %v4039_v50, %v4036_v57 }
0x21a1   :  { %v2928_v22 = vpop.eup %2927 }
0x21a2   :  { %2251 = vrot.lane.b32.xlu1 %v2928_v22, %s2948_s0 }
0x21ef   :  { %v2307_v17 = vpop.permute.xlu0 %2306 }
0x21f0   :  { %v4050_v24 = vadd.f32 %v2307_v17, %v2299_v29 }
0x21f2   :  { %2929 = vtanh.f32 %v4050_v24  ;;  %v2316_v17 = vsel %vm391_vm9, %v4050_v24, %v4047_v54  ;;  %v2441_v54 = vld [vmem:[%s4137_s8 + $0x10] sm:$0xff]  ;;  %v2440_v24 = vld [vmem:[%s4137_s8 + $0x8] sm:$0xff] }
0x21f3   :  { %2461 = vmatpush.msra.mxu0 %v2441_v54 }
0x21f5   :  { %2462 = vmatpush.msra.mxu0 %v2440_v24 }
0x21f7   :  { %2463 = vmatpush.msra.mxu0 %v2439_v41 }
0x21f8   :  { %v2930_v6 = vpop.eup %2929 }
0x21f9   :  { %2312 = vrot.lane.b32.xlu2 %v2930_v6, %s2948_s0 }
0x2214   :  { %v2252_v38 = vpop.permute.xlu1 %2251 }
0x2215   :  { %v2254_v16 = vmul.f32 %v2252_v38, %v2235_v45 }
0x2217   :  { %v4057_v15 = vsel %vm463_vm7, %v2254_v16, %v4011_v18 }
0x2218   :  { %v2319_v33 = vpack.c.bf16 %v4057_v15, %v4057_v15 }
0x221a   :  { %2321 = vrot.lane.b32.xlu0 %v2319_v33, %s2949_s4 }
0x2253   :  { %v2313_v59 = vpop.permute.xlu2 %2312 }
0x2254   :  { %v2315_v47 = vmul.f32 %v2313_v59, %v2296_v55  ;;  %v2475_v59 = vld [vmem:[%s4137_s8 + $0x38] sm:$0xff] }
0x2255   :  { %2493 = vmatpush.msra.mxu1 %v2475_v59 }
0x2256   :  { %v4065_v44 = vsel %vm391_vm9, %v2315_v47, %v4019_v8  ;;  %v2474_v47 = vld [vmem:[%s4137_s8 + $0x30] sm:$0xff] }
0x2257   :  { %v2379_v14 = vpack.c.bf16 %v4065_v44, %v4065_v44  ;;  %2494 = vmatpush.msra.mxu1 %v2474_v47 }
0x2259   :  { %2381 = vrot.lane.b32.xlu1 %v2379_v14, %s2949_s4 }
0x228c   :  { %v2322_v9 = vpop.permute.xlu0 %2321 }
0x228d   :  { %2660 = vmatmul.msk.bf16.vlgmr.msrb.gmra.mxu2 %vm184_vm13, %v2322_v9  ;;  %v2473_v9 = vld [vmem:[%s4137_s8 + $0x28] sm:$0xff] }
0x228e   :  { %2495 = vmatpush.msra.mxu1 %v2473_v9 }
0x22cb   :  { %v2382_v18 = vpop.permute.xlu1 %2381 }
0x22cc   :  { %2662 = vmatmul.msk.bf16.vlgmr.msrb.gmra.mxu3 %vm184_vm13, %v2382_v18 }
0x2310   :  { %v2335_v13 = vpop.f32.mrf.mxu2 }
0x2311   :  { %v2339_v30 = vadd.f32 %v2335_v13, %v1398_v42  ;;  %v2472_v42 = vld [vmem:[%s4137_s8 + $0x20] sm:$0xff] }
0x2312   :  { %2496 = vmatpush.msra.mxu1 %v2472_v42 }
0x2313   :  { %2931 = vtanh.f32 %v2339_v30  ;;  %v2661_v37 = vmul.f32 -1.442695, %v2339_v30 }
0x2315   :  { %2933 = vpow2.f32 %v2661_v37 }
0x2318   :  { %v2337_v56 = vpop.f32.mrf.mxu2 }
0x2319   :  { %v2932_v8 = vpop.eup %2931 }
0x231a   :  { %2362 = vrot.lane.b32.xlu2 %v2932_v8, %s2948_s0 }
0x231b   :  { %v2934_v34 = vpop.eup %2933 }
0x231c   :  { %v2343_v19 = vadd.f32 1.0, %v2934_v34 }
0x231e   :  { %v2355_v62 = vand.u32 2147483648, %v2343_v19  ;;  %vm2349_vm10 = vweird.f32 %v2343_v19  ;;  %v2353_v28 = vand.u32 2147483647, %v2343_v19 }
0x2320   :  { %vm2354_vm15 = vcmp.eq.f32.partialorder %v2353_v28, 8.507059e+37 }
0x234f   :  { %v2395_v1 = vpop.f32.mrf.mxu3 }
0x2350   :  { %v2399_v2 = vadd.f32 %v2395_v1, %v3724_v20  ;;  %v2356_v20 = vor.u32 1.1754944e-38, %v2355_v62 }
0x2352   :  { %2935 = vtanh.f32 %v2399_v2  ;;  %v2663_v7 = vmul.f32 -1.442695, %v2399_v2 }
0x2353   :  { %2937 = vrcp.f32 %v2343_v19 }
0x2354   :  { %2939 = vpow2.f32 %v2663_v7 }
0x2357   :  { %v2397_v58 = vpop.f32.mrf.mxu3 }
0x2358   :  { %v2936_v11 = vpop.eup %2935 }
0x2359   :  { %2422 = vrot.lane.b32.xlu0 %v2936_v11, %s2948_s0  ;;  %v2938_v39 = vpop.eup %2937 }
0x235a   :  { %v2345_v32 = vmul.f32 %v2938_v39, %v2343_v19  ;;  %vm2350_vm8 = vweird.f32 %v2938_v39  ;;  %v2940_v3 = vpop.eup %2939 }
0x235b   :  { %vm2351_vm5 = vmor %vm2349_vm10, %vm2350_vm8  ;;  %v2403_v12 = vadd.f32 1.0, %v2940_v3 }
0x235c   :  { %v2346_v31 = vsub.f32 1.0, %v2345_v32 }
0x235d   :  { %2941 = vrcp.f32 %v2403_v12  ;;  %v2415_v35 = vand.u32 2147483648, %v2403_v12  ;;  %vm2409_vm6 = vweird.f32 %v2403_v12  ;;  %v2413_v26 = vand.u32 2147483647, %v2403_v12 }
0x235e   :  { %v2347_v36 = vmul.f32 %v2938_v39, %v2346_v31 }
0x235f   :  { %v2416_v46 = vor.u32 1.1754944e-38, %v2415_v35  ;;  %vm2414_vm1 = vcmp.eq.f32.partialorder %v2413_v26, 8.507059e+37 }
0x2360   :  { %v2348_v25 = vadd.f32 %v2938_v39, %v2347_v36 }
0x2362   :  { %v2352_v61 = vsel %vm2351_vm5, %v2938_v39, %v2348_v25 }
0x2363   :  { %v2357_v40 = vsel %vm2354_vm15, %v2356_v20, %v2352_v61  ;;  %v2942_v63 = vpop.eup %2941 }
0x2364   :  { %v2405_v4 = vmul.f32 %v2942_v63, %v2403_v12  ;;  %vm2410_vm0 = vweird.f32 %v2942_v63  ;;  %v2360_v0 = vmul.f32 %v2357_v40, %v2255_v10 }
0x2365   :  { %vm2411_vm14 = vmor %vm2409_vm6, %vm2410_vm0 }
0x2366   :  { %v2406_v27 = vsub.f32 1.0, %v2405_v4 }
0x2368   :  { %v2407_v52 = vmul.f32 %v2942_v63, %v2406_v27 }
0x236a   :  { %v2408_v43 = vadd.f32 %v2942_v63, %v2407_v52 }
0x236c   :  { %v2412_v23 = vsel %vm2411_vm14, %v2942_v63, %v2408_v43 }
0x236d   :  { %v2417_v55 = vsel %vm2414_vm1, %v2416_v46, %v2412_v23 }
0x236e   :  { %v2420_v6 = vmul.f32 %v2417_v55, %v2316_v17 }
0x2374   :  { %v2363_v53 = vpop.permute.xlu2 %2362 }
0x2375   :  { %v2365_v45 = vmul.f32 %v2363_v53, %v2357_v40 }
0x2377   :  { %2367 = vrot.lane.b32.xlu1 %v2365_v45, %s2949_s4 }
0x23cb   :  { %v2423_v48 = vpop.permute.xlu0 %2422 }
0x23cc   :  { %v2425_v51 = vmul.f32 %v2423_v48, %v2417_v55 }
0x23ce   :  { %2427 = vrot.lane.b32.xlu2 %v2425_v51, %s2949_s4 }
0x23e9   :  { %v2368_v21 = vpop.permute.xlu1 %2367 }
0x23ea   :  { %v2370_v22 = vadd.f32 %v2368_v21, %v2360_v0 }
0x23ec   :  { %2943 = vtanh.f32 %v2370_v22 }
0x23f2   :  { %v2944_v29 = vpop.eup %2943 }
0x23f3   :  { %2373 = vrot.lane.b32.xlu0 %v2944_v29, %s2948_s0 }
0x2428   :  { %v2428_v38 = vpop.permute.xlu2 %2427 }
0x2429   :  { %v2430_v16 = vadd.f32 %v2428_v38, %v2420_v6 }
0x242b   :  { %2945 = vtanh.f32 %v2430_v16 }
0x2431   :  { %v2946_v33 = vpop.eup %2945 }
0x2432   :  { %2433 = vrot.lane.b32.xlu1 %v2946_v33, %s2948_s0 }
0x2465   :  { %v2374_v60 = vpop.permute.xlu0 %2373 }
0x2466   :  { %v2376_v57 = vmul.f32 %v2374_v60, %v2357_v40 }
0x2468   :  { %v2377_v50 = vsel %vm319_vm11, %v2376_v57, %v4057_v15  ;;  %vm2502_vm11 = vcmask 23552  }
0x2469   :  { %2444 = vrot.lane.b32.xlu2 %v2377_v50, %s2949_s4 }
0x24a4   :  { %v2434_v15 = vpop.permute.xlu1 %2433 }
0x24a5   :  { %v2436_v14 = vmul.f32 %v2434_v15, %v2417_v55 }
0x24a7   :  { %v2437_v18 = vsel %vm243_vm12, %v2436_v14, %v4065_v44 }
0x24a8   :  { %2477 = vrot.lane.b32.xlu0 %v2437_v18, %s2949_s4 }
0x24c3   :  { %v2445_v13 = vpop.permute.xlu2 %2444 }
0x24c4   :  { %2664 = vmatmul.msk.f32.vlgmr.msra.gmra.mxu0 %vm184_vm13, %v2445_v13 }
0x251a   :  { %v2478_v30 = vpop.permute.xlu0 %2477 }
0x251b   :  { %2665 = vmatmul.msk.f32.vlgmr.msra.gmra.mxu1 %vm184_vm13, %v2478_v30 }
0x2541   :  { %v2465_v44 = vpop.f32.mrf.mxu0 }
0x2542   :  { %v2471_v56 = vadd.f32 %v2690_v49, %v2465_v44 }
0x2598   :  { %v2498_v8 = vpop.f32.mrf.mxu1 }
0x2599   :  { %v2501_v37 = vadd.f32 %v2498_v8, %v2471_v56 }
0x259b   :  { %2503 = vst.msk [vmem:[%s4139_s10] sm:$0xff] %vm2502_vm11, %v2501_v37 }

</bundles_post_ra>
